<compile_context>
chip_gen: v5e
topology: v5e:2x2
jax: 0.10.0
libtpu: 0.0.40
codegen_flags: <defaults>
</compile_context>

<pallas_src>
import functools

import jax
import jax.numpy as jnp
from jax.experimental import pallas as pl
from jax.experimental.pallas import tpu as pltpu


# ----------------------------------------------------------------------------
# In-kernel multi-head self-attention over a batch of sequences
# ----------------------------------------------------------------------------
def _attend(x3, wqkv_b, bqkv_row, wo_b, bo_row, *, num_heads, compute_dtype):
    """MHSA for a batch of sequences.

    x3:       (n_seqs, L, pc) f32
    wqkv_b:   (pc, 3*pc) compute_dtype     bqkv_row: (1, 3*pc) f32
    wo_b:     (pc, pc)   compute_dtype     bo_row:   (1, pc)   f32
    returns:  (n_seqs, L, pc) f32
    """
    n_seqs, seq_len, pc = x3.shape
    hd = pc // num_heads
    scale = float(hd) ** -0.5

    # One MXU matmul projects QKV for every sequence of this branch (bf16 in,
    # f32 accumulate), bias added in f32.
    x2 = x3.reshape(n_seqs * seq_len, pc).astype(compute_dtype)
    qkv = jnp.dot(x2, wqkv_b, preferred_element_type=jnp.float32) + bqkv_row
    qkv3 = qkv.reshape(n_seqs, seq_len, 3 * pc)

    y = None
    for h in range(num_heads):          # static; heads are contiguous col blocks
        q = (qkv3[..., h * hd:(h + 1) * hd] * scale).astype(compute_dtype)
        k = qkv3[..., pc + h * hd:pc + (h + 1) * hd].astype(compute_dtype)
        v = qkv3[..., 2 * pc + h * hd:2 * pc + (h + 1) * hd]
        # Batched matmuls over all sequences (single batch dim).
        s = jnp.einsum('bqd,bkd->bqk', q, k, preferred_element_type=jnp.float32)
        s = s - jnp.max(s, axis=-1, keepdims=True)          # stable softmax, f32
        p = jnp.exp(s)
        p = p * pl.reciprocal(jnp.sum(p, axis=-1, keepdims=True), approx=True)
        o_h = jnp.einsum('bqk,bkd->bqd', p.astype(compute_dtype),
                         v.astype(compute_dtype),
                         preferred_element_type=jnp.float32)
        # Per-head output projection accumulated in f32: no head-concat lane
        # interleave is ever materialized (wo rows are already head-major).
        contrib = jnp.dot(o_h.reshape(n_seqs * seq_len, hd).astype(compute_dtype),
                          wo_b[h * hd:(h + 1) * hd, :],
                          preferred_element_type=jnp.float32)
        y = contrib if y is None else y + contrib
    y = y + bo_row
    return y.reshape(n_seqs, seq_len, pc)


# ----------------------------------------------------------------------------
# Fused kernel: one grid step = b_blk batch elements, all three branches
# ----------------------------------------------------------------------------
def _joint_attn_kernel(x_ref, wqkv_ref, bqkv_ref, wo_ref, bo_ref,
                       ot_ref, os_ref, ost_ref, s_scr,
                       *, b_blk, n, t, id_c, pc, num_heads, compute_dtype):
    xv = x_ref[...]                      # (b_blk, n, t, C): one DMA per step
    c_st = id_c                          # input channel order: [id | st | s | t]
    c_s = id_c + pc
    c_t = id_c + 2 * pc

    # S branch row reorder (n,t)->(t,n) done in VMEM (no HBM transpose copy).
    # Static loops; each iteration is a small strided load + store.
    for bi in range(b_blk):
        for ti in range(t):
            s_scr[bi, ti] = x_ref[bi, :, ti, c_s:c_s + pc]   # (n, pc)

    def branch(x3, idx):
        return _attend(x3, wqkv_ref[idx], bqkv_ref[idx:idx + 1, :],
                       wo_ref[idx], bo_ref[idx:idx + 1, :],
                       num_heads=num_heads, compute_dtype=compute_dtype)

    # temporal: (b*n) sequences of length t
    yt = branch(xv[..., c_t:c_t + pc].reshape(b_blk * n, t, pc), 0)
    # spatial: (b*t) sequences of length n (rows already (b, t, n)-ordered)
    ys = branch(s_scr[...].reshape(b_blk * t, n, pc), 1)
    # joint: b sequences of length n*t
    # TODO(synk): flash-style kv tiling here at production n*t.
    yst = branch(xv[..., c_st:c_st + pc].reshape(b_blk, n * t, pc), 2)

    # Three full-block stores; no in-kernel concat.  The S branch stays in
    # (b, t, n, pc) order; the tail permutation absorbs the un-transpose.
    ot_ref[...] = yt.reshape(b_blk, n, t, pc).astype(ot_ref.dtype)
    os_ref[...] = ys.reshape(b_blk, t, n, pc).astype(os_ref.dtype)
    ost_ref[...] = yst.reshape(b_blk, n, t, pc).astype(ost_ref.dtype)


# ----------------------------------------------------------------------------
# Wrapper
# ----------------------------------------------------------------------------
def joint_attention_forward(x, params, *, in_channels, num_heads, partial,
                            compute_dtype=jnp.bfloat16, b_blk=None):
    b, n, t, c = x.shape
    assert c == in_channels
    assert in_channels % partial == 0, "channel_shuffle needs C % partial == 0"
    pc = int(in_channels * (1.0 / partial))
    id_c = in_channels - 3 * pc
    assert id_c >= 0, "partial must be >= 3 so split_indexes is valid"
    assert pc % num_heads == 0

    if b_blk is None:
        # Fewer, bigger grid steps (amortize ~0.35us/step on single-TC chips)
        # while keeping >=2 steps when possible so both v7x TCs get work.
        b_blk = b if b == 1 else (b // 2 if b % 2 == 0 else 1)
    assert b % b_blk == 0

    # Stack the three branches' weights into 4 small resident VMEM operands.
    # Matmul operands in compute_dtype (bf16 on the MXU); biases stay f32.
    wqkv = jnp.stack([params["T"][0], params["S"][0], params["ST"][0]]).astype(compute_dtype)
    bqkv = jnp.stack([params["T"][1], params["S"][1], params["ST"][1]]).astype(jnp.float32)
    wo = jnp.stack([params["T"][2], params["S"][2], params["ST"][2]]).astype(compute_dtype)
    bo = jnp.stack([params["T"][3], params["S"][3], params["ST"][3]]).astype(jnp.float32)

    kern = functools.partial(_joint_attn_kernel, b_blk=b_blk, n=n, t=t,
                             id_c=id_c, pc=pc, num_heads=num_heads,
                             compute_dtype=compute_dtype)

    o_t, o_s, o_st = pl.pallas_call(
        kern,
        out_shape=(jax.ShapeDtypeStruct((b, n, t, pc), x.dtype),
                   jax.ShapeDtypeStruct((b, t, n, pc), x.dtype),
                   jax.ShapeDtypeStruct((b, n, t, pc), x.dtype)),
        grid=(b // b_blk,),
        in_specs=[
            # One input DMA per step: the raw (n, t, C) slab of this batch
            # block; the T/S/ST channel split happens inside the kernel, so no
            # wrapper-side slice / transpose copies ever hit HBM.
            pl.BlockSpec((b_blk, n, t, c), lambda i: (i, 0, 0, 0)),
            # Branch weights: constant index maps -> fetched once, resident.
            pl.BlockSpec((3, pc, 3 * pc), lambda i: (0, 0, 0)),
            pl.BlockSpec((3, 3 * pc), lambda i: (0, 0)),
            pl.BlockSpec((3, pc, pc), lambda i: (0, 0, 0)),
            pl.BlockSpec((3, pc), lambda i: (0, 0)),
        ],
        out_specs=(
            pl.BlockSpec((b_blk, n, t, pc), lambda i: (i, 0, 0, 0)),
            pl.BlockSpec((b_blk, t, n, pc), lambda i: (i, 0, 0, 0)),
            pl.BlockSpec((b_blk, n, t, pc), lambda i: (i, 0, 0, 0)),
        ),
        scratch_shapes=[pltpu.VMEM((b_blk, t, n, pc), jnp.float32)],
        compiler_params=pltpu.CompilerParams(
            dimension_semantics=("parallel",)),
    )(x, wqkv, bqkv, wo, bo)

    # Tail: channel_shuffle(concat(id,t,s,st).permute(0,3,1,2), partial) is a
    # static per-group channel permutation.  Group g of the shuffled output is
    # exactly one pc-wide source block, so the whole tail collapses into a few
    # pc-wide transposes feeding one stack/reshape (XLA fuses into one copy):
    #   g < partial-3 : identity channels straight from x (never copied
    #                   through the kernel),
    #   g = partial-3 : T branch,
    #   g = partial-2 : S branch (this transpose also absorbs its (t,n) order),
    #   g = partial-1 : ST branch.
    blocks = [jnp.transpose(x[..., g * pc:(g + 1) * pc], (0, 3, 1, 2))
              for g in range(partial - 3)]
    blocks.append(jnp.transpose(o_t, (0, 3, 1, 2)))      # (B, pc, N, T)
    blocks.append(jnp.transpose(o_s, (0, 3, 2, 1)))      # (B, pc, N, T)
    blocks.append(jnp.transpose(o_st, (0, 3, 1, 2)))     # (B, pc, N, T)
    out = jnp.stack(blocks, axis=2)                      # (B, pc, partial, N, T)
    return out.reshape(b, in_channels, n, t)             # shuffled (B, C, N, T)


# ----------------------------------------------------------------------------
# Pure-JAX reference (sanity check of the Pallas path)
# ----------------------------------------------------------------------------
def channel_shuffle(x, groups):
    # x: (B, C, H, W) — standard ShuffleNet channel shuffle.
    b, c, h, w = x.shape
    x = x.reshape(b, groups, c // groups, h, w)
    x = jnp.transpose(x, (0, 2, 1, 3, 4))
    return x.reshape(b, c, h, w)


def mhsa_ref(x, params, num_heads):
    B, L, D = x.shape
    wqkv, bqkv, wo, bo = params
    hd = D // num_heads
    qkv = x @ wqkv + bqkv
    q, k, v = qkv[..., :D], qkv[..., D:2 * D], qkv[..., 2 * D:]

    def heads(a):
        return a.reshape(B, L, num_heads, hd).transpose(0, 2, 1, 3)

    q, k, v = heads(q) * (hd ** -0.5), heads(k), heads(v)
    s = jnp.einsum("bhqd,bhkd->bhqk", q, k)
    p = jax.nn.softmax(s, axis=-1)
    o = jnp.einsum("bhqk,bhkd->bhqd", p, v)
    o = o.transpose(0, 2, 1, 3).reshape(B, L, D)
    return o @ wo + bo


def joint_attention_ref(x, params, *, in_channels, num_heads, partial):
    b, n, t, c = x.shape
    pc = int(in_channels * (1.0 / partial))
    id_c = in_channels - 3 * pc
    x_id = x[..., :id_c]
    x_st = x[..., id_c:id_c + pc]
    x_s = x[..., id_c + pc:id_c + 2 * pc]
    x_t = x[..., id_c + 2 * pc:]
    t_x = mhsa_ref(x_t.reshape(b * n, t, pc), params["T"], num_heads).reshape(b, n, t, pc)
    s_x = mhsa_ref(jnp.transpose(x_s, (0, 2, 1, 3)).reshape(b * t, n, pc),
                   params["S"], num_heads).reshape(b, t, n, pc)
    s_x = jnp.transpose(s_x, (0, 2, 1, 3))
    st_x = mhsa_ref(x_st.reshape(b, n * t, pc), params["ST"], num_heads).reshape(b, n, t, pc)
    out = jnp.concatenate((x_id, t_x, s_x, st_x), axis=3)
    out = jnp.transpose(out, (0, 3, 1, 2))
    return channel_shuffle(out, partial)


# ----------------------------------------------------------------------------
# Deterministic parameter init (synthetic — shapes per AttentionBlock(dim=pc))
# ----------------------------------------------------------------------------
def init_attention_params(key, dim):
    k1, k2, k3, k4 = jax.random.split(key, 4)
    wqkv = 0.05 * jax.random.normal(k1, (dim, 3 * dim), jnp.float32)
    bqkv = 0.01 * jax.random.normal(k2, (3 * dim,), jnp.float32)
    wo = 0.05 * jax.random.normal(k3, (dim, dim), jnp.float32)
    bo = 0.01 * jax.random.normal(k4, (dim,), jnp.float32)
    return (wqkv, bqkv, wo, bo)


if __name__ == "__main__":
    # Small, module-consistent shapes: x is [B, N, T, C].
    B, N, T, C = 2, 8, 8, 32
    NUM_HEADS = 2
    PARTIAL = 4          # pc = C / 4 = 8, split = (8, 8, 8, 8)

    key = jax.random.PRNGKey(0)
    kx, kt, ks, kst = jax.random.split(key, 4)
    x = jax.random.normal(kx, (B, N, T, C), jnp.float32)

    pc = int(C * (1.0 / PARTIAL))
    params = {
        "T": init_attention_params(kt, pc),
        "S": init_attention_params(ks, pc),
        "ST": init_attention_params(kst, pc),
    }

    fwd = jax.jit(functools.partial(joint_attention_forward, in_channels=C,
                                    num_heads=NUM_HEADS, partial=PARTIAL))
    out = jax.block_until_ready(fwd(x, params))
    assert out.shape == (B, C, N, T), out.shape

    ref = joint_attention_ref(x, params, in_channels=C,
                              num_heads=NUM_HEADS, partial=PARTIAL)
    ref = jax.block_until_ready(ref)
    assert jnp.allclose(out, ref, atol=5e-2, rtol=5e-2), \
        float(jnp.max(jnp.abs(out - ref)))

    print("KERNEL_OK")
</pallas_src>

<mosaic_0001>
module attributes {stable_mosaic.version = 11 : i64} {
  func.func @_joint_attn_kernel(%arg0: i32, %arg1: memref<1x8x8x32xf32, #tpu.memory_space<vmem>>, %arg2: memref<3x8x24xbf16, #tpu.memory_space<vmem>>, %arg3: memref<3x24xf32, #tpu.memory_space<vmem>>, %arg4: memref<3x8x8xbf16, #tpu.memory_space<vmem>>, %arg5: memref<3x8xf32, #tpu.memory_space<vmem>>, %arg6: memref<1x8x8x8xf32, #tpu.memory_space<vmem>>, %arg7: memref<1x8x8x8xf32, #tpu.memory_space<vmem>>, %arg8: memref<1x8x8x8xf32, #tpu.memory_space<vmem>>, %arg9: memref<1x8x8x8xf32, #tpu.memory_space<vmem>>) attributes {dimension_semantics = [#tpu.dimension_semantics<parallel>], iteration_bounds = array<i64: 2>, scalar_prefetch = 0 : i64, scratch_operands = 1 : i64, tpu.core_type = #tpu.core_type<tc>, window_params = [{transform_indices = @transform_0, window_bounds = array<i64: 1, 8, 8, 32>}, {pipeline_mode = #tpu.pipeline_mode<synchronous>, transform_indices = @transform_1, window_bounds = array<i64: 3, 8, 24>}, {pipeline_mode = #tpu.pipeline_mode<synchronous>, transform_indices = @transform_2, window_bounds = array<i64: 3, 24>}, {pipeline_mode = #tpu.pipeline_mode<synchronous>, transform_indices = @transform_3, window_bounds = array<i64: 3, 8, 8>}, {pipeline_mode = #tpu.pipeline_mode<synchronous>, transform_indices = @transform_4, window_bounds = array<i64: 3, 8>}, {transform_indices = @transform_5, window_bounds = array<i64: 1, 8, 8, 8>}, {transform_indices = @transform_6, window_bounds = array<i64: 1, 8, 8, 8>}, {transform_indices = @transform_7, window_bounds = array<i64: 1, 8, 8, 8>}]} {
    %c0 = arith.constant 0 : index
    %c0_0 = arith.constant 0 : index
    %c0_1 = arith.constant 0 : index
    %c0_2 = arith.constant 0 : index
    %0 = vector.load %arg1[%c0, %c0_0, %c0_1, %c0_2] : memref<1x8x8x32xf32, #tpu.memory_space<vmem>>, vector<1x8x8x32xf32>
    %c0_3 = arith.constant 0 : index
    %c0_4 = arith.constant 0 : index
    %c0_5 = arith.constant 0 : index
    %c16 = arith.constant 16 : index
    %1 = vector.load %arg1[%c0_3, %c0_4, %c0_5, %c16] : memref<1x8x8x32xf32, #tpu.memory_space<vmem>>, vector<1x8x1x8xf32>
    %2 = vector.shape_cast %1 : vector<1x8x1x8xf32> to vector<8x8xf32>
    %c0_6 = arith.constant 0 : index
    %c0_7 = arith.constant 0 : index
    %c0_8 = arith.constant 0 : index
    %c0_9 = arith.constant 0 : index
    %3 = vector.load %arg9[%c0_6, %c0_7, %c0_8, %c0_9] : memref<1x8x8x8xf32, #tpu.memory_space<vmem>>, vector<1x1x8x8xf32>
    %4 = vector.shape_cast %3 : vector<1x1x8x8xf32> to vector<8x8xf32>
    %5 = vector.shape_cast %2 : vector<8x8xf32> to vector<1x1x8x8xf32>
    tpu.vector_store %arg9[%c0_6, %c0_7, %c0_8, %c0_9], %5 {strides = array<i32>} : memref<1x8x8x8xf32, #tpu.memory_space<vmem>>, vector<1x1x8x8xf32>,
    %c0_10 = arith.constant 0 : index
    %c0_11 = arith.constant 0 : index
    %c1 = arith.constant 1 : index
    %c16_12 = arith.constant 16 : index
    %6 = vector.load %arg1[%c0_10, %c0_11, %c1, %c16_12] : memref<1x8x8x32xf32, #tpu.memory_space<vmem>>, vector<1x8x1x8xf32>
    %7 = vector.shape_cast %6 : vector<1x8x1x8xf32> to vector<8x8xf32>
    %c0_13 = arith.constant 0 : index
    %c1_14 = arith.constant 1 : index
    %c0_15 = arith.constant 0 : index
    %c0_16 = arith.constant 0 : index
    %8 = vector.load %arg9[%c0_13, %c1_14, %c0_15, %c0_16] : memref<1x8x8x8xf32, #tpu.memory_space<vmem>>, vector<1x1x8x8xf32>
    %9 = vector.shape_cast %8 : vector<1x1x8x8xf32> to vector<8x8xf32>
    %10 = vector.shape_cast %7 : vector<8x8xf32> to vector<1x1x8x8xf32>
    tpu.vector_store %arg9[%c0_13, %c1_14, %c0_15, %c0_16], %10 {strides = array<i32>} : memref<1x8x8x8xf32, #tpu.memory_space<vmem>>, vector<1x1x8x8xf32>,
    %c0_17 = arith.constant 0 : index
    %c0_18 = arith.constant 0 : index
    %c2 = arith.constant 2 : index
    %c16_19 = arith.constant 16 : index
    %11 = vector.load %arg1[%c0_17, %c0_18, %c2, %c16_19] : memref<1x8x8x32xf32, #tpu.memory_space<vmem>>, vector<1x8x1x8xf32>
    %12 = vector.shape_cast %11 : vector<1x8x1x8xf32> to vector<8x8xf32>
    %c0_20 = arith.constant 0 : index
    %c2_21 = arith.constant 2 : index
    %c0_22 = arith.constant 0 : index
    %c0_23 = arith.constant 0 : index
    %13 = vector.load %arg9[%c0_20, %c2_21, %c0_22, %c0_23] : memref<1x8x8x8xf32, #tpu.memory_space<vmem>>, vector<1x1x8x8xf32>
    %14 = vector.shape_cast %13 : vector<1x1x8x8xf32> to vector<8x8xf32>
    %15 = vector.shape_cast %12 : vector<8x8xf32> to vector<1x1x8x8xf32>
    tpu.vector_store %arg9[%c0_20, %c2_21, %c0_22, %c0_23], %15 {strides = array<i32>} : memref<1x8x8x8xf32, #tpu.memory_space<vmem>>, vector<1x1x8x8xf32>,
    %c0_24 = arith.constant 0 : index
    %c0_25 = arith.constant 0 : index
    %c3 = arith.constant 3 : index
    %c16_26 = arith.constant 16 : index
    %16 = vector.load %arg1[%c0_24, %c0_25, %c3, %c16_26] : memref<1x8x8x32xf32, #tpu.memory_space<vmem>>, vector<1x8x1x8xf32>
    %17 = vector.shape_cast %16 : vector<1x8x1x8xf32> to vector<8x8xf32>
    %c0_27 = arith.constant 0 : index
    %c3_28 = arith.constant 3 : index
    %c0_29 = arith.constant 0 : index
    %c0_30 = arith.constant 0 : index
    %18 = vector.load %arg9[%c0_27, %c3_28, %c0_29, %c0_30] : memref<1x8x8x8xf32, #tpu.memory_space<vmem>>, vector<1x1x8x8xf32>
    %19 = vector.shape_cast %18 : vector<1x1x8x8xf32> to vector<8x8xf32>
    %20 = vector.shape_cast %17 : vector<8x8xf32> to vector<1x1x8x8xf32>
    tpu.vector_store %arg9[%c0_27, %c3_28, %c0_29, %c0_30], %20 {strides = array<i32>} : memref<1x8x8x8xf32, #tpu.memory_space<vmem>>, vector<1x1x8x8xf32>,
    %c0_31 = arith.constant 0 : index
    %c0_32 = arith.constant 0 : index
    %c4 = arith.constant 4 : index
    %c16_33 = arith.constant 16 : index
    %21 = vector.load %arg1[%c0_31, %c0_32, %c4, %c16_33] : memref<1x8x8x32xf32, #tpu.memory_space<vmem>>, vector<1x8x1x8xf32>
    %22 = vector.shape_cast %21 : vector<1x8x1x8xf32> to vector<8x8xf32>
    %c0_34 = arith.constant 0 : index
    %c4_35 = arith.constant 4 : index
    %c0_36 = arith.constant 0 : index
    %c0_37 = arith.constant 0 : index
    %23 = vector.load %arg9[%c0_34, %c4_35, %c0_36, %c0_37] : memref<1x8x8x8xf32, #tpu.memory_space<vmem>>, vector<1x1x8x8xf32>
    %24 = vector.shape_cast %23 : vector<1x1x8x8xf32> to vector<8x8xf32>
    %25 = vector.shape_cast %22 : vector<8x8xf32> to vector<1x1x8x8xf32>
    tpu.vector_store %arg9[%c0_34, %c4_35, %c0_36, %c0_37], %25 {strides = array<i32>} : memref<1x8x8x8xf32, #tpu.memory_space<vmem>>, vector<1x1x8x8xf32>,
    %c0_38 = arith.constant 0 : index
    %c0_39 = arith.constant 0 : index
    %c5 = arith.constant 5 : index
    %c16_40 = arith.constant 16 : index
    %26 = vector.load %arg1[%c0_38, %c0_39, %c5, %c16_40] : memref<1x8x8x32xf32, #tpu.memory_space<vmem>>, vector<1x8x1x8xf32>
    %27 = vector.shape_cast %26 : vector<1x8x1x8xf32> to vector<8x8xf32>
    %c0_41 = arith.constant 0 : index
    %c5_42 = arith.constant 5 : index
    %c0_43 = arith.constant 0 : index
    %c0_44 = arith.constant 0 : index
    %28 = vector.load %arg9[%c0_41, %c5_42, %c0_43, %c0_44] : memref<1x8x8x8xf32, #tpu.memory_space<vmem>>, vector<1x1x8x8xf32>
    %29 = vector.shape_cast %28 : vector<1x1x8x8xf32> to vector<8x8xf32>
    %30 = vector.shape_cast %27 : vector<8x8xf32> to vector<1x1x8x8xf32>
    tpu.vector_store %arg9[%c0_41, %c5_42, %c0_43, %c0_44], %30 {strides = array<i32>} : memref<1x8x8x8xf32, #tpu.memory_space<vmem>>, vector<1x1x8x8xf32>,
    %c0_45 = arith.constant 0 : index
    %c0_46 = arith.constant 0 : index
    %c6 = arith.constant 6 : index
    %c16_47 = arith.constant 16 : index
    %31 = vector.load %arg1[%c0_45, %c0_46, %c6, %c16_47] : memref<1x8x8x32xf32, #tpu.memory_space<vmem>>, vector<1x8x1x8xf32>
    %32 = vector.shape_cast %31 : vector<1x8x1x8xf32> to vector<8x8xf32>
    %c0_48 = arith.constant 0 : index
    %c6_49 = arith.constant 6 : index
    %c0_50 = arith.constant 0 : index
    %c0_51 = arith.constant 0 : index
    %33 = vector.load %arg9[%c0_48, %c6_49, %c0_50, %c0_51] : memref<1x8x8x8xf32, #tpu.memory_space<vmem>>, vector<1x1x8x8xf32>
    %34 = vector.shape_cast %33 : vector<1x1x8x8xf32> to vector<8x8xf32>
    %35 = vector.shape_cast %32 : vector<8x8xf32> to vector<1x1x8x8xf32>
    tpu.vector_store %arg9[%c0_48, %c6_49, %c0_50, %c0_51], %35 {strides = array<i32>} : memref<1x8x8x8xf32, #tpu.memory_space<vmem>>, vector<1x1x8x8xf32>,
    %c0_52 = arith.constant 0 : index
    %c0_53 = arith.constant 0 : index
    %c7 = arith.constant 7 : index
    %c16_54 = arith.constant 16 : index
    %36 = vector.load %arg1[%c0_52, %c0_53, %c7, %c16_54] : memref<1x8x8x32xf32, #tpu.memory_space<vmem>>, vector<1x8x1x8xf32>
    %37 = vector.shape_cast %36 : vector<1x8x1x8xf32> to vector<8x8xf32>
    %c0_55 = arith.constant 0 : index
    %c7_56 = arith.constant 7 : index
    %c0_57 = arith.constant 0 : index
    %c0_58 = arith.constant 0 : index
    %38 = vector.load %arg9[%c0_55, %c7_56, %c0_57, %c0_58] : memref<1x8x8x8xf32, #tpu.memory_space<vmem>>, vector<1x1x8x8xf32>
    %39 = vector.shape_cast %38 : vector<1x1x8x8xf32> to vector<8x8xf32>
    %40 = vector.shape_cast %37 : vector<8x8xf32> to vector<1x1x8x8xf32>
    tpu.vector_store %arg9[%c0_55, %c7_56, %c0_57, %c0_58], %40 {strides = array<i32>} : memref<1x8x8x8xf32, #tpu.memory_space<vmem>>, vector<1x1x8x8xf32>,
    %41 = vector.extract_strided_slice %0 {offsets = [0, 0, 0, 24], sizes = [1, 8, 8, 8], strides = [1, 1, 1, 1]} : vector<1x8x8x32xf32> to vector<1x8x8x8xf32>
    %42 = vector.shape_cast %41 : vector<1x8x8x8xf32> to vector<8x8x8xf32>
    %c0_59 = arith.constant 0 : index
    %c0_60 = arith.constant 0 : index
    %c0_61 = arith.constant 0 : index
    %43 = vector.load %arg2[%c0_59, %c0_60, %c0_61] : memref<3x8x24xbf16, #tpu.memory_space<vmem>>, vector<1x8x24xbf16>
    %44 = vector.shape_cast %43 : vector<1x8x24xbf16> to vector<8x24xbf16>
    %c0_62 = arith.constant 0 : index
    %c0_63 = arith.constant 0 : index
    %45 = vector.load %arg3[%c0_62, %c0_63] : memref<3x24xf32, #tpu.memory_space<vmem>>, vector<1x24xf32>
    %c0_64 = arith.constant 0 : index
    %c0_65 = arith.constant 0 : index
    %c0_66 = arith.constant 0 : index
    %46 = vector.load %arg4[%c0_64, %c0_65, %c0_66] : memref<3x8x8xbf16, #tpu.memory_space<vmem>>, vector<1x8x8xbf16>
    %47 = vector.shape_cast %46 : vector<1x8x8xbf16> to vector<8x8xbf16>
    %c0_67 = arith.constant 0 : index
    %c0_68 = arith.constant 0 : index
    %48 = vector.load %arg5[%c0_67, %c0_68] : memref<3x8xf32, #tpu.memory_space<vmem>>, vector<1x8xf32>
    %49 = vector.shape_cast %42 : vector<8x8x8xf32> to vector<64x8xf32>
    %50 = arith.truncf %49 : vector<64x8xf32> to vector<64x8xbf16>
    %cst = arith.constant dense<0.000000e+00> : vector<64x24xf32>
    %51 = tpu.matmul %50, %44, %cst {dimension_numbers = #tpu.dot_dimension_numbers<[1], [0], [0], [1], [0, 0, 1, 1], [], []>} : vector<64x8xbf16>, vector<8x24xbf16>, vector<64x24xf32> -> vector<64x24xf32>
    %52 = vector.broadcast %45 : vector<1x24xf32> to vector<64x24xf32>
    %53 = arith.addf %51, %52 : vector<64x24xf32>
    %54 = vector.shape_cast %53 : vector<64x24xf32> to vector<8x8x24xf32>
    %55 = vector.extract_strided_slice %54 {offsets = [0, 0, 0], sizes = [8, 8, 4], strides = [1, 1, 1]} : vector<8x8x24xf32> to vector<8x8x4xf32>
    %cst_69 = arith.constant 5.000000e-01 : f32
    %56 = vector.broadcast %cst_69 : f32 to vector<8x8x4xf32>
    %57 = arith.mulf %55, %56 : vector<8x8x4xf32>
    %58 = arith.truncf %57 : vector<8x8x4xf32> to vector<8x8x4xbf16>
    %59 = vector.extract_strided_slice %54 {offsets = [0, 0, 8], sizes = [8, 8, 4], strides = [1, 1, 1]} : vector<8x8x24xf32> to vector<8x8x4xf32>
    %60 = arith.truncf %59 : vector<8x8x4xf32> to vector<8x8x4xbf16>
    %61 = vector.extract_strided_slice %54 {offsets = [0, 0, 16], sizes = [8, 8, 4], strides = [1, 1, 1]} : vector<8x8x24xf32> to vector<8x8x4xf32>
    "tpu.trace_start"() <{level = 10 : i32, message = "bqd,bkd->bqk"}> : () -> ()
    %cst_70 = arith.constant dense<0.000000e+00> : vector<8x8x8xf32>
    %62 = tpu.matmul %58, %60, %cst_70 {dimension_numbers = #tpu.dot_dimension_numbers<[2], [2], [1], [1], [0, 0, 0, 1, 1, 1], [0], [0]>} : vector<8x8x4xbf16>, vector<8x8x4xbf16>, vector<8x8x8xf32> -> vector<8x8x8xf32>
    "tpu.trace_stop"() : () -> ()
    %cst_71 = arith.constant dense<0xFF800000> : vector<8x8xf32>
    %63 = vector.multi_reduction <maximumf>, %62, %cst_71 [2] : vector<8x8x8xf32> to vector<8x8xf32>
    %64 = vector.shape_cast %63 : vector<8x8xf32> to vector<8x8x1xf32>
    %65 = vector.broadcast %64 : vector<8x8x1xf32> to vector<8x8x8xf32>
    %66 = arith.subf %62, %65 : vector<8x8x8xf32>
    %67 = math.exp %66 : vector<8x8x8xf32>
    %cst_72 = arith.constant dense<0.000000e+00> : vector<8x8xf32>
    %68 = vector.multi_reduction <add>, %67, %cst_72 [2] : vector<8x8x8xf32> to vector<8x8xf32>
    %69 = vector.shape_cast %68 : vector<8x8xf32> to vector<8x8x1xf32>
    %70 = tpu.reciprocal %69 {approx = true} : vector<8x8x1xf32> -> vector<8x8x1xf32>
    %71 = vector.broadcast %70 : vector<8x8x1xf32> to vector<8x8x8xf32>
    %72 = arith.mulf %67, %71 : vector<8x8x8xf32>
    %73 = arith.truncf %72 : vector<8x8x8xf32> to vector<8x8x8xbf16>
    %74 = arith.truncf %61 : vector<8x8x4xf32> to vector<8x8x4xbf16>
    "tpu.trace_start"() <{level = 10 : i32, message = "bqk,bkd->bqd"}> : () -> ()
    %cst_73 = arith.constant dense<0.000000e+00> : vector<8x8x4xf32>
    %75 = tpu.matmul %73, %74, %cst_73 {dimension_numbers = #tpu.dot_dimension_numbers<[2], [1], [1], [2], [0, 0, 0, 1, 1, 2], [0], [0]>} : vector<8x8x8xbf16>, vector<8x8x4xbf16>, vector<8x8x4xf32> -> vector<8x8x4xf32>
    "tpu.trace_stop"() : () -> ()
    %76 = vector.shape_cast %75 : vector<8x8x4xf32> to vector<64x4xf32>
    %77 = arith.truncf %76 : vector<64x4xf32> to vector<64x4xbf16>
    %78 = vector.extract_strided_slice %47 {offsets = [0, 0], sizes = [4, 8], strides = [1, 1]} : vector<8x8xbf16> to vector<4x8xbf16>
    %cst_74 = arith.constant dense<0.000000e+00> : vector<64x8xf32>
    %79 = tpu.matmul %77, %78, %cst_74 {dimension_numbers = #tpu.dot_dimension_numbers<[1], [0], [0], [1], [0, 0, 1, 1], [], []>} : vector<64x4xbf16>, vector<4x8xbf16>, vector<64x8xf32> -> vector<64x8xf32>
    %80 = vector.extract_strided_slice %54 {offsets = [0, 0, 4], sizes = [8, 8, 4], strides = [1, 1, 1]} : vector<8x8x24xf32> to vector<8x8x4xf32>
    %cst_75 = arith.constant 5.000000e-01 : f32
    %81 = vector.broadcast %cst_75 : f32 to vector<8x8x4xf32>
    %82 = arith.mulf %80, %81 : vector<8x8x4xf32>
    %83 = arith.truncf %82 : vector<8x8x4xf32> to vector<8x8x4xbf16>
    %84 = vector.extract_strided_slice %54 {offsets = [0, 0, 12], sizes = [8, 8, 4], strides = [1, 1, 1]} : vector<8x8x24xf32> to vector<8x8x4xf32>
    %85 = arith.truncf %84 : vector<8x8x4xf32> to vector<8x8x4xbf16>
    %86 = vector.extract_strided_slice %54 {offsets = [0, 0, 20], sizes = [8, 8, 4], strides = [1, 1, 1]} : vector<8x8x24xf32> to vector<8x8x4xf32>
    "tpu.trace_start"() <{level = 10 : i32, message = "bqd,bkd->bqk"}> : () -> ()
    %cst_76 = arith.constant dense<0.000000e+00> : vector<8x8x8xf32>
    %87 = tpu.matmul %83, %85, %cst_76 {dimension_numbers = #tpu.dot_dimension_numbers<[2], [2], [1], [1], [0, 0, 0, 1, 1, 1], [0], [0]>} : vector<8x8x4xbf16>, vector<8x8x4xbf16>, vector<8x8x8xf32> -> vector<8x8x8xf32>
    "tpu.trace_stop"() : () -> ()
    %cst_77 = arith.constant dense<0xFF800000> : vector<8x8xf32>
    %88 = vector.multi_reduction <maximumf>, %87, %cst_77 [2] : vector<8x8x8xf32> to vector<8x8xf32>
    %89 = vector.shape_cast %88 : vector<8x8xf32> to vector<8x8x1xf32>
    %90 = vector.broadcast %89 : vector<8x8x1xf32> to vector<8x8x8xf32>
    %91 = arith.subf %87, %90 : vector<8x8x8xf32>
    %92 = math.exp %91 : vector<8x8x8xf32>
    %cst_78 = arith.constant dense<0.000000e+00> : vector<8x8xf32>
    %93 = vector.multi_reduction <add>, %92, %cst_78 [2] : vector<8x8x8xf32> to vector<8x8xf32>
    %94 = vector.shape_cast %93 : vector<8x8xf32> to vector<8x8x1xf32>
    %95 = tpu.reciprocal %94 {approx = true} : vector<8x8x1xf32> -> vector<8x8x1xf32>
    %96 = vector.broadcast %95 : vector<8x8x1xf32> to vector<8x8x8xf32>
    %97 = arith.mulf %92, %96 : vector<8x8x8xf32>
    %98 = arith.truncf %97 : vector<8x8x8xf32> to vector<8x8x8xbf16>
    %99 = arith.truncf %86 : vector<8x8x4xf32> to vector<8x8x4xbf16>
    "tpu.trace_start"() <{level = 10 : i32, message = "bqk,bkd->bqd"}> : () -> ()
    %cst_79 = arith.constant dense<0.000000e+00> : vector<8x8x4xf32>
    %100 = tpu.matmul %98, %99, %cst_79 {dimension_numbers = #tpu.dot_dimension_numbers<[2], [1], [1], [2], [0, 0, 0, 1, 1, 2], [0], [0]>} : vector<8x8x8xbf16>, vector<8x8x4xbf16>, vector<8x8x4xf32> -> vector<8x8x4xf32>
    "tpu.trace_stop"() : () -> ()
    %101 = vector.shape_cast %100 : vector<8x8x4xf32> to vector<64x4xf32>
    %102 = arith.truncf %101 : vector<64x4xf32> to vector<64x4xbf16>
    %103 = vector.extract_strided_slice %47 {offsets = [4, 0], sizes = [4, 8], strides = [1, 1]} : vector<8x8xbf16> to vector<4x8xbf16>
    %cst_80 = arith.constant dense<0.000000e+00> : vector<64x8xf32>
    %104 = tpu.matmul %102, %103, %cst_80 {dimension_numbers = #tpu.dot_dimension_numbers<[1], [0], [0], [1], [0, 0, 1, 1], [], []>} : vector<64x4xbf16>, vector<4x8xbf16>, vector<64x8xf32> -> vector<64x8xf32>
    %105 = arith.addf %79, %104 : vector<64x8xf32>
    %106 = vector.broadcast %48 : vector<1x8xf32> to vector<64x8xf32>
    %107 = arith.addf %105, %106 : vector<64x8xf32>
    %108 = vector.shape_cast %107 : vector<64x8xf32> to vector<8x8x8xf32>
    %c0_81 = arith.constant 0 : index
    %c0_82 = arith.constant 0 : index
    %c0_83 = arith.constant 0 : index
    %c0_84 = arith.constant 0 : index
    %109 = vector.load %arg9[%c0_81, %c0_82, %c0_83, %c0_84] : memref<1x8x8x8xf32, #tpu.memory_space<vmem>>, vector<1x8x8x8xf32>
    %110 = vector.shape_cast %109 : vector<1x8x8x8xf32> to vector<8x8x8xf32>
    %c1_85 = arith.constant 1 : index
    %c0_86 = arith.constant 0 : index
    %c0_87 = arith.constant 0 : index
    %111 = vector.load %arg2[%c1_85, %c0_86, %c0_87] : memref<3x8x24xbf16, #tpu.memory_space<vmem>>, vector<1x8x24xbf16>
    %112 = vector.shape_cast %111 : vector<1x8x24xbf16> to vector<8x24xbf16>
    %c1_88 = arith.constant 1 : index
    %c0_89 = arith.constant 0 : index
    %113 = vector.load %arg3[%c1_88, %c0_89] : memref<3x24xf32, #tpu.memory_space<vmem>>, vector<1x24xf32>
    %c1_90 = arith.constant 1 : index
    %c0_91 = arith.constant 0 : index
    %c0_92 = arith.constant 0 : index
    %114 = vector.load %arg4[%c1_90, %c0_91, %c0_92] : memref<3x8x8xbf16, #tpu.memory_space<vmem>>, vector<1x8x8xbf16>
    %115 = vector.shape_cast %114 : vector<1x8x8xbf16> to vector<8x8xbf16>
    %c1_93 = arith.constant 1 : index
    %c0_94 = arith.constant 0 : index
    %116 = vector.load %arg5[%c1_93, %c0_94] : memref<3x8xf32, #tpu.memory_space<vmem>>, vector<1x8xf32>
    %117 = vector.shape_cast %110 : vector<8x8x8xf32> to vector<64x8xf32>
    %118 = arith.truncf %117 : vector<64x8xf32> to vector<64x8xbf16>
    %cst_95 = arith.constant dense<0.000000e+00> : vector<64x24xf32>
    %119 = tpu.matmul %118, %112, %cst_95 {dimension_numbers = #tpu.dot_dimension_numbers<[1], [0], [0], [1], [0, 0, 1, 1], [], []>} : vector<64x8xbf16>, vector<8x24xbf16>, vector<64x24xf32> -> vector<64x24xf32>
    %120 = vector.broadcast %113 : vector<1x24xf32> to vector<64x24xf32>
    %121 = arith.addf %119, %120 : vector<64x24xf32>
    %122 = vector.shape_cast %121 : vector<64x24xf32> to vector<8x8x24xf32>
    %123 = vector.extract_strided_slice %122 {offsets = [0, 0, 0], sizes = [8, 8, 4], strides = [1, 1, 1]} : vector<8x8x24xf32> to vector<8x8x4xf32>
    %cst_96 = arith.constant 5.000000e-01 : f32
    %124 = vector.broadcast %cst_96 : f32 to vector<8x8x4xf32>
    %125 = arith.mulf %123, %124 : vector<8x8x4xf32>
    %126 = arith.truncf %125 : vector<8x8x4xf32> to vector<8x8x4xbf16>
    %127 = vector.extract_strided_slice %122 {offsets = [0, 0, 8], sizes = [8, 8, 4], strides = [1, 1, 1]} : vector<8x8x24xf32> to vector<8x8x4xf32>
    %128 = arith.truncf %127 : vector<8x8x4xf32> to vector<8x8x4xbf16>
    %129 = vector.extract_strided_slice %122 {offsets = [0, 0, 16], sizes = [8, 8, 4], strides = [1, 1, 1]} : vector<8x8x24xf32> to vector<8x8x4xf32>
    "tpu.trace_start"() <{level = 10 : i32, message = "bqd,bkd->bqk"}> : () -> ()
    %cst_97 = arith.constant dense<0.000000e+00> : vector<8x8x8xf32>
    %130 = tpu.matmul %126, %128, %cst_97 {dimension_numbers = #tpu.dot_dimension_numbers<[2], [2], [1], [1], [0, 0, 0, 1, 1, 1], [0], [0]>} : vector<8x8x4xbf16>, vector<8x8x4xbf16>, vector<8x8x8xf32> -> vector<8x8x8xf32>
    "tpu.trace_stop"() : () -> ()
    %cst_98 = arith.constant dense<0xFF800000> : vector<8x8xf32>
    %131 = vector.multi_reduction <maximumf>, %130, %cst_98 [2] : vector<8x8x8xf32> to vector<8x8xf32>
    %132 = vector.shape_cast %131 : vector<8x8xf32> to vector<8x8x1xf32>
    %133 = vector.broadcast %132 : vector<8x8x1xf32> to vector<8x8x8xf32>
    %134 = arith.subf %130, %133 : vector<8x8x8xf32>
    %135 = math.exp %134 : vector<8x8x8xf32>
    %cst_99 = arith.constant dense<0.000000e+00> : vector<8x8xf32>
    %136 = vector.multi_reduction <add>, %135, %cst_99 [2] : vector<8x8x8xf32> to vector<8x8xf32>
    %137 = vector.shape_cast %136 : vector<8x8xf32> to vector<8x8x1xf32>
    %138 = tpu.reciprocal %137 {approx = true} : vector<8x8x1xf32> -> vector<8x8x1xf32>
    %139 = vector.broadcast %138 : vector<8x8x1xf32> to vector<8x8x8xf32>
    %140 = arith.mulf %135, %139 : vector<8x8x8xf32>
    %141 = arith.truncf %140 : vector<8x8x8xf32> to vector<8x8x8xbf16>
    %142 = arith.truncf %129 : vector<8x8x4xf32> to vector<8x8x4xbf16>
    "tpu.trace_start"() <{level = 10 : i32, message = "bqk,bkd->bqd"}> : () -> ()
    %cst_100 = arith.constant dense<0.000000e+00> : vector<8x8x4xf32>
    %143 = tpu.matmul %141, %142, %cst_100 {dimension_numbers = #tpu.dot_dimension_numbers<[2], [1], [1], [2], [0, 0, 0, 1, 1, 2], [0], [0]>} : vector<8x8x8xbf16>, vector<8x8x4xbf16>, vector<8x8x4xf32> -> vector<8x8x4xf32>
    "tpu.trace_stop"() : () -> ()
    %144 = vector.shape_cast %143 : vector<8x8x4xf32> to vector<64x4xf32>
    %145 = arith.truncf %144 : vector<64x4xf32> to vector<64x4xbf16>
    %146 = vector.extract_strided_slice %115 {offsets = [0, 0], sizes = [4, 8], strides = [1, 1]} : vector<8x8xbf16> to vector<4x8xbf16>
    %cst_101 = arith.constant dense<0.000000e+00> : vector<64x8xf32>
    %147 = tpu.matmul %145, %146, %cst_101 {dimension_numbers = #tpu.dot_dimension_numbers<[1], [0], [0], [1], [0, 0, 1, 1], [], []>} : vector<64x4xbf16>, vector<4x8xbf16>, vector<64x8xf32> -> vector<64x8xf32>
    %148 = vector.extract_strided_slice %122 {offsets = [0, 0, 4], sizes = [8, 8, 4], strides = [1, 1, 1]} : vector<8x8x24xf32> to vector<8x8x4xf32>
    %cst_102 = arith.constant 5.000000e-01 : f32
    %149 = vector.broadcast %cst_102 : f32 to vector<8x8x4xf32>
    %150 = arith.mulf %148, %149 : vector<8x8x4xf32>
    %151 = arith.truncf %150 : vector<8x8x4xf32> to vector<8x8x4xbf16>
    %152 = vector.extract_strided_slice %122 {offsets = [0, 0, 12], sizes = [8, 8, 4], strides = [1, 1, 1]} : vector<8x8x24xf32> to vector<8x8x4xf32>
    %153 = arith.truncf %152 : vector<8x8x4xf32> to vector<8x8x4xbf16>
    %154 = vector.extract_strided_slice %122 {offsets = [0, 0, 20], sizes = [8, 8, 4], strides = [1, 1, 1]} : vector<8x8x24xf32> to vector<8x8x4xf32>
    "tpu.trace_start"() <{level = 10 : i32, message = "bqd,bkd->bqk"}> : () -> ()
    %cst_103 = arith.constant dense<0.000000e+00> : vector<8x8x8xf32>
    %155 = tpu.matmul %151, %153, %cst_103 {dimension_numbers = #tpu.dot_dimension_numbers<[2], [2], [1], [1], [0, 0, 0, 1, 1, 1], [0], [0]>} : vector<8x8x4xbf16>, vector<8x8x4xbf16>, vector<8x8x8xf32> -> vector<8x8x8xf32>
    "tpu.trace_stop"() : () -> ()
    %cst_104 = arith.constant dense<0xFF800000> : vector<8x8xf32>
    %156 = vector.multi_reduction <maximumf>, %155, %cst_104 [2] : vector<8x8x8xf32> to vector<8x8xf32>
    %157 = vector.shape_cast %156 : vector<8x8xf32> to vector<8x8x1xf32>
    %158 = vector.broadcast %157 : vector<8x8x1xf32> to vector<8x8x8xf32>
    %159 = arith.subf %155, %158 : vector<8x8x8xf32>
    %160 = math.exp %159 : vector<8x8x8xf32>
    %cst_105 = arith.constant dense<0.000000e+00> : vector<8x8xf32>
    %161 = vector.multi_reduction <add>, %160, %cst_105 [2] : vector<8x8x8xf32> to vector<8x8xf32>
    %162 = vector.shape_cast %161 : vector<8x8xf32> to vector<8x8x1xf32>
    %163 = tpu.reciprocal %162 {approx = true} : vector<8x8x1xf32> -> vector<8x8x1xf32>
    %164 = vector.broadcast %163 : vector<8x8x1xf32> to vector<8x8x8xf32>
    %165 = arith.mulf %160, %164 : vector<8x8x8xf32>
    %166 = arith.truncf %165 : vector<8x8x8xf32> to vector<8x8x8xbf16>
    %167 = arith.truncf %154 : vector<8x8x4xf32> to vector<8x8x4xbf16>
    "tpu.trace_start"() <{level = 10 : i32, message = "bqk,bkd->bqd"}> : () -> ()
    %cst_106 = arith.constant dense<0.000000e+00> : vector<8x8x4xf32>
    %168 = tpu.matmul %166, %167, %cst_106 {dimension_numbers = #tpu.dot_dimension_numbers<[2], [1], [1], [2], [0, 0, 0, 1, 1, 2], [0], [0]>} : vector<8x8x8xbf16>, vector<8x8x4xbf16>, vector<8x8x4xf32> -> vector<8x8x4xf32>
    "tpu.trace_stop"() : () -> ()
    %169 = vector.shape_cast %168 : vector<8x8x4xf32> to vector<64x4xf32>
    %170 = arith.truncf %169 : vector<64x4xf32> to vector<64x4xbf16>
    %171 = vector.extract_strided_slice %115 {offsets = [4, 0], sizes = [4, 8], strides = [1, 1]} : vector<8x8xbf16> to vector<4x8xbf16>
    %cst_107 = arith.constant dense<0.000000e+00> : vector<64x8xf32>
    %172 = tpu.matmul %170, %171, %cst_107 {dimension_numbers = #tpu.dot_dimension_numbers<[1], [0], [0], [1], [0, 0, 1, 1], [], []>} : vector<64x4xbf16>, vector<4x8xbf16>, vector<64x8xf32> -> vector<64x8xf32>
    %173 = arith.addf %147, %172 : vector<64x8xf32>
    %174 = vector.broadcast %116 : vector<1x8xf32> to vector<64x8xf32>
    %175 = arith.addf %173, %174 : vector<64x8xf32>
    %176 = vector.shape_cast %175 : vector<64x8xf32> to vector<8x8x8xf32>
    %177 = vector.extract_strided_slice %0 {offsets = [0, 0, 0, 8], sizes = [1, 8, 8, 8], strides = [1, 1, 1, 1]} : vector<1x8x8x32xf32> to vector<1x8x8x8xf32>
    %178 = vector.shape_cast %177 : vector<1x8x8x8xf32> to vector<1x64x8xf32>
    %c2_108 = arith.constant 2 : index
    %c0_109 = arith.constant 0 : index
    %c0_110 = arith.constant 0 : index
    %179 = vector.load %arg2[%c2_108, %c0_109, %c0_110] : memref<3x8x24xbf16, #tpu.memory_space<vmem>>, vector<1x8x24xbf16>
    %180 = vector.shape_cast %179 : vector<1x8x24xbf16> to vector<8x24xbf16>
    %c2_111 = arith.constant 2 : index
    %c0_112 = arith.constant 0 : index
    %181 = vector.load %arg3[%c2_111, %c0_112] : memref<3x24xf32, #tpu.memory_space<vmem>>, vector<1x24xf32>
    %c2_113 = arith.constant 2 : index
    %c0_114 = arith.constant 0 : index
    %c0_115 = arith.constant 0 : index
    %182 = vector.load %arg4[%c2_113, %c0_114, %c0_115] : memref<3x8x8xbf16, #tpu.memory_space<vmem>>, vector<1x8x8xbf16>
    %183 = vector.shape_cast %182 : vector<1x8x8xbf16> to vector<8x8xbf16>
    %c2_116 = arith.constant 2 : index
    %c0_117 = arith.constant 0 : index
    %184 = vector.load %arg5[%c2_116, %c0_117] : memref<3x8xf32, #tpu.memory_space<vmem>>, vector<1x8xf32>
    %185 = vector.shape_cast %178 : vector<1x64x8xf32> to vector<64x8xf32>
    %186 = arith.truncf %185 : vector<64x8xf32> to vector<64x8xbf16>
    %cst_118 = arith.constant dense<0.000000e+00> : vector<64x24xf32>
    %187 = tpu.matmul %186, %180, %cst_118 {dimension_numbers = #tpu.dot_dimension_numbers<[1], [0], [0], [1], [0, 0, 1, 1], [], []>} : vector<64x8xbf16>, vector<8x24xbf16>, vector<64x24xf32> -> vector<64x24xf32>
    %188 = vector.broadcast %181 : vector<1x24xf32> to vector<64x24xf32>
    %189 = arith.addf %187, %188 : vector<64x24xf32>
    %190 = vector.shape_cast %189 : vector<64x24xf32> to vector<1x64x24xf32>
    %191 = vector.extract_strided_slice %190 {offsets = [0, 0, 0], sizes = [1, 64, 4], strides = [1, 1, 1]} : vector<1x64x24xf32> to vector<1x64x4xf32>
    %cst_119 = arith.constant 5.000000e-01 : f32
    %192 = vector.broadcast %cst_119 : f32 to vector<1x64x4xf32>
    %193 = arith.mulf %191, %192 : vector<1x64x4xf32>
    %194 = arith.truncf %193 : vector<1x64x4xf32> to vector<1x64x4xbf16>
    %195 = vector.extract_strided_slice %190 {offsets = [0, 0, 8], sizes = [1, 64, 4], strides = [1, 1, 1]} : vector<1x64x24xf32> to vector<1x64x4xf32>
    %196 = arith.truncf %195 : vector<1x64x4xf32> to vector<1x64x4xbf16>
    %197 = vector.extract_strided_slice %190 {offsets = [0, 0, 16], sizes = [1, 64, 4], strides = [1, 1, 1]} : vector<1x64x24xf32> to vector<1x64x4xf32>
    "tpu.trace_start"() <{level = 10 : i32, message = "bqd,bkd->bqk"}> : () -> ()
    %cst_120 = arith.constant dense<0.000000e+00> : vector<1x64x64xf32>
    %198 = tpu.matmul %194, %196, %cst_120 {dimension_numbers = #tpu.dot_dimension_numbers<[2], [2], [1], [1], [0, 0, 0, 1, 1, 1], [0], [0]>} : vector<1x64x4xbf16>, vector<1x64x4xbf16>, vector<1x64x64xf32> -> vector<1x64x64xf32>
    "tpu.trace_stop"() : () -> ()
    %cst_121 = arith.constant dense<0xFF800000> : vector<1x64xf32>
    %199 = vector.multi_reduction <maximumf>, %198, %cst_121 [2] : vector<1x64x64xf32> to vector<1x64xf32>
    %200 = vector.shape_cast %199 : vector<1x64xf32> to vector<1x64x1xf32>
    %201 = vector.broadcast %200 : vector<1x64x1xf32> to vector<1x64x64xf32>
    %202 = arith.subf %198, %201 : vector<1x64x64xf32>
    %203 = math.exp %202 : vector<1x64x64xf32>
    %cst_122 = arith.constant dense<0.000000e+00> : vector<1x64xf32>
    %204 = vector.multi_reduction <add>, %203, %cst_122 [2] : vector<1x64x64xf32> to vector<1x64xf32>
    %205 = vector.shape_cast %204 : vector<1x64xf32> to vector<1x64x1xf32>
    %206 = tpu.reciprocal %205 {approx = true} : vector<1x64x1xf32> -> vector<1x64x1xf32>
    %207 = vector.broadcast %206 : vector<1x64x1xf32> to vector<1x64x64xf32>
    %208 = arith.mulf %203, %207 : vector<1x64x64xf32>
    %209 = arith.truncf %208 : vector<1x64x64xf32> to vector<1x64x64xbf16>
    %210 = arith.truncf %197 : vector<1x64x4xf32> to vector<1x64x4xbf16>
    "tpu.trace_start"() <{level = 10 : i32, message = "bqk,bkd->bqd"}> : () -> ()
    %cst_123 = arith.constant dense<0.000000e+00> : vector<1x64x4xf32>
    %211 = tpu.matmul %209, %210, %cst_123 {dimension_numbers = #tpu.dot_dimension_numbers<[2], [1], [1], [2], [0, 0, 0, 1, 1, 2], [0], [0]>} : vector<1x64x64xbf16>, vector<1x64x4xbf16>, vector<1x64x4xf32> -> vector<1x64x4xf32>
    "tpu.trace_stop"() : () -> ()
    %212 = vector.shape_cast %211 : vector<1x64x4xf32> to vector<64x4xf32>
    %213 = arith.truncf %212 : vector<64x4xf32> to vector<64x4xbf16>
    %214 = vector.extract_strided_slice %183 {offsets = [0, 0], sizes = [4, 8], strides = [1, 1]} : vector<8x8xbf16> to vector<4x8xbf16>
    %cst_124 = arith.constant dense<0.000000e+00> : vector<64x8xf32>
    %215 = tpu.matmul %213, %214, %cst_124 {dimension_numbers = #tpu.dot_dimension_numbers<[1], [0], [0], [1], [0, 0, 1, 1], [], []>} : vector<64x4xbf16>, vector<4x8xbf16>, vector<64x8xf32> -> vector<64x8xf32>
    %216 = vector.extract_strided_slice %190 {offsets = [0, 0, 4], sizes = [1, 64, 4], strides = [1, 1, 1]} : vector<1x64x24xf32> to vector<1x64x4xf32>
    %cst_125 = arith.constant 5.000000e-01 : f32
    %217 = vector.broadcast %cst_125 : f32 to vector<1x64x4xf32>
    %218 = arith.mulf %216, %217 : vector<1x64x4xf32>
    %219 = arith.truncf %218 : vector<1x64x4xf32> to vector<1x64x4xbf16>
    %220 = vector.extract_strided_slice %190 {offsets = [0, 0, 12], sizes = [1, 64, 4], strides = [1, 1, 1]} : vector<1x64x24xf32> to vector<1x64x4xf32>
    %221 = arith.truncf %220 : vector<1x64x4xf32> to vector<1x64x4xbf16>
    %222 = vector.extract_strided_slice %190 {offsets = [0, 0, 20], sizes = [1, 64, 4], strides = [1, 1, 1]} : vector<1x64x24xf32> to vector<1x64x4xf32>
    "tpu.trace_start"() <{level = 10 : i32, message = "bqd,bkd->bqk"}> : () -> ()
    %cst_126 = arith.constant dense<0.000000e+00> : vector<1x64x64xf32>
    %223 = tpu.matmul %219, %221, %cst_126 {dimension_numbers = #tpu.dot_dimension_numbers<[2], [2], [1], [1], [0, 0, 0, 1, 1, 1], [0], [0]>} : vector<1x64x4xbf16>, vector<1x64x4xbf16>, vector<1x64x64xf32> -> vector<1x64x64xf32>
    "tpu.trace_stop"() : () -> ()
    %cst_127 = arith.constant dense<0xFF800000> : vector<1x64xf32>
    %224 = vector.multi_reduction <maximumf>, %223, %cst_127 [2] : vector<1x64x64xf32> to vector<1x64xf32>
    %225 = vector.shape_cast %224 : vector<1x64xf32> to vector<1x64x1xf32>
    %226 = vector.broadcast %225 : vector<1x64x1xf32> to vector<1x64x64xf32>
    %227 = arith.subf %223, %226 : vector<1x64x64xf32>
    %228 = math.exp %227 : vector<1x64x64xf32>
    %cst_128 = arith.constant dense<0.000000e+00> : vector<1x64xf32>
    %229 = vector.multi_reduction <add>, %228, %cst_128 [2] : vector<1x64x64xf32> to vector<1x64xf32>
    %230 = vector.shape_cast %229 : vector<1x64xf32> to vector<1x64x1xf32>
    %231 = tpu.reciprocal %230 {approx = true} : vector<1x64x1xf32> -> vector<1x64x1xf32>
    %232 = vector.broadcast %231 : vector<1x64x1xf32> to vector<1x64x64xf32>
    %233 = arith.mulf %228, %232 : vector<1x64x64xf32>
    %234 = arith.truncf %233 : vector<1x64x64xf32> to vector<1x64x64xbf16>
    %235 = arith.truncf %222 : vector<1x64x4xf32> to vector<1x64x4xbf16>
    "tpu.trace_start"() <{level = 10 : i32, message = "bqk,bkd->bqd"}> : () -> ()
    %cst_129 = arith.constant dense<0.000000e+00> : vector<1x64x4xf32>
    %236 = tpu.matmul %234, %235, %cst_129 {dimension_numbers = #tpu.dot_dimension_numbers<[2], [1], [1], [2], [0, 0, 0, 1, 1, 2], [0], [0]>} : vector<1x64x64xbf16>, vector<1x64x4xbf16>, vector<1x64x4xf32> -> vector<1x64x4xf32>
    "tpu.trace_stop"() : () -> ()
    %237 = vector.shape_cast %236 : vector<1x64x4xf32> to vector<64x4xf32>
    %238 = arith.truncf %237 : vector<64x4xf32> to vector<64x4xbf16>
    %239 = vector.extract_strided_slice %183 {offsets = [4, 0], sizes = [4, 8], strides = [1, 1]} : vector<8x8xbf16> to vector<4x8xbf16>
    %cst_130 = arith.constant dense<0.000000e+00> : vector<64x8xf32>
    %240 = tpu.matmul %238, %239, %cst_130 {dimension_numbers = #tpu.dot_dimension_numbers<[1], [0], [0], [1], [0, 0, 1, 1], [], []>} : vector<64x4xbf16>, vector<4x8xbf16>, vector<64x8xf32> -> vector<64x8xf32>
    %241 = arith.addf %215, %240 : vector<64x8xf32>
    %242 = vector.broadcast %184 : vector<1x8xf32> to vector<64x8xf32>
    %243 = arith.addf %241, %242 : vector<64x8xf32>
    %244 = vector.shape_cast %243 : vector<64x8xf32> to vector<1x64x8xf32>
    %245 = vector.shape_cast %108 : vector<8x8x8xf32> to vector<1x8x8x8xf32>
    %c0_131 = arith.constant 0 : index
    %c0_132 = arith.constant 0 : index
    %c0_133 = arith.constant 0 : index
    %c0_134 = arith.constant 0 : index
    %246 = vector.load %arg6[%c0_131, %c0_132, %c0_133, %c0_134] : memref<1x8x8x8xf32, #tpu.memory_space<vmem>>, vector<1x8x8x8xf32>
    tpu.vector_store %arg6[%c0_131, %c0_132, %c0_133, %c0_134], %245 {strides = array<i32>} : memref<1x8x8x8xf32, #tpu.memory_space<vmem>>, vector<1x8x8x8xf32>,
    %247 = vector.shape_cast %176 : vector<8x8x8xf32> to vector<1x8x8x8xf32>
    %c0_135 = arith.constant 0 : index
    %c0_136 = arith.constant 0 : index
    %c0_137 = arith.constant 0 : index
    %c0_138 = arith.constant 0 : index
    %248 = vector.load %arg7[%c0_135, %c0_136, %c0_137, %c0_138] : memref<1x8x8x8xf32, #tpu.memory_space<vmem>>, vector<1x8x8x8xf32>
    tpu.vector_store %arg7[%c0_135, %c0_136, %c0_137, %c0_138], %247 {strides = array<i32>} : memref<1x8x8x8xf32, #tpu.memory_space<vmem>>, vector<1x8x8x8xf32>,
    %249 = vector.shape_cast %244 : vector<1x64x8xf32> to vector<1x8x8x8xf32>
    %c0_139 = arith.constant 0 : index
    %c0_140 = arith.constant 0 : index
    %c0_141 = arith.constant 0 : index
    %c0_142 = arith.constant 0 : index
    %250 = vector.load %arg8[%c0_139, %c0_140, %c0_141, %c0_142] : memref<1x8x8x8xf32, #tpu.memory_space<vmem>>, vector<1x8x8x8xf32>
    tpu.vector_store %arg8[%c0_139, %c0_140, %c0_141, %c0_142], %249 {strides = array<i32>} : memref<1x8x8x8xf32, #tpu.memory_space<vmem>>, vector<1x8x8x8xf32>,
    return
  }
  func.func @transform_0(%arg0: i32) -> (i32, i32, i32, i32) {
    %c0_i32 = arith.constant 0 : i32
    %c0_i32_0 = arith.constant 0 : i32
    %c0_i32_1 = arith.constant 0 : i32
    %c0_i32_2 = arith.constant 0 : i32
    return %arg0, %c0_i32, %c0_i32_0, %c0_i32_1 : i32, i32, i32, i32
  }
  func.func @transform_1(%arg0: i32) -> (i32, i32, i32) {
    %c0_i32 = arith.constant 0 : i32
    %c0_i32_0 = arith.constant 0 : i32
    %c0_i32_1 = arith.constant 0 : i32
    %c0_i32_2 = arith.constant 0 : i32
    return %c0_i32, %c0_i32_0, %c0_i32_1 : i32, i32, i32
  }
  func.func @transform_2(%arg0: i32) -> (i32, i32) {
    %c0_i32 = arith.constant 0 : i32
    %c0_i32_0 = arith.constant 0 : i32
    %c0_i32_1 = arith.constant 0 : i32
    return %c0_i32, %c0_i32_0 : i32, i32
  }
  func.func @transform_3(%arg0: i32) -> (i32, i32, i32) {
    %c0_i32 = arith.constant 0 : i32
    %c0_i32_0 = arith.constant 0 : i32
    %c0_i32_1 = arith.constant 0 : i32
    %c0_i32_2 = arith.constant 0 : i32
    return %c0_i32, %c0_i32_0, %c0_i32_1 : i32, i32, i32
  }
  func.func @transform_4(%arg0: i32) -> (i32, i32) {
    %c0_i32 = arith.constant 0 : i32
    %c0_i32_0 = arith.constant 0 : i32
    %c0_i32_1 = arith.constant 0 : i32
    return %c0_i32, %c0_i32_0 : i32, i32
  }
  func.func @transform_5(%arg0: i32) -> (i32, i32, i32, i32) {
    %c0_i32 = arith.constant 0 : i32
    %c0_i32_0 = arith.constant 0 : i32
    %c0_i32_1 = arith.constant 0 : i32
    %c0_i32_2 = arith.constant 0 : i32
    return %arg0, %c0_i32, %c0_i32_0, %c0_i32_1 : i32, i32, i32, i32
  }
  func.func @transform_6(%arg0: i32) -> (i32, i32, i32, i32) {
    %c0_i32 = arith.constant 0 : i32
    %c0_i32_0 = arith.constant 0 : i32
    %c0_i32_1 = arith.constant 0 : i32
    %c0_i32_2 = arith.constant 0 : i32
    return %arg0, %c0_i32, %c0_i32_0, %c0_i32_1 : i32, i32, i32, i32
  }
  func.func @transform_7(%arg0: i32) -> (i32, i32, i32, i32) {
    %c0_i32 = arith.constant 0 : i32
    %c0_i32_0 = arith.constant 0 : i32
    %c0_i32_1 = arith.constant 0 : i32
    %c0_i32_2 = arith.constant 0 : i32
    return %arg0, %c0_i32, %c0_i32_0, %c0_i32_1 : i32, i32, i32, i32
  }
}

</mosaic_0001>

<bundles_post_ra>
// kernel: joint_attention_forward.1
= control target key start
LH: loop header
LB: loop body
LE: loop exit
PB: predicated region body
PF: predicated region fallthrough
CT: control target
= control target key end

     0   :  { %s4106_s24 = smov 0   ;;  %s5525_s0 = inlined_call_operand.vmem [shape: f32[2,8,8,32], index: 0, kind: input, shape index: {}]   ;;  %s5526_s1 = inlined_call_operand.vmem [shape: bf16[3,8,24], index: 1, kind: input, shape index: {}]   ;;  %s5527_s2 = inlined_call_operand.vmem [shape: f32[3,24], index: 2, kind: input, shape index: {}]   ;;  %s5528_s3 = inlined_call_operand.vmem [shape: bf16[3,8,8], index: 3, kind: input, shape index: {}]   ;;  %s5529_s4 = inlined_call_operand.vmem [shape: f32[3,8], index: 4, kind: input, shape index: {}]   ;;  %s5530_s5 = inlined_call_operand.vmem [shape: f32[2,8,8,8], index: 5, kind: output, shape index: {0}]   ;;  %s5531_s6 = inlined_call_operand.vmem [shape: f32[2,8,8,8], index: 6, kind: output, shape index: {1}]   ;;  %s5532_s7 = inlined_call_operand.vmem [shape: f32[2,8,8,8], index: 7, kind: output, shape index: {2}]  }
   0x1 LB: > { %s3699_s25 = sadd.s32 4294967295, %s4058_s24   ;;  %p3703_p0 = scmp.ge.s32.totalorder %s4058_s24, 1  ;;  %s4058_s24 = sphi %s4106_s24, %s18_s24  }
   0x2   : > { %p242_p1 = scmp.lt.s32.totalorder %s4058_s24, 3 }
   0x4   : > { %p243_p2 = pnand %p3703_p0, %p242_p1 }
   0x5   : > { %p284_p3 = scmp.lt.s32.totalorder (!%p243_p2), %s3699_s25, 1  ;;  %s4060_s9 = smov (!%p243_p2), 104  }
   0x6   : > { %246 = sbr.rel (%p243_p2) target bundleno = 3749 (0xea5), region = 40  ;;  %s4061_s12 = smov (!%p243_p2), 120  }
   0x7   : > { %s4062_s13 = smov (!%p243_p2), 112   ;;  %s4063_s14 = smov (!%p243_p2), 124  }
   0x8   : > { %s4064_s15 = smov (!%p243_p2), 116   ;;  %s4065_s16 = smov (!%p243_p2), 108  }
   0xb   : > { %v600_v0 = vld [vmem:[%s5526_s1] sm:$0xf]  ;;  %vm633_vm0 = vcmask 1043456   ;;  %s5534_s25 = smov (!%p284_p3, %s3699_s25), 1  ;;  %vm353_vm1 = vcmask 64512   ;;  %vm695_vm2 = vcmask 31744  }
   0xc   : > { %v635_v1 = vsel %vm633_vm0, %v600_v0, 0  ;;  %s4118_s28 = sshll.u32 %s5534_s25, 6  ;;  %v4153_v18 = vld [vmem:[%s5527_s2] ss:$0 sm:$0xff]  ;;  %vm330_vm3 = vcmask 1041409   ;;  %vm333_vm4 = vcmask 1042434  }
   0xd   : > { %644 = vmatpush.bf16.msra.mxu0 %v635_v1  ;;  %3838 = vmatpush.bf16.msra.mxu1 %v635_v1  ;;  %s4124_s8 = scalar_lea.vmem %s5525_s0, %s4118_s28  ;;  %vm336_vm5 = vcmask 1043459   ;;  %vm339_vm6 = vcmask 1044484   ;;  %vm342_vm7 = vcmask 1045509   ;;  %vm345_vm8 = vcmask 1046534   ;;  %s4873_s29 = scalar_lea.vmem %s5530_s5, %s4118_s28 }
   0xe   : > { %3839 = vmatpush.bf16.msra.mxu2 %v635_v1  ;;  %v305_v2 = vld [vmem:[%s4124_s8] sm:$0xff]  ;;  %v306_v3 = vld [vmem:[%s4124_s8 + $0x8] sm:$0xff]  ;;  %v311_v5 = vld [vmem:[%s4124_s8 + $0x30] sm:$0xff]  ;;  %vm348_vm9 = vcmask 1047559   ;;  %vm1643_vm10 = vcmask 1041408   ;;  %vm3037_vm11 = vcmask 523264   ;;  %s5504_s25 = scalar_lea.vmem %s5532_s7, %s4118_s28 }
   0xf   : > { %v4128_v4 = vpack.c.bf16 %v306_v3, %v305_v2  ;;  %v312_v6 = vld [vmem:[%s4124_s8 + $0x38] sm:$0xff]  ;;  %v307_v8 = vld [vmem:[%s4124_s8 + $0x10] sm:$0xff]  ;;  %v309_v10 = vld [vmem:[%s4124_s8 + $0x20] sm:$0xff] }
  0x10   : > { %v4132_v7 = vpack.c.bf16 %v312_v6, %v311_v5  ;;  %v308_v9 = vld [vmem:[%s4124_s8 + $0x18] sm:$0xff]  ;;  %v310_v11 = vld [vmem:[%s4124_s8 + $0x28] sm:$0xff] }
  0x11   : > { %613 = vrot.lane.b32.xlu0 %v4128_v4, %s4060_s9  ;;  %v4140_v12 = vpack.c.bf16 %v308_v9, %v307_v8  ;;  %v4142_v13 = vpack.c.bf16 %v310_v11, %v309_v10 }
  0x12   : > { %619 = vrot.lane.b32.xlu1 %v4132_v7, %s4060_s9 }
  0x19   : > { %615 = vrot.lane.b32.xlu0 %v4140_v12, %s4060_s9 }
  0x1a   : > { %617 = vrot.lane.b32.xlu1 %v4142_v13, %s4060_s9 }
  0x83   : > { %v614_v14 = vpop.permute.xlu0 %613 }
  0x84   : > { %3712 = vmatmul.msk.bf16.vlgmr.msra.gmra.mxu0 %vm353_vm1, %v614_v14  ;;  %v620_v15 = vpop.permute.xlu1 %619 }
  0x85   : > { %3715 = vmatmul.msk.bf16.vlgmr.msra.gmra.mxu2 %vm353_vm1, %v620_v15 }
  0x8b   : > { %v616_v16 = vpop.permute.xlu0 %615 }
  0x8c   : > { %3713 = vmatmul.msk.bf16.vlgmr.msra.gmra.mxu1 %vm353_vm1, %v616_v16  ;;  %v618_v17 = vpop.permute.xlu1 %617 }
  0x9c   : > { %3714 = vmatmul.msk.bf16.gmra.mxu1 %vm353_vm1, %v618_v17 }
 0x101   : > { %v646_v19 = vpop.f32.mrf.mxu0 }
 0x102   : > { %v647_v20 = vadd.f32 %v4153_v18, %v646_v19 }
 0x104   : > { %v682_v21 = vpack.c.bf16 %v647_v20, %v647_v20  ;;  %v666_v56 = vmul.f32 0.5, %v647_v20 }
 0x106   : > { %v691_v22 = vunpack.c.l.b16 %v682_v21  ;;  %v4195_v57 = vpack.c.bf16 %v666_v56, %v666_v56 }
 0x108   : > { %v4156_v23 = vpack.c.b16 %v691_v22, %v691_v22  ;;  %v661_v24 = vpop.f32.mrf.mxu2 }
 0x109   : > { %v648_v25 = vpop.f32.mrf.mxu0  ;;  %v651_v26 = vpop.f32.mrf.mxu1  ;;  %v4159_v27 = vadd.f32 %v4153_v18, %v661_v24 }
 0x10a   : > { %v652_v28 = vadd.f32 %v4153_v18, %v651_v26  ;;  %693 = vrot.lane.b32.xlu2 %v4156_v23, %s4061_s12  ;;  %v649_v30 = vadd.f32 %v4153_v18, %v648_v25 }
 0x10b   : > { %v688_v29 = vpack.c.bf16 %v4159_v27, %v4159_v27  ;;  %v672_v19 = vmul.f32 0.5, %v4159_v27 }
 0x10c   : > { %v684_v31 = vpack.c.bf16 %v652_v28, %v652_v28  ;;  %v683_v35 = vpack.c.bf16 %v649_v30, %v649_v30  ;;  %v668_v60 = vmul.f32 0.5, %v652_v28  ;;  %v667_v0 = vmul.f32 0.5, %v649_v30 }
 0x10d   : > { %v836_v32 = vunpack.c.l.b16 %v688_v29  ;;  %v680_v20 = vpack.c.bf16 %v672_v19, %v672_v19 }
 0x10e   : > { %v740_v33 = vunpack.c.l.b16 %v684_v31  ;;  %v716_v39 = vunpack.c.l.b16 %v683_v35  ;;  %v676_v61 = vpack.c.bf16 %v668_v60, %v668_v60  ;;  %v4202_v1 = vpack.c.bf16 %v667_v0, %v667_v0 }
 0x10f   : > { %v4167_v34 = vpack.c.b16 %v836_v32, %v836_v32 }
 0x110   : > { %v4169_v36 = vpack.c.b16 %v740_v33, %v740_v33  ;;  %v663_v42 = vpop.f32.mrf.mxu2  ;;  %v4176_v43 = vpack.c.b16 %v716_v39, %v716_v39 }
 0x111   : > { %v653_v37 = vpop.f32.mrf.mxu1  ;;  %838 = vrot.lane.b32.xlu1 %v4167_v34, %s4061_s12  ;;  %v664_v47 = vadd.f32 %v4153_v18, %v663_v42 }
 0x112   : > { %v654_v38 = vadd.f32 %v4153_v18, %v653_v37  ;;  %742 = vrot.lane.b32.xlu2 %v4169_v36, %s4061_s12 }
 0x113   : > { %v689_v50 = vpack.c.bf16 %v664_v47, %v664_v47  ;;  %v673_v21 = vmul.f32 0.5, %v664_v47  ;;  %v1308_v47 = vunpack.c.l.b16 %v680_v20 }
 0x114   : > { %v685_v40 = vpack.c.bf16 %v654_v38, %v654_v38  ;;  %v669_v8 = vmul.f32 0.5, %v654_v38 }
 0x115   : > { %v860_v52 = vunpack.c.l.b16 %v689_v50  ;;  %v4220_v22 = vpack.c.bf16 %v673_v21, %v673_v21 }
 0x116   : > { %v764_v41 = vunpack.c.l.b16 %v685_v40  ;;  %v4208_v9 = vpack.c.bf16 %v669_v8, %v669_v8 }
 0x117   : > { %v4190_v53 = vpack.c.b16 %v860_v52, %v860_v52 }
 0x118   : > { %v4178_v44 = vpack.c.b16 %v764_v41, %v764_v41 }
 0x119   : > { %v656_v45 = vpop.f32.mrf.mxu1 }
 0x11a   : > { %v657_v46 = vadd.f32 %v4153_v18, %v656_v45  ;;  %766 = vrot.lane.b32.xlu0 %v4178_v44, %s4061_s12  ;;  %718 = vrot.lane.b32.xlu2 %v4176_v43, %s4061_s12  ;;  %v1204_v45 = vunpack.c.l.b16 %v676_v61 }
 0x11c   : > { %v686_v48 = vpack.c.bf16 %v657_v46, %v657_v46  ;;  %v670_v11 = vmul.f32 0.5, %v657_v46  ;;  %v1205_v46 = vpack.c.b16 %v1204_v45, %v1204_v45 }
 0x11e   : > { %v788_v49 = vunpack.c.l.b16 %v686_v48  ;;  %v4213_v15 = vpack.c.bf16 %v670_v11, %v670_v11  ;;  %v1309_v48 = vpack.c.b16 %v1308_v47, %v1308_v47 }
 0x120   : > { %v4186_v51 = vpack.c.b16 %v788_v49, %v788_v49 }
 0x121   : > { %v658_v24 = vpop.f32.mrf.mxu1 }
 0x122   : > { %790 = vrot.lane.b32.xlu1 %v4186_v51, %s4061_s12  ;;  %v659_v8 = vadd.f32 %v4153_v18, %v658_v24 }
 0x12a   : > { %862 = vrot.lane.b32.xlu1 %v4190_v53, %s4061_s12 }
 0x164   : > { %v694_v54 = vpop.permute.xlu2 %693 }
 0x165   : > { %v700_v55 = vsel %vm695_vm2, %v694_v54, 0 }
 0x166   : > { %709 = vmatpush.bf16.xpose.msrb.mxu1 %v700_v55 }
 0x16c   : > { %v743_v58 = vpop.permute.xlu2 %742 }
 0x16d   : > { %3716 = vmatmul.msk.bf16.vlgmr.msrb.gmra.mxu1 %vm695_vm2, %v4195_v57  ;;  %v748_v59 = vsel %vm695_vm2, %v743_v58, 0 }
 0x16e   : > { %757 = vmatpush.bf16.xpose.msra.mxu3 %v748_v59 }
 0x174   : > { %v719_v62 = vpop.permute.xlu2 %718 }
 0x175   : > { %3718 = vmatmul.msk.bf16.vlgmr.msra.gmra.mxu3 %vm695_vm2, %v676_v61  ;;  %v724_v63 = vsel %vm695_vm2, %v719_v62, 0 }
 0x176   : > { %733 = vmatpush.bf16.xpose.msrb.mxu2 %v724_v63 }
 0x17d   : > { %3717 = vmatmul.msk.bf16.vlgmr.msrb.gmra.mxu2 %vm695_vm2, %v4202_v1 }
 0x183   : > { %v839_v2 = vpop.permute.xlu1 %838 }
 0x184   : > { %v844_v3 = vsel %vm695_vm2, %v839_v2, 0 }
 0x18c   : > { %v767_v5 = vpop.permute.xlu0 %766 }
 0x18d   : > { %v772_v6 = vsel %vm695_vm2, %v767_v5, 0 }
 0x18e   : > { %781 = vmatpush.bf16.xpose.msra.mxu1 %v772_v6 }
 0x194   : > { %v791_v10 = vpop.permute.xlu1 %790 }
 0x195   : > { %v796_v14 = vsel %vm695_vm2, %v791_v10, 0  ;;  %3719 = vmatmul.msk.bf16.vlgmr.msra.gmra.mxu1 %vm695_vm2, %v4208_v9  ;;  %v687_v10 = vpack.c.bf16 %v659_v8, %v659_v8 }
 0x196   : > { %853 = vmatpush.bf16.xpose.msrb.mxu1 %v844_v3  ;;  %805 = vmatpush.bf16.xpose.msra.mxu2 %v796_v14 }
 0x197   : > { %v812_v14 = vunpack.c.l.b16 %v687_v10 }
 0x19c   : > { %v863_v16 = vpop.permute.xlu1 %862 }
 0x19d   : > { %v868_v17 = vsel %vm695_vm2, %v863_v16, 0  ;;  %3720 = vmatmul.msk.bf16.vlgmr.msra.gmra.mxu2 %vm695_vm2, %v4213_v15 }
 0x19e   : > { %877 = vmatpush.bf16.xpose.msrb.mxu2 %v868_v17  ;;  %v4261_v17 = vpack.c.b16 %v812_v14, %v812_v14  ;;  %v1334_v14 = vunpack.c.l.b16 %v4220_v22 }
 0x1a5   : > { %3722 = vmatmul.msk.bf16.vlgmr.msrb.gmra.mxu1 %vm695_vm2, %v680_v20 }
 0x1ad   : > { %3723 = vmatmul.msk.bf16.vlgmr.msrb.gmra.mxu2 %vm695_vm2, %v4220_v22 }
 0x1ea   : > { %v4224_v25 = vpop.f32.mrf.mxu1 }
 0x1eb   : > { %v883_v6 = vsel %vm353_vm1, %v4224_v25, -inf }
 0x1f2   : > { %v713_v26 = vpop.f32.mrf.mxu1 }
 0x1f8   : > { %v759_v28 = vpop.f32.mrf.mxu3 }
 0x1f9   : > { %v889_v29 = vsel %vm353_vm1, %v759_v28, -inf }
 0x1fa   : > { %890 = vmax.xlane.f32.xlu0 %v889_v29 }
 0x200   : > { %v4227_v30 = vpop.f32.mrf.mxu2  ;;  %v761_v27 = vpop.f32.mrf.mxu3 }
 0x208   : > { %v737_v31 = vpop.f32.mrf.mxu2 }
 0x20e   : > { %1105 = vrot.lane.b32.xlu0 %v4167_v34, %s4062_s13 }
 0x212   : > { %v4231_v32 = vpop.f32.mrf.mxu1 }
 0x213   : > { %v892_v54 = vsel %vm353_vm1, %v4231_v32, -inf }
 0x21a   : > { %v785_v33 = vpop.f32.mrf.mxu1 }
 0x220   : > { %v4233_v35 = vpop.f32.mrf.mxu2 }
 0x222   : > { %v855_v37 = vpop.f32.mrf.mxu1 }
 0x223   : > { %v901_v38 = vsel %vm353_vm1, %v855_v37, -inf }
 0x224   : > { %902 = vmax.xlane.f32.xlu2 %v901_v38 }
 0x228   : > { %v809_v39 = vpop.f32.mrf.mxu2 }
 0x22a   : > { %v857_v40 = vpop.f32.mrf.mxu1 }
 0x230   : > { %v4236_v41 = vpop.f32.mrf.mxu2 }
 0x231   : > { %v904_v5 = vsel %vm353_vm1, %v4236_v41, -inf }
 0x238   : > { %v881_v42 = vpop.f32.mrf.mxu2 }
 0x23c   : > { %1021 = vrot.lane.b32.xlu2 %v4169_v36, %s4062_s13 }
 0x244   : > { %1206 = vrot.lane.b32.xlu2 %v1205_v46, %s4063_s14 }
 0x24c   : > { %1310 = vrot.lane.b32.xlu2 %v1309_v48, %s4063_s14 }
 0x26d   : > { %v891_v49 = vpop.xlane.xlu0 %890 }
 0x26e   : > { %v909_v50 = vsub.f32 %v759_v28, %v891_v49 }
 0x270   : > { %v919_v52 = vmul.f32 1.442695, %v909_v50 }
 0x272   : > { %3860 = vpow2.f32 %v919_v52 }
 0x275   : > { %893 = vmax.xlane.f32.xlu2 %v892_v54 }
 0x278   : > { %v3861_v55 = vpop.eup %3860 }
 0x279   : > { %v937_v56 = vsel %vm353_vm1, %v3861_v55, 0.0 }
 0x27a   : > { %938 = vadd.xlane.f32.xlu1 %v937_v56 }
 0x280   : > { %v1106_v61 = vpop.permute.xlu0 %1105 }
 0x281   : > { %v1111_v0 = vsel %vm633_vm0, %v1106_v61, 0 }
 0x293   : > { %1208 = vrot.lane.b32.xlu1 %v4169_v36, %s4064_s15 }
 0x297   : > { %v903_v58 = vpop.xlane.xlu2 %902 }
 0x298   : > { %v913_v59 = vsub.f32 %v855_v37, %v903_v58 }
 0x29a   : > { %v927_v60 = vmul.f32 1.442695, %v913_v59 }
 0x29c   : > { %3862 = vpow2.f32 %v927_v60 }
 0x29f   : > { %v1022_v62 = vpop.permute.xlu2 %1021 }
 0x2a0   : > { %v1027_v63 = vsel %vm633_vm0, %v1022_v62, 0 }
 0x2a1   : > { %1036 = vmatpush.bf16.msra.mxu2 %v1027_v63 }
 0x2a2   : > { %v3863_v2 = vpop.eup %3862 }
 0x2a3   : > { %v949_v3 = vsel %vm353_vm1, %v3863_v2, 0.0 }
 0x2a4   : > { %950 = vadd.xlane.f32.xlu0 %v949_v3 }
 0x2a5   : > { %1120 = vmatpush.bf16.msrb.mxu2 %v1111_v0  ;;  %v1230_v0 = vunpack.c.l.b16 %v4208_v9 }
 0x2a7   : > { %v1207_v38 = vpop.permute.xlu2 %1206 }
 0x2af   : > { %v1311_v45 = vpop.permute.xlu2 %1310 }
 0x2b8   : > { %1312 = vrot.lane.b32.xlu0 %v4167_v34, %s4064_s15 }
 0x2bd   : > { %905 = vmax.xlane.f32.xlu1 %v904_v5 }
 0x2d6   : > { %979 = vrot.lane.b32.xlu1 %v4156_v23, %s4062_s13 }
 0x2de   : > { %1126 = vrot.lane.b32.xlu1 %v4190_v53, %s4062_s13 }
 0x2e2   : > { %884 = vmax.xlane.f32.xlu0 %v883_v6 }
 0x2e8   : > { %v894_v46 = vpop.xlane.xlu2 %893 }
 0x2e9   : > { %v910_v48 = vsub.f32 %v4231_v32, %v894_v46  ;;  %v671_v32 = vmul.f32 0.5, %v659_v8  ;;  %v392_v46 = vld [vmem:[%s4124_s8 + $0x12] sm:$0x1] }
 0x2eb   : > { %v921_v50 = vmul.f32 1.442695, %v910_v48  ;;  %v4287_v61 = vpack.c.bf16 %v671_v32, %v671_v32 }
 0x2ed   : > { %v939_v11 = vpop.xlane.xlu1 %938 }
 0x2ee   : > { %3864 = vrcp.f32 %v939_v11 }
 0x2f4   : > { %v3865_v16 = vpop.eup %3864 }
 0x2f5   : > { %v965_v19 = vmul.f32 %v3865_v16, %v3861_v55 }
 0x2f6   : > { %814 = vrot.lane.b32.xlu0 %v4261_v17, %s4061_s12 }
 0x2f7   : > { %v973_v20 = vpack.c.bf16 %v965_v19, %v965_v19  ;;  %v1335_v19 = vpack.c.b16 %v1334_v14, %v1334_v14 }
 0x2f9   : > { %3726 = vmatmul.msk.bf16.vlgmr.msra.gmra.mxu2 %vm353_vm1, %v973_v20  ;;  %v356_v20 = vld [vmem:[%s4124_s8 + $0x9] sm:$0x1] }
 0x305   : > { %v1209_v21 = vpop.permute.xlu1 %1208 }
 0x306   : > { %v1214_v26 = vsel %vm695_vm2, %v1209_v21, 0 }
 0x307   : > { %1223 = vmatpush.bf16.xpose.msra.mxu2 %v1214_v26  ;;  %v357_v26 = vld [vmem:[%s4124_s8 + $0x11] sm:$0x1] }
 0x317   : > { %v951_v28 = vpop.xlane.xlu0 %950 }
 0x318   : > { %3866 = vrcp.f32 %v951_v28  ;;  %v371_v28 = vrot.slane %v356_v20, 7 }
 0x31e   : > { %v3867_v18 = vpop.eup %3866 }
 0x31f   : > { %v969_v24 = vmul.f32 %v3867_v18, %v3863_v2  ;;  %v1231_v2 = vpack.c.b16 %v1230_v0, %v1230_v0  ;;  %v355_v18 = vld [vmem:[%s4124_s8 + $0x1] sm:$0x1] }
 0x320   : > { %v372_v22 = vsel %vm330_vm3, %v371_v28, %v355_v18  ;;  %v495_v28 = vld [vmem:[%s4124_s8 + $0x5] sm:$0x1] }
 0x321   : > { %v977_v29 = vpack.c.bf16 %v969_v24, %v969_v24  ;;  %v358_v24 = vld [vmem:[%s4124_s8 + $0x19] sm:$0x1] }
 0x323   : > { %3730 = vmatmul.msk.bf16.vlgmr.msrb.gmra.mxu2 %vm353_vm1, %v977_v29  ;;  %v373_v29 = vrot.slane %v357_v26, 6 }
 0x32a   : > { %v1313_v27 = vpop.permute.xlu0 %1312 }
 0x32b   : > { %v1318_v31 = vsel %vm695_vm2, %v1313_v27, 0 }
 0x32c   : > { %1327 = vmatpush.bf16.xpose.msrb.mxu2 %v1318_v31  ;;  %v391_v31 = vld [vmem:[%s4124_s8 + $0xa] sm:$0x1] }
 0x330   : > { %v906_v33 = vpop.xlane.xlu1 %905 }
 0x331   : > { %v914_v37 = vsub.f32 %v4236_v41, %v906_v33 }
 0x333   : > { %v929_v39 = vmul.f32 1.442695, %v914_v37  ;;  %3734 = vmatmul.msk.bf16.vlgmr.msra.gmra.mxu2 %vm695_vm2, %v1207_v38  ;;  %v359_v38 = vld [vmem:[%s4124_s8 + $0x21] sm:$0x1] }
 0x334   : > { %v377_v48 = vrot.slane %v359_v38, 4 }
 0x335   : > { %3868 = vpow2.f32 %v929_v39  ;;  %v375_v39 = vrot.slane %v358_v24, 5 }
 0x33b   : > { %v4271_v40 = vpop.eup %3868 }
 0x33c   : > { %v952_v42 = vsel %vm353_vm1, %v4271_v40, 0.0 }
 0x33d   : > { %953 = vadd.xlane.f32.xlu0 %v952_v42  ;;  %v374_v42 = vsel %vm333_vm4, %v373_v29, %v372_v22  ;;  %v498_v22 = vld [vmem:[%s4124_s8 + $0x1d] sm:$0x1] }
 0x343   : > { %3738 = vmatmul.msk.bf16.vlgmr.msrb.gmra.mxu2 %vm695_vm2, %v1311_v45 }
 0x348   : > { %v980_v56 = vpop.permute.xlu1 %979 }
 0x351   : > { %1338 = vrot.lane.b32.xlu0 %v4190_v53, %s4064_s15 }
 0x355   : > { %v885_v47 = vpop.xlane.xlu0 %884 }
 0x356   : > { %v907_v41 = vsub.f32 %v4224_v25, %v885_v47  ;;  %v985_v25 = vsel %vm633_vm0, %v980_v56, 0  ;;  %v406_v47 = vrot.slane %v391_v31, 7  ;;  %v361_v56 = vld [vmem:[%s4124_s8 + $0x31] sm:$0x1] }
 0x358   : > { %v915_v49 = vmul.f32 1.442695, %v907_v41  ;;  %v360_v41 = vld [vmem:[%s4124_s8 + $0x29] sm:$0x1] }
 0x35a   : > { %3870 = vpow2.f32 %v915_v49  ;;  %v390_v49 = vld [vmem:[%s4124_s8 + $0x2] sm:$0x1] }
 0x35b   : > { %3872 = vpow2.f32 %v921_v50  ;;  %v376_v50 = vsel %vm336_vm5, %v375_v39, %v374_v42  ;;  %v531_v39 = vld [vmem:[%s4124_s8 + $0xe] sm:$0x1] }
 0x360   : > { %v3871_v52 = vpop.eup %3870 }
 0x361   : > { %v931_v54 = vsel %vm353_vm1, %v3871_v52, 0.0  ;;  %v4281_v55 = vpop.eup %3872 }
 0x362   : > { %932 = vadd.xlane.f32.xlu2 %v931_v54  ;;  %v940_v59 = vsel %vm353_vm1, %v4281_v55, 0.0  ;;  %v408_v54 = vrot.slane %v392_v46, 6  ;;  %v515_v46 = vrot.slane %v498_v22, 5 }
 0x368   : > { %v815_v58 = vpop.permute.xlu0 %814 }
 0x369   : > { %v820_v60 = vsel %vm695_vm2, %v815_v58, 0  ;;  %v379_v58 = vrot.slane %v360_v41, 3  ;;  %v397_v41 = vld [vmem:[%s4124_s8 + $0x3a] sm:$0x1] }
 0x36a   : > { %941 = vadd.xlane.f32.xlu2 %v940_v59  ;;  %829 = vmatpush.bf16.xpose.msrb.mxu3 %v820_v60  ;;  %v407_v59 = vsel %vm330_vm3, %v406_v47, %v390_v49  ;;  %v378_v60 = vsel %vm339_vm6, %v377_v48, %v376_v50 }
 0x36b   : > { %v380_v14 = vsel %vm342_vm7, %v379_v58, %v378_v60  ;;  %v500_v58 = vld [vmem:[%s4124_s8 + $0x2d] sm:$0x1] }
 0x371   : > { %3721 = vmatmul.msk.bf16.vlgmr.msrb.gmra.mxu3 %vm695_vm2, %v4287_v61 }
 0x372   : > { %994 = vmatpush.bf16.msra.mxu3 %v985_v25  ;;  %v496_v25 = vld [vmem:[%s4124_s8 + $0xd] sm:$0x1] }
 0x37c   : > { %v4291_v62 = vpop.f32.mrf.mxu2 }
 0x382   : > { %1042 = vrot.lane.b32.xlu2 %v4178_v44, %s4062_s13 }
 0x384   : > { %v1040_v63 = vpop.f32.mrf.mxu2 }
 0x385   : > { %v394_v63 = vld [vmem:[%s4124_s8 + $0x22] sm:$0x1] }
 0x386   : > { %v412_v26 = vrot.slane %v394_v63, 4 }
 0x38a   : > { %1234 = vrot.lane.b32.xlu2 %v4178_v44, %s4064_s15 }
 0x392   : > { %1232 = vrot.lane.b32.xlu2 %v1231_v2, %s4063_s14 }
 0x3a6   : > { %v4299_v3 = vpop.f32.mrf.mxu2 }
 0x3ae   : > { %v1124_v5 = vpop.f32.mrf.mxu2 }
 0x3af   : > { %v362_v5 = vld [vmem:[%s4124_s8 + $0x39] sm:$0x1] }
 0x3b0   : > { %v383_v18 = vrot.slane %v362_v5, 1  ;;  %v501_v5 = vld [vmem:[%s4124_s8 + $0x35] sm:$0x1] }
 0x3b6   : > { %v4301_v6 = vpop.f32.mrf.mxu2 }
 0x3b7   : > { %v1365_v8 = vsel %vm353_vm1, %v4301_v6, -inf }
 0x3b8   : > { %1366 = vmax.xlane.f32.xlu1 %v1365_v8  ;;  %v381_v8 = vrot.slane %v361_v56, 2  ;;  %v546_v56 = vrot.slane %v531_v39, 7 }
 0x3ba   : > { %v382_v29 = vsel %vm345_vm8, %v381_v8, %v380_v14  ;;  %v519_v8 = vrot.slane %v500_v58, 3  ;;  %v537_v58 = vld [vmem:[%s4124_s8 + $0x3e] sm:$0x1] }
 0x3bb   : > { %v384_v42 = vsel %vm348_vm9, %v383_v18, %v382_v29  ;;  %v567_v29 = vld [vmem:[%s4124_s8 + $0x17] sm:$0x1] }
 0x3be   : > { %v1227_v10 = vpop.f32.mrf.mxu2 }
 0x3bf   : > { %v409_v10 = vsel %vm333_vm4, %v408_v54, %v407_v59  ;;  %v532_v54 = vld [vmem:[%s4124_s8 + $0x16] sm:$0x1] }
 0x3c6   : > { %v4305_v11 = vpop.f32.mrf.mxu2 }
 0x3c7   : > { %v1377_v9 = vsel %vm353_vm1, %v4305_v11, -inf }
 0x3c8   : > { %1378 = vmax.xlane.f32.xlu2 %v1377_v9 }
 0x3ce   : > { %v1331_v16 = vpop.f32.mrf.mxu2 }
 0x3cf   : > { %v497_v16 = vld [vmem:[%s4124_s8 + $0x15] sm:$0x1] }
 0x3d1   : > { %1336 = vrot.lane.b32.xlu1 %v1335_v19, %s4063_s14  ;;  %v511_v19 = vrot.slane %v496_v25, 7  ;;  %v418_v25 = vrot.slane %v397_v41, 1 }
 0x3d5   : > { %v933_v21 = vpop.xlane.xlu2 %932 }
 0x3d6   : > { %3874 = vrcp.f32 %v933_v21  ;;  %v395_v21 = vld [vmem:[%s4124_s8 + $0x2a] sm:$0x1] }
 0x3dc   : > { %v3875_v27 = vpop.eup %3874 }
 0x3dd   : > { %v963_v33 = vmul.f32 %v3875_v27, %v3871_v52  ;;  %v942_v37 = vpop.xlane.xlu2 %941  ;;  %v393_v52 = vld [vmem:[%s4124_s8 + $0x1a] sm:$0x1]  ;;  %v513_v27 = vrot.slane %v497_v16, 6  ;;  %v566_v16 = vld [vmem:[%s4124_s8 + $0xf] sm:$0x1] }
 0x3de   : > { %3876 = vrcp.f32 %v942_v37  ;;  %v410_v0 = vrot.slane %v393_v52, 5  ;;  %v512_v37 = vsel %vm330_vm3, %v511_v19, %v495_v28  ;;  %v521_v28 = vrot.slane %v501_v5, 2 }
 0x3df   : > { %v971_v45 = vpack.c.bf16 %v963_v33, %v963_v33  ;;  %v396_v33 = vld [vmem:[%s4124_s8 + $0x32] sm:$0x1]  ;;  %v514_v49 = vsel %vm333_vm4, %v513_v27, %v512_v37  ;;  %v581_v22 = vrot.slane %v566_v16, 7 }
 0x3e0   : > { %1497 = vrot.lane.b32.xlu2 %v4169_v36, %s4065_s16  ;;  %v1127_v36 = vpop.permute.xlu1 %1126  ;;  %v411_v24 = vsel %vm336_vm5, %v410_v0, %v409_v10  ;;  %v416_v48 = vrot.slane %v396_v33, 2  ;;  %v533_v0 = vld [vmem:[%s4124_s8 + $0x1e] sm:$0x1] }
 0x3e1   : > { %3724 = vmatmul.msk.bf16.vlgmr.msra.gmra.mxu3 %vm353_vm1, %v971_v45  ;;  %v1132_v9 = vsel %vm633_vm0, %v1127_v36, 0  ;;  %v413_v38 = vsel %vm339_vm6, %v412_v26, %v411_v24  ;;  %v499_v45 = vld [vmem:[%s4124_s8 + $0x25] sm:$0x1]  ;;  %v530_v36 = vld [vmem:[%s4124_s8 + $0x6] sm:$0x1] }
 0x3e2   : > { %v517_v59 = vrot.slane %v499_v45, 4  ;;  %v547_v10 = vsel %vm330_vm3, %v546_v56, %v530_v36  ;;  %v502_v26 = vld [vmem:[%s4124_s8 + $0x3d] sm:$0x1]  ;;  %v583_v45 = vrot.slane %v567_v29, 6 }
 0x3e3   : > { %v523_v37 = vrot.slane %v502_v26, 1 }
 0x3e4   : > { %v3877_v20 = vpop.eup %3876 }
 0x3e5   : > { %v1043_v32 = vpop.permute.xlu2 %1042  ;;  %v966_v31 = vmul.f32 %v3877_v20, %v4281_v55  ;;  %v954_v55 = vpop.xlane.xlu0 %953  ;;  %v534_v20 = vld [vmem:[%s4124_s8 + $0x26] sm:$0x1] }
 0x3e6   : > { %v1048_v2 = vsel %vm633_vm0, %v1043_v32, 0  ;;  %v516_v32 = vsel %vm336_vm5, %v515_v46, %v514_v49  ;;  %3878 = vrcp.f32 %v954_v55  ;;  %v552_v33 = vrot.slane %v534_v20, 4 }
 0x3e7   : > { %1057 = vmatpush.bf16.msrb.mxu3 %v1048_v2  ;;  %v974_v50 = vpack.c.bf16 %v966_v31, %v966_v31  ;;  %v548_v2 = vrot.slane %v532_v54, 6  ;;  %v518_v14 = vsel %vm339_vm6, %v517_v59, %v516_v32  ;;  %v535_v31 = vld [vmem:[%s4124_s8 + $0x2e] sm:$0x1] }
 0x3e8   : > { %1581 = vrot.lane.b32.xlu2 %v4167_v34, %s4065_s16  ;;  %v414_v34 = vrot.slane %v395_v21, 3  ;;  %v550_v21 = vrot.slane %v533_v0, 5  ;;  %v520_v24 = vsel %vm342_vm7, %v519_v8, %v518_v14  ;;  %v554_v41 = vrot.slane %v535_v31, 3  ;;  %v571_v8 = vld [vmem:[%s4124_s8 + $0x37] sm:$0x1] }
 0x3e9   : > { %v549_v18 = vsel %vm333_vm4, %v548_v2, %v547_v10  ;;  %v522_v39 = vsel %vm345_vm8, %v521_v28, %v520_v24  ;;  %v558_v0 = vrot.slane %v537_v58, 1  ;;  %v591_v20 = vrot.slane %v571_v8, 2  ;;  %v314_v31 = vld [vmem:[%s4124_s8 + $0x8] sm:$0x1] }
 0x3ea   : > { %v415_v52 = vsel %vm342_vm7, %v414_v34, %v413_v38  ;;  %v565_v34 = vld [vmem:[%s4124_s8 + $0x7] sm:$0x1]  ;;  %v551_v38 = vsel %vm336_vm5, %v550_v21, %v549_v18 }
 0x3eb   : > { %1141 = vmatpush.bf16.msra.mxu3 %v1132_v9  ;;  %v417_v63 = vsel %vm345_vm8, %v416_v48, %v415_v52  ;;  %v582_v48 = vsel %vm330_vm3, %v581_v22, %v565_v34  ;;  %v553_v55 = vsel %vm339_vm6, %v552_v33, %v551_v38  ;;  %v569_v52 = vld [vmem:[%s4124_s8 + $0x27] sm:$0x1]  ;;  %v315_v33 = vld [vmem:[%s4124_s8 + $0x10] sm:$0x1]  ;;  %v329_v34 = vrot.slane %v314_v31, 7 }
 0x3ec   : > { %v419_v19 = vsel %vm348_vm9, %v418_v25, %v417_v63  ;;  %v3879_v27 = vpop.eup %3878  ;;  %v584_v36 = vsel %vm333_vm4, %v583_v45, %v582_v48  ;;  %v570_v25 = vld [vmem:[%s4124_s8 + $0x2f] sm:$0x1]  ;;  %v587_v32 = vrot.slane %v569_v52, 4 }
 0x3ed   : > { %v1235_v47 = vpop.permute.xlu2 %1234  ;;  %v970_v46 = vmul.f32 %v3879_v27, %v4271_v40  ;;  %v1339_v56 = vpop.permute.xlu0 %1338  ;;  %v589_v10 = vrot.slane %v570_v25, 3 }
 0x3ee   : > { %v1240_v60 = vsel %vm695_vm2, %v1235_v47, 0  ;;  %v536_v47 = vld [vmem:[%s4124_s8 + $0x36] sm:$0x1]  ;;  %v1344_v63 = vsel %vm695_vm2, %v1339_v56, 0  ;;  %v318_v56 = vld [vmem:[%s4124_s8 + $0x28] sm:$0x1] }
 0x3ef   : > { %v556_v59 = vrot.slane %v536_v47, 2  ;;  %v978_v40 = vpack.c.bf16 %v970_v46, %v970_v46  ;;  %v426_v47 = vld [vmem:[%s4124_s8 + $0xb] sm:$0x1] }
 0x3f0   : > { %385 = vrot.lane.b32.xlu2 %v384_v42, %s4062_s13  ;;  %v568_v42 = vld [vmem:[%s4124_s8 + $0x1f] sm:$0x1]  ;;  %v441_v52 = vrot.slane %v426_v47, 7 }
 0x3f1   : > { %3727 = vmatmul.msk.bf16.vlgmr.msrb.gmra.mxu3 %vm353_vm1, %v974_v50  ;;  %v524_v50 = vsel %vm348_vm9, %v523_v37, %v522_v39  ;;  %v585_v54 = vrot.slane %v568_v42, 5  ;;  %v313_v37 = vld [vmem:[%s4124_s8] sm:$0x1]  ;;  %v316_v39 = vld [vmem:[%s4124_s8 + $0x18] sm:$0x1]  ;;  %v332_v42 = vrot.slane %v315_v33, 6 }
 0x3f2   : > { %1249 = vmatpush.bf16.xpose.msrb.mxu3 %v1240_v60  ;;  %v555_v60 = vsel %vm342_vm7, %v554_v41, %v553_v55  ;;  %v331_v46 = vsel %vm330_vm3, %v329_v34, %v313_v37  ;;  %v317_v41 = vld [vmem:[%s4124_s8 + $0x20] sm:$0x1]  ;;  %v335_v48 = vrot.slane %v316_v39, 5  ;;  %v431_v33 = vld [vmem:[%s4124_s8 + $0x33] sm:$0x1] }
 0x3f3   : > { %v586_v2 = vsel %vm336_vm5, %v585_v54, %v584_v36  ;;  %v557_v5 = vsel %vm345_vm8, %v556_v59, %v555_v60  ;;  %v338_v58 = vrot.slane %v317_v41, 4  ;;  %v425_v59 = vld [vmem:[%s4124_s8 + $0x3] sm:$0x1]  ;;  %v428_v60 = vld [vmem:[%s4124_s8 + $0x1b] sm:$0x1]  ;;  %v451_v47 = vrot.slane %v431_v33, 2 }
 0x3f4   : > { %v4366_v9 = vpop.f32.mrf.mxu3  ;;  %v588_v14 = vsel %vm339_vm6, %v587_v32, %v586_v2  ;;  %v559_v16 = vsel %vm348_vm9, %v558_v0, %v557_v5  ;;  %v319_v32 = vld [vmem:[%s4124_s8 + $0x30] sm:$0x1]  ;;  %v442_v0 = vsel %vm330_vm3, %v441_v52, %v425_v59  ;;  %v429_v5 = vld [vmem:[%s4124_s8 + $0x23] sm:$0x1]  ;;  %v445_v8 = vrot.slane %v428_v60, 5 }
 0x3f5   : > { %v590_v21 = vsel %vm342_vm7, %v589_v10, %v588_v14  ;;  %v1233_v24 = vpop.permute.xlu2 %1232  ;;  %v344_v10 = vrot.slane %v319_v32, 2  ;;  %v462_v39 = vld [vmem:[%s4124_s8 + $0x14] sm:$0x1]  ;;  %v465_v60 = vld [vmem:[%s4124_s8 + $0x2c] sm:$0x1] }
 0x3f6   : > { %v592_v28 = vsel %vm345_vm8, %v591_v20, %v590_v21 }
 0x3f8   : > { %420 = vrot.lane.b32.xlu2 %v419_v19, %s4062_s13  ;;  %v572_v19 = vld [vmem:[%s4124_s8 + $0x3f] sm:$0x1] }
 0x3f9   : > { %v593_v26 = vrot.slane %v572_v19, 1 }
 0x3fb   : > { %v594_v18 = vsel %vm348_vm9, %v593_v26, %v592_v28  ;;  %v430_v26 = vld [vmem:[%s4124_s8 + $0x2b] sm:$0x1]  ;;  %v447_v28 = vrot.slane %v429_v5, 4  ;;  %v467_v5 = vld [vmem:[%s4124_s8 + $0x3c] sm:$0x1] }
 0x3fc   : > { %v833_v49 = vpop.f32.mrf.mxu3  ;;  %v449_v34 = vrot.slane %v430_v26, 3 }
 0x3fd   : > { %v334_v49 = vsel %vm333_vm4, %v332_v42, %v331_v46  ;;  %v460_v46 = vld [vmem:[%s4124_s8 + $0x4] sm:$0x1] }
 0x3fe   : > { %v337_v36 = vsel %vm336_vm5, %v335_v48, %v334_v49  ;;  %v463_v49 = vld [vmem:[%s4124_s8 + $0x1c] sm:$0x1] }
 0x3ff   : > { %v340_v2 = vsel %vm339_vm6, %v338_v58, %v337_v36  ;;  %v464_v58 = vld [vmem:[%s4124_s8 + $0x24] sm:$0x1]  ;;  %v480_v59 = vrot.slane %v463_v49, 5 }
 0x400   : > { %525 = vrot.lane.b32.xlu2 %v524_v50, %s4062_s13  ;;  %v427_v50 = vld [vmem:[%s4124_s8 + $0x13] sm:$0x1] }
 0x401   : > { %3731 = vmatmul.msk.bf16.vlgmr.msra.gmra.mxu3 %vm353_vm1, %v978_v40  ;;  %v443_v25 = vrot.slane %v427_v50, 6 }
 0x402   : > { %1353 = vmatpush.bf16.xpose.msra.mxu3 %v1344_v63  ;;  %v341_v63 = vrot.slane %v318_v56, 3 }
 0x403   : > { %v444_v14 = vsel %vm333_vm4, %v443_v25, %v442_v0  ;;  %v482_v25 = vrot.slane %v464_v58, 4  ;;  %v484_v0 = vrot.slane %v465_v60, 3 }
 0x404   : > { %v343_v20 = vsel %vm342_vm7, %v341_v63, %v340_v2  ;;  %v466_v63 = vld [vmem:[%s4124_s8 + $0x34] sm:$0x1] }
 0x408   : > { %560 = vrot.lane.b32.xlu2 %v559_v16, %s4062_s13 }
 0x410   : > { %595 = vrot.lane.b32.xlu2 %v594_v18, %s4062_s13 }
 0x411   : > { %3735 = vmatmul.msk.bf16.vlgmr.msrb.gmra.mxu3 %vm695_vm2, %v1233_v24  ;;  %v446_v24 = vsel %vm336_vm5, %v445_v8, %v444_v14  ;;  %v486_v8 = vrot.slane %v466_v63, 2 }
 0x412   : > { %v448_v37 = vsel %vm339_vm6, %v447_v28, %v446_v24 }
 0x413   : > { %v450_v48 = vsel %vm342_vm7, %v449_v34, %v448_v37 }
 0x414   : > { %v452_v56 = vsel %vm345_vm8, %v451_v47, %v450_v48 }
 0x42b   : > { %v1367_v29 = vpop.xlane.xlu1 %1366 }
 0x42c   : > { %v1385_v22 = vsub.f32 %v4301_v6, %v1367_v29  ;;  %v898_v6 = vsel %vm353_vm1, %v4366_v9, -inf  ;;  %v461_v29 = vld [vmem:[%s4124_s8 + $0xc] sm:$0x1] }
 0x42d   : > { %v476_v42 = vrot.slane %v461_v29, 7 }
 0x42e   : > { %v1395_v27 = vmul.f32 1.442695, %v1385_v22 }
 0x42f   : > { %v477_v52 = vsel %vm330_vm3, %v476_v42, %v460_v46 }
 0x430   : > { %3880 = vpow2.f32 %v1395_v27  ;;  %v346_v27 = vsel %vm345_vm8, %v344_v10, %v343_v20  ;;  %v488_v10 = vrot.slane %v467_v5, 1 }
 0x436   : > { %v4411_v38 = vpop.eup %3880 }
 0x437   : > { %v1413_v45 = vsel %vm353_vm1, %v4411_v38, 0.0 }
 0x438   : > { %1414 = vadd.xlane.f32.xlu0 %v1413_v45 }
 0x439   : > { %899 = vmax.xlane.f32.xlu2 %v898_v6  ;;  %v432_v6 = vld [vmem:[%s4124_s8 + $0x3b] sm:$0x1] }
 0x43b   : > { %v1379_v55 = vpop.xlane.xlu2 %1378 }
 0x43c   : > { %v1389_v54 = vsub.f32 %v4305_v11, %v1379_v55  ;;  %v320_v11 = vld [vmem:[%s4124_s8 + $0x38] sm:$0x1]  ;;  %v478_v55 = vrot.slane %v462_v39, 6 }
 0x43d   : > { %v347_v18 = vrot.slane %v320_v11, 1 }
 0x43e   : > { %v1403_v40 = vmul.f32 1.442695, %v1389_v54  ;;  %v453_v54 = vrot.slane %v432_v6, 1  ;;  %v479_v36 = vsel %vm333_vm4, %v478_v55, %v477_v52  ;;  %v3756_v55 = vld [vmem:[%s5526_s1 + $0x4] sm:$0xf] }
 0x43f   : > { %v349_v45 = vsel %vm348_vm9, %v347_v18, %v346_v27  ;;  %v481_v32 = vsel %vm336_vm5, %v480_v59, %v479_v36  ;;  %v886_v27 = vsel %vm353_vm1, %v4227_v30, -inf  ;;  %v1761_v52 = vsel %vm633_vm0, %v3756_v55, 0 }
 0x440   : > { %3882 = vpow2.f32 %v1403_v40  ;;  %v454_v40 = vsel %vm348_vm9, %v453_v54, %v452_v56  ;;  %v483_v2 = vsel %vm339_vm6, %v482_v25, %v481_v32 }
 0x441   : > { %v485_v11 = vsel %vm342_vm7, %v484_v0, %v483_v2 }
 0x442   : > { %v487_v14 = vsel %vm345_vm8, %v486_v8, %v485_v11 }
 0x443   : > { %v1337_v16 = vpop.permute.xlu1 %1336  ;;  %v1498_v19 = vpop.permute.xlu2 %1497 }
 0x444   : > { %v1503_v21 = vsel %vm633_vm0, %v1498_v19, 0  ;;  %3739 = vmatmul.msk.bf16.vlgmr.msra.gmra.mxu3 %vm695_vm2, %v1337_v16  ;;  %v489_v16 = vsel %vm348_vm9, %v488_v10, %v487_v14 }
 0x445   : > { %1512 = vmatpush.bf16.msra.mxu2 %v1503_v21 }
 0x446   : > { %v4440_v22 = vpop.eup %3882 }
 0x447   : > { %v1425_v31 = vsel %vm353_vm1, %v4440_v22, 0.0 }
 0x448   : > { %1426 = vadd.xlane.f32.xlu1 %v1425_v31 }
 0x44b   : > { %v1582_v41 = vpop.permute.xlu2 %1581 }
 0x44c   : > { %v1587_v50 = vsel %vm633_vm0, %v1582_v41, 0  ;;  %350 = vrot.lane.b32.xlu0 %v349_v45, %s4062_s13  ;;  %v895_v45 = vsel %vm353_vm1, %v4233_v35, -inf }
 0x44d   : > { %1596 = vmatpush.bf16.msrb.mxu2 %v1587_v50 }
 0x453   : > { %v386_v19 = vpop.permute.xlu2 %385 }
 0x454   : > { %455 = vrot.lane.b32.xlu0 %v454_v40, %s4062_s13  ;;  %389 = vst.msk [vmem:[#allocation2 + $0x8] sm:$0xff] %vm353_vm1, %v386_v19 }
 0x45b   : > { %v421_v21 = vpop.permute.xlu2 %420  ;;  %v1730_v2 = vld [vmem:[#allocation2 + $0x8] sm:$0xff] }
 0x45c   : > { %424 = vst.msk [vmem:[#allocation2 + $0x10] sm:$0xff] %vm353_vm1, %v421_v21 }
 0x461   : > { %490 = vrot.lane.b32.xlu1 %v489_v16, %s4062_s13 }
 0x463   : > { %v526_v28 = vpop.permute.xlu2 %525  ;;  %v1731_v8 = vld [vmem:[#allocation2 + $0x10] sm:$0xff] }
 0x464   : > { %v4471_v20 = vpop.f32.mrf.mxu3  ;;  %529 = vst.msk [vmem:[#allocation2 + $0x28] sm:$0xff] %vm353_vm1, %v526_v28 }
 0x46b   : > { %v561_v24 = vpop.permute.xlu2 %560  ;;  %v1734_v21 = vld [vmem:[#allocation2 + $0x28] sm:$0xff] }
 0x46c   : > { %v998_v26 = vpop.f32.mrf.mxu3  ;;  %564 = vst.msk [vmem:[#allocation2 + $0x30] sm:$0xff] %vm353_vm1, %v561_v24 }
 0x473   : > { %v596_v31 = vpop.permute.xlu2 %595  ;;  %v1735_v24 = vld [vmem:[#allocation2 + $0x30] sm:$0xff] }
 0x474   : > { %v4475_v18 = vpop.f32.mrf.mxu3  ;;  %599 = vst.msk [vmem:[#allocation2 + $0x38] sm:$0xff] %vm353_vm1, %v596_v31 }
 0x47c   : > { %v1061_v29 = vpop.f32.mrf.mxu3 }
 0x47d   : > { %v1736_v29 = vld [vmem:[#allocation2 + $0x38] sm:$0xff] }
 0x47e   : > { %887 = vmax.xlane.f32.xlu0 %v886_v27  ;;  %v1746_v31 = vpack.c.bf16 %v1736_v29, %v1735_v24 }
 0x484   : > { %v4481_v33 = vpop.f32.mrf.mxu3 }
 0x48c   : > { %v1145_v34 = vpop.f32.mrf.mxu3 }
 0x492   : > { %1000 = vrot.lane.b32.xlu0 %v4176_v43, %s4062_s13 }
 0x494   : > { %v4485_v37 = vpop.f32.mrf.mxu3 }
 0x495   : > { %v1368_v39 = vsel %vm353_vm1, %v4485_v37, -inf }
 0x496   : > { %1369 = vmax.xlane.f32.xlu2 %v1368_v39 }
 0x49c   : > { %v1253_v42 = vpop.f32.mrf.mxu3 }
 0x49e   : > { %896 = vmax.xlane.f32.xlu2 %v895_v45 }
 0x4ab   : > { %v1415_v46 = vpop.xlane.xlu0 %1414 }
 0x4ac   : > { %3884 = vrcp.f32 %v1415_v46  ;;  %v900_v6 = vpop.xlane.xlu2 %899 }
 0x4ad   : > { %v912_v47 = vsub.f32 %v4366_v9, %v900_v6  ;;  %v1178_v6 = vunpack.c.l.b16 %v4202_v1 }
 0x4af   : > { %v925_v41 = vmul.f32 1.442695, %v912_v47  ;;  %v1179_v47 = vpack.c.b16 %v1178_v6, %v1178_v6 }
 0x4b1   : > { %3886 = vpow2.f32 %v925_v41 }
 0x4b2   : > { %v3885_v48 = vpop.eup %3884 }
 0x4b3   : > { %v1441_v49 = vmul.f32 %v3885_v48, %v4411_v38 }
 0x4b5   : > { %v1449_v50 = vpack.c.bf16 %v1441_v49, %v1441_v49 }
 0x4b7   : > { %3742 = vmatmul.msk.bf16.vlgmr.msra.gmra.mxu2 %vm353_vm1, %v1449_v50  ;;  %v4498_v54 = vpop.eup %3886 }
 0x4b8   : > { %1770 = vmatpush.bf16.msra.mxu2 %v1761_v52  ;;  %v946_v9 = vsel %vm353_vm1, %v4498_v54, 0.0 }
 0x4bb   : > { %v1427_v56 = vpop.xlane.xlu1 %1426 }
 0x4bc   : > { %3888 = vrcp.f32 %v1427_v56  ;;  %947 = vadd.xlane.f32.xlu0 %v946_v9 }
 0x4be   : > { %v351_v58 = vpop.permute.xlu0 %350 }
 0x4bf   : > { %354 = vst.msk [vmem:[#allocation2] sm:$0xff] %vm353_vm1, %v351_v58 }
 0x4c2   : > { %v3889_v38 = vpop.eup %3888 }
 0x4c3   : > { %v1445_v59 = vmul.f32 %v3889_v38, %v4440_v22 }
 0x4c5   : > { %v1453_v36 = vpack.c.bf16 %v1445_v59, %v1445_v59 }
 0x4c6   : > { %v456_v40 = vpop.permute.xlu0 %455  ;;  %v1729_v63 = vld [vmem:[#allocation2] sm:$0xff] }
 0x4c7   : > { %459 = vst.msk [vmem:[#allocation2 + $0x18] sm:$0xff] %vm353_vm1, %v456_v40  ;;  %v1355_v60 = vpop.f32.mrf.mxu3  ;;  %3746 = vmatmul.msk.bf16.vlgmr.msrb.gmra.mxu2 %vm353_vm1, %v1453_v36  ;;  %v1743_v5 = vpack.c.bf16 %v1730_v2, %v1729_v63 }
 0x4c8   : > { %v1380_v25 = vsel %vm353_vm1, %v1355_v60, -inf }
 0x4c9   : > { %1381 = vmax.xlane.f32.xlu2 %v1380_v25 }
 0x4ce   : > { %v1732_v22 = vld [vmem:[#allocation2 + $0x18] sm:$0xff] }
 0x4cf   : > { %v1357_v32 = vpop.f32.mrf.mxu3  ;;  %v1744_v11 = vpack.c.bf16 %v1732_v22, %v1731_v8 }
 0x4d0   : > { %v4559_v32 = vld [vmem:[%s5527_s2 + $0x1] ss:$0 sm:$0xff] }
 0x4d3   : > { %v491_v0 = vpop.permute.xlu1 %490 }
 0x4d4   : > { %494 = vst.msk [vmem:[#allocation2 + $0x20] sm:$0xff] %vm353_vm1, %v491_v0 }
 0x4d7   : > { %3758 = vmatmul.msk.bf16.vlgmr.msra.gmra.mxu2 %vm353_vm1, %v1743_v5 }
 0x4db   : > { %v1733_v16 = vld [vmem:[#allocation2 + $0x20] sm:$0xff] }
 0x4dc   : > { %v1745_v26 = vpack.c.bf16 %v1734_v21, %v1733_v16  ;;  %v1152_v16 = vunpack.c.l.b16 %v4195_v57  ;;  %v1256_v57 = vunpack.c.l.b16 %v4213_v15 }
 0x4e1   : > { %1182 = vrot.lane.b32.xlu2 %v4176_v43, %s4064_s15 }
 0x4e7   : > { %3759 = vmatmul.msk.bf16.gmra.mxu2 %vm353_vm1, %v1744_v11 }
 0x4e9   : > { %1518 = vrot.lane.b32.xlu2 %v4178_v44, %s4065_s16 }
 0x4f1   : > { %v888_v10 = vpop.xlane.xlu0 %887  ;;  %1063 = vrot.lane.b32.xlu2 %v4186_v51, %s4062_s13 }
 0x4f2   : > { %v908_v14 = vsub.f32 %v4227_v30, %v888_v10 }
 0x4f4   : > { %v917_v19 = vmul.f32 1.442695, %v908_v14 }
 0x4f6   : > { %3890 = vpow2.f32 %v917_v19 }
 0x4f7   : > { %3760 = vmatmul.msk.bf16.gmra.mxu2 %vm353_vm1, %v1745_v26  ;;  %v1153_v26 = vpack.c.b16 %v1152_v16, %v1152_v16 }
 0x4f9   : > { %1156 = vrot.lane.b32.xlu2 %v4156_v23, %s4064_s15 }
 0x4fc   : > { %v4520_v28 = vpop.eup %3890 }
 0x4fd   : > { %v934_v44 = vsel %vm353_vm1, %v4520_v28, 0.0 }
 0x4fe   : > { %935 = vadd.xlane.f32.xlu1 %v934_v44 }
 0x504   : > { %v1001_v27 = vpop.permute.xlu0 %1000 }
 0x505   : > { %v1006_v30 = vsel %vm633_vm0, %v1001_v27, 0 }
 0x506   : > { %1015 = vmatpush.bf16.msra.mxu1 %v1006_v30 }
 0x507   : > { %3761 = vmatmul.msk.bf16.gmra.mxu2 %vm353_vm1, %v1746_v31 }
 0x509   : > { %v1370_v34 = vpop.xlane.xlu2 %1369 }
 0x50a   : > { %v1386_v39 = vsub.f32 %v4485_v37, %v1370_v34  ;;  %v1282_v37 = vunpack.c.l.b16 %v4287_v61  ;;  %v1257_v34 = vpack.c.b16 %v1256_v57, %v1256_v57 }
 0x50c   : > { %v1397_v42 = vmul.f32 1.442695, %v1386_v39  ;;  %v1283_v41 = vpack.c.b16 %v1282_v37, %v1282_v37 }
 0x50e   : > { %3892 = vpow2.f32 %v1397_v42 }
 0x511   : > { %v897_v48 = vpop.xlane.xlu2 %896 }
 0x512   : > { %v911_v9 = vsub.f32 %v4233_v35, %v897_v48 }
 0x514   : > { %v4527_v45 = vpop.eup %3892  ;;  %v923_v61 = vmul.f32 1.442695, %v911_v9 }
 0x515   : > { %v1416_v46 = vsel %vm353_vm1, %v4527_v45, 0.0 }
 0x516   : > { %1417 = vadd.xlane.f32.xlu0 %v1416_v46 }
 0x517   : > { %1084 = vrot.lane.b32.xlu1 %v4261_v17, %s4062_s13 }
 0x51f   : > { %1180 = vrot.lane.b32.xlu1 %v1179_v47, %s4063_s14 }
 0x527   : > { %1286 = vrot.lane.b32.xlu1 %v4261_v17, %s4064_s15 }
 0x52a   : > { %1602 = vrot.lane.b32.xlu0 %v4190_v53, %s4065_s16 }
 0x52f   : > { %1284 = vrot.lane.b32.xlu1 %v1283_v41, %s4063_s14  ;;  %v948_v48 = vpop.xlane.xlu0 %947 }
 0x53a   : > { %v4541_v49 = vpop.f32.mrf.mxu2 }
 0x53c   : > { %v1382_v55 = vpop.xlane.xlu2 %1381 }
 0x53d   : > { %v1390_v50 = vsub.f32 %v1355_v60, %v1382_v55 }
 0x53f   : > { %v1405_v56 = vmul.f32 1.442695, %v1390_v50 }
 0x541   : > { %3894 = vpow2.f32 %v1405_v56 }
 0x542   : > { %v1516_v1 = vpop.f32.mrf.mxu2  ;;  %3896 = vpow2.f32 %v923_v61 }
 0x544   : > { %v4543_v52 = vpop.permute.xlu2 %1182 }
 0x547   : > { %v4549_v59 = vpop.eup %3894 }
 0x548   : > { %v1428_v40 = vsel %vm353_vm1, %v4549_v59, 0.0  ;;  %v4553_v25 = vpop.eup %3896 }
 0x549   : > { %v943_v63 = vsel %vm353_vm1, %v4553_v25, 0.0 }
 0x54a   : > { %v4546_v58 = vpop.f32.mrf.mxu2 }
 0x54c   : > { %v1519_v38 = vpop.permute.xlu2 %1518 }
 0x54d   : > { %v1524_v53 = vsel %vm633_vm0, %v1519_v38, 0  ;;  %v1188_v38 = vsel %vm695_vm2, %v4543_v52, 0 }
 0x54e   : > { %1533 = vmatpush.bf16.msrb.mxu3 %v1524_v53 }
 0x552   : > { %v1600_v36 = vpop.f32.mrf.mxu2 }
 0x554   : > { %1429 = vadd.xlane.f32.xlu0 %v1428_v40  ;;  %v1064_v60 = vpop.permute.xlu2 %1063 }
 0x555   : > { %v1069_v35 = vsel %vm633_vm0, %v1064_v60, 0 }
 0x556   : > { %1078 = vmatpush.bf16.msrb.mxu0 %v1069_v35 }
 0x559   : > { %944 = vadd.xlane.f32.xlu1 %v943_v63 }
 0x55a   : > { %v1772_v0 = vpop.f32.mrf.mxu2 }
 0x55b   : > { %v4564_v2 = vadd.f32 %v4559_v32, %v1772_v0 }
 0x55c   : > { %v1157_v5 = vpop.permute.xlu2 %1156 }
 0x55d   : > { %v1808_v22 = vpack.c.bf16 %v4564_v2, %v4564_v2  ;;  %v1162_v8 = vsel %vm695_vm2, %v1157_v5, 0 }
 0x55e   : > { %1171 = vmatpush.bf16.xpose.msra.mxu0 %v1162_v8 }
 0x55f   : > { %v1817_v11 = vunpack.c.l.b16 %v1808_v22 }
 0x561   : > { %v4569_v10 = vpack.c.b16 %v1817_v11, %v1817_v11 }
 0x562   : > { %v1774_v14 = vpop.f32.mrf.mxu2 }
 0x563   : > { %v4573_v19 = vadd.f32 %v4559_v32, %v1774_v14  ;;  %1819 = vrot.lane.b32.xlu2 %v4569_v10, %s4061_s12 }
 0x565   : > { %v1809_v21 = vpack.c.bf16 %v4573_v19, %v4573_v19 }
 0x567   : > { %v1841_v44 = vunpack.c.l.b16 %v1809_v21 }
 0x568   : > { %1154 = vrot.lane.b32.xlu0 %v1153_v26, %s4063_s14 }
 0x569   : > { %v4580_v24 = vpack.c.b16 %v1841_v44, %v1841_v44 }
 0x56a   : > { %v1777_v29 = vpop.f32.mrf.mxu2 }
 0x56b   : > { %v4583_v27 = vadd.f32 %v4559_v32, %v1777_v29  ;;  %1843 = vrot.lane.b32.xlu2 %v4580_v24, %s4061_s12 }
 0x56d   : > { %v1810_v30 = vpack.c.bf16 %v4583_v27, %v4583_v27 }
 0x56f   : > { %v1865_v31 = vunpack.c.l.b16 %v1810_v30 }
 0x570   : > { %1260 = vrot.lane.b32.xlu0 %v4186_v51, %s4064_s15 }
 0x571   : > { %v4592_v39 = vpack.c.b16 %v1865_v31, %v1865_v31  ;;  %v936_v42 = vpop.xlane.xlu1 %935 }
 0x572   : > { %3898 = vrcp.f32 %v936_v42  ;;  %v4594_v46 = vpop.f32.mrf.mxu2  ;;  %1258 = vrot.lane.b32.xlu1 %v1257_v34, %s4063_s14 }
 0x573   : > { %1867 = vrot.lane.b32.xlu2 %v4592_v39, %s4061_s12  ;;  %3900 = vrcp.f32 %v948_v48 }
 0x578   : > { %v3899_v15 = vpop.eup %3898 }
 0x579   : > { %v964_v6 = vmul.f32 %v3899_v15, %v4520_v28  ;;  %v3901_v50 = vpop.eup %3900 }
 0x57a   : > { %v1782_v47 = vpop.f32.mrf.mxu2  ;;  %v968_v1 = vmul.f32 %v3901_v50, %v4498_v54 }
 0x57b   : > { %v972_v37 = vpack.c.bf16 %v964_v6, %v964_v6  ;;  %v4601_v41 = vadd.f32 %v4559_v32, %v1782_v47  ;;  %v1792_v47 = vmul.f32 0.5, %v4564_v2 }
 0x57c   : > { %v976_v36 = vpack.c.bf16 %v968_v1, %v968_v1 }
 0x57d   : > { %3725 = vmatmul.msk.bf16.vlgmr.msra.gmra.mxu1 %vm353_vm1, %v972_v37  ;;  %v4633_v48 = vpack.c.bf16 %v1792_v47, %v1792_v47 }
 0x582   : > { %v4604_v55 = vpop.f32.mrf.mxu2 }
 0x589   : > { %v1085_v56 = vpop.permute.xlu1 %1084  ;;  %v1418_v9 = vpop.xlane.xlu0 %1417 }
 0x58a   : > { %v1090_v61 = vsel %vm633_vm0, %v1085_v56, 0  ;;  %3902 = vrcp.f32 %v1418_v9  ;;  %v1787_v28 = vpop.f32.mrf.mxu2 }
 0x58b   : > { %v4611_v53 = vadd.f32 %v4559_v32, %v1787_v28  ;;  %1099 = vmatpush.bf16.msrb.mxu1 %v1090_v61  ;;  %v1794_v61 = vmul.f32 0.5, %v4583_v27 }
 0x58d   : > { %v1814_v40 = vpack.c.bf16 %v4611_v53, %v4611_v53  ;;  %v4649_v28 = vpack.c.bf16 %v1794_v61, %v1794_v61 }
 0x58e   : > { %3729 = vmatmul.msk.bf16.vlgmr.msrb.gmra.mxu1 %vm353_vm1, %v976_v36 }
 0x58f   : > { %1197 = vmatpush.bf16.xpose.msra.mxu1 %v1188_v38  ;;  %v1961_v54 = vunpack.c.l.b16 %v1814_v40  ;;  %v1798_v40 = vmul.f32 0.5, %v4611_v53 }
 0x590   : > { %v3903_v60 = vpop.eup %3902 }
 0x591   : > { %v1442_v35 = vmul.f32 %v3903_v60, %v4527_v45  ;;  %v4617_v63 = vpack.c.b16 %v1961_v54, %v1961_v54  ;;  %v1181_v0 = vpop.permute.xlu1 %1180  ;;  %v4657_v60 = vpack.c.bf16 %v1798_v40, %v1798_v40 }
 0x592   : > { %v4679_v47 = vpop.f32.mrf.mxu2 }
 0x593   : > { %v1450_v5 = vpack.c.bf16 %v1442_v35, %v1442_v35  ;;  %1963 = vrot.lane.b32.xlu0 %v4617_v63, %s4061_s12 }
 0x595   : > { %3743 = vmatmul.msk.bf16.vlgmr.msrb.gmra.mxu3 %vm353_vm1, %v1450_v5 }
 0x599   : > { %v1287_v52 = vpop.permute.xlu1 %1286 }
 0x59a   : > { %v1292_v22 = vsel %vm695_vm2, %v1287_v52, 0 }
 0x59b   : > { %1301 = vmatpush.bf16.xpose.msrb.mxu1 %v1292_v22 }
 0x59c   : > { %v1603_v8 = vpop.permute.xlu0 %1602 }
 0x59d   : > { %v1608_v11 = vsel %vm633_vm0, %v1603_v8, 0 }
 0x59e   : > { %3733 = vmatmul.msk.bf16.vlgmr.msra.gmra.mxu1 %vm695_vm2, %v1181_v0  ;;  %1617 = vmatpush.bf16.msra.mxu3 %v1608_v11 }
 0x5a1   : > { %v1285_v45 = vpop.permute.xlu1 %1284 }
 0x5ae   : > { %3737 = vmatmul.msk.bf16.vlgmr.msrb.gmra.mxu1 %vm695_vm2, %v1285_v45 }
 0x5bd   : > { %v1820_v14 = vpop.permute.xlu2 %1819 }
 0x5be   : > { %v1825_v16 = vsel %vm695_vm2, %v1820_v14, 0 }
 0x5bf   : > { %1834 = vmatpush.bf16.xpose.msrb.mxu3 %v1825_v16 }
 0x5c5   : > { %v1844_v57 = vpop.permute.xlu2 %1843 }
 0x5c6   : > { %v1849_v34 = vsel %vm695_vm2, %v1844_v57, 0 }
 0x5c7   : > { %v1430_v21 = vpop.xlane.xlu0 %1429 }
 0x5c8   : > { %3904 = vrcp.f32 %v1430_v21 }
 0x5cc   : > { %v945_v26 = vpop.xlane.xlu1 %944 }
 0x5cd   : > { %3906 = vrcp.f32 %v945_v26  ;;  %v1868_v37 = vpop.permute.xlu2 %1867 }
 0x5ce   : > { %v3905_v44 = vpop.eup %3904  ;;  %v1873_v50 = vsel %vm695_vm2, %v1868_v37, 0 }
 0x5cf   : > { %v1446_v29 = vmul.f32 %v3905_v44, %v4549_v59 }
 0x5d1   : > { %v1454_v30 = vpack.c.bf16 %v1446_v29, %v1446_v29 }
 0x5d3   : > { %v3907_v31 = vpop.eup %3906  ;;  %3747 = vmatmul.msk.bf16.vlgmr.msra.gmra.mxu3 %vm353_vm1, %v1454_v30 }
 0x5d4   : > { %v967_v42 = vmul.f32 %v3907_v31, %v4553_v25  ;;  %1858 = vmatpush.bf16.xpose.msra.mxu3 %v1849_v34  ;;  %v1793_v25 = vmul.f32 0.5, %v4573_v19 }
 0x5d6   : > { %v975_v15 = vpack.c.bf16 %v967_v42, %v967_v42  ;;  %v4641_v56 = vpack.c.bf16 %v1793_v25, %v1793_v25 }
 0x5d8   : > { %3728 = vmatmul.msk.bf16.vlgmr.msrb.gmra.mxu0 %vm353_vm1, %v975_v15 }
 0x5da   : > { %v1155_v6 = vpop.permute.xlu0 %1154 }
 0x5e2   : > { %v1261_v59 = vpop.permute.xlu0 %1260 }
 0x5e3   : > { %v1266_v1 = vsel %vm695_vm2, %v1261_v59, 0  ;;  %3762 = vmatmul.msk.bf16.vlgmr.msrb.gmra.mxu3 %vm695_vm2, %v4633_v48 }
 0x5e4   : > { %1882 = vmatpush.bf16.xpose.msrb.mxu3 %v1873_v50  ;;  %1275 = vmatpush.bf16.xpose.msrb.mxu0 %v1266_v1  ;;  %v1259_v2 = vpop.permute.xlu1 %1258 }
 0x5e8   : > { %3732 = vmatmul.msk.bf16.vlgmr.msra.gmra.mxu0 %vm695_vm2, %v1155_v6 }
 0x5f3   : > { %3763 = vmatmul.msk.bf16.vlgmr.msra.gmra.mxu3 %vm695_vm2, %v4641_v56 }
 0x5f8   : > { %3736 = vmatmul.msk.bf16.vlgmr.msrb.gmra.mxu0 %vm695_vm2, %v1259_v2 }
 0x5fa   : > { %v4646_v9 = vpop.f32.mrf.mxu1 }
 0x602   : > { %v1019_v38 = vpop.f32.mrf.mxu1 }
 0x603   : > { %3764 = vmatmul.msk.bf16.vlgmr.msrb.gmra.mxu3 %vm695_vm2, %v4649_v28 }
 0x605   : > { %v1964_v36 = vpop.permute.xlu0 %1963 }
 0x606   : > { %v1969_v19 = vsel %vm695_vm2, %v1964_v36, 0 }
 0x607   : > { %1978 = vmatpush.bf16.xpose.msrb.mxu2 %v1969_v19 }
 0x60b   : > { %v4655_v54 = vpop.f32.mrf.mxu1 }
 0x60e   : > { %3768 = vmatmul.msk.bf16.vlgmr.msrb.gmra.mxu2 %vm695_vm2, %v4657_v60 }
 0x613   : > { %v1103_v27 = vpop.f32.mrf.mxu1 }
 0x618   : > { %v4661_v35 = vpop.f32.mrf.mxu3 }
 0x61b   : > { %v1199_v0 = vpop.f32.mrf.mxu1 }
 0x61c   : > { %v1362_v5 = vsel %vm353_vm1, %v1199_v0, -inf }
 0x61d   : > { %1363 = vmax.xlane.f32.xlu2 %v1362_v5 }
 0x620   : > { %v1537_v52 = vpop.f32.mrf.mxu3 }
 0x623   : > { %v1201_v22 = vpop.f32.mrf.mxu1 }
 0x624   : > { %v4690_v22 = vadd.f32 %v4559_v32, %v4604_v55 }
 0x62b   : > { %v1303_v8 = vpop.f32.mrf.mxu1 }
 0x62c   : > { %v1374_v11 = vsel %vm353_vm1, %v1303_v8, -inf }
 0x62d   : > { %1375 = vmax.xlane.f32.xlu0 %v1374_v11  ;;  %v1813_v11 = vpack.c.bf16 %v4690_v22, %v4690_v22 }
 0x633   : > { %v1305_v53 = vpop.f32.mrf.mxu1 }
 0x635   : > { %1476 = vrot.lane.b32.xlu2 %v4176_v43, %s4065_s16 }
 0x655   : > { %v4667_v45 = vpop.f32.mrf.mxu0 }
 0x656   : > { %v4669_v14 = vpop.f32.mrf.mxu3 }
 0x65d   : > { %v1082_v16 = vpop.f32.mrf.mxu0 }
 0x65e   : > { %v1621_v21 = vpop.f32.mrf.mxu3 }
 0x665   : > { %v1173_v26 = vpop.f32.mrf.mxu0 }
 0x666   : > { %v4671_v44 = vpop.f32.mrf.mxu3  ;;  %v1359_v29 = vsel %vm353_vm1, %v1173_v26, -inf }
 0x667   : > { %1360 = vmax.xlane.f32.xlu0 %v1359_v29 }
 0x66d   : > { %v1175_v57 = vpop.f32.mrf.mxu0 }
 0x66e   : > { %v1838_v30 = vpop.f32.mrf.mxu3 }
 0x66f   : > { %v2433_v30 = vunpack.c.l.b16 %v4657_v60 }
 0x675   : > { %v1277_v31 = vpop.f32.mrf.mxu0 }
 0x676   : > { %v4674_v34 = vpop.f32.mrf.mxu3  ;;  %v1371_v42 = vsel %vm353_vm1, %v1277_v31, -inf }
 0x677   : > { %1372 = vmax.xlane.f32.xlu2 %v1371_v42 }
 0x67d   : > { %v1279_v43 = vpop.f32.mrf.mxu0 }
 0x67e   : > { %v1862_v15 = vpop.f32.mrf.mxu3 }
 0x67f   : > { %v2434_v15 = vpack.c.b16 %v2433_v30, %v2433_v30  ;;  %v1148_v30 = vpack.c.bf16 %v4475_v18, %v4291_v62 }
 0x686   : > { %v4677_v6 = vpop.f32.mrf.mxu3 }
 0x68e   : > { %v1886_v37 = vpop.f32.mrf.mxu3 }
 0x68f   : > { %v2014_v37 = vsel %vm353_vm1, %v4677_v6, -inf }
 0x690   : > { %v1364_v59 = vpop.xlane.xlu2 %1363 }
 0x691   : > { %v1384_v50 = vsub.f32 %v1199_v0, %v1364_v59  ;;  %v4681_v1 = vpop.f32.mrf.mxu2 }
 0x692   : > { %v2026_v60 = vsel %vm353_vm1, %v4681_v1, -inf }
 0x693   : > { %v1393_v25 = vmul.f32 1.442695, %v1384_v50 }
 0x695   : > { %3908 = vpow2.f32 %v1393_v25 }
 0x698   : > { %v1477_v2 = vpop.permute.xlu2 %1476 }
 0x699   : > { %v1482_v61 = vsel %vm633_vm0, %v1477_v2, 0  ;;  %v1982_v38 = vpop.f32.mrf.mxu2 }
 0x69a   : > { %1491 = vmatpush.bf16.msra.mxu1 %v1482_v61 }
 0x69b   : > { %v3909_v36 = vpop.eup %3908 }
 0x69c   : > { %v1410_v19 = vsel %vm353_vm1, %v3909_v36, 0.0 }
 0x69d   : > { %1411 = vadd.xlane.f32.xlu1 %v1410_v19  ;;  %v4731_v19 = vld [vmem:[%s5528_s3] sm:$0xf] }
 0x6a0   : > { %v1376_v40 = vpop.xlane.xlu0 %1375 }
 0x6a1   : > { %v1388_v27 = vsub.f32 %v1303_v8, %v1376_v40  ;;  %v1937_v8 = vunpack.c.l.b16 %v1813_v11 }
 0x6a3   : > { %v1401_v5 = vmul.f32 1.442695, %v1388_v27  ;;  %v4696_v53 = vpack.c.b16 %v1937_v8, %v1937_v8 }
 0x6a5   : > { %3910 = vpow2.f32 %v1401_v5 }
 0x6ab   : > { %v3911_v52 = vpop.eup %3910 }
 0x6ac   : > { %v1422_v0 = vsel %vm353_vm1, %v3911_v52, 0.0 }
 0x6ad   : > { %1423 = vadd.xlane.f32.xlu0 %v1422_v0  ;;  %v1689_v0 = vsel %vm1643_vm10, %v4731_v19, 0 }
 0x6b6   : > { %1560 = vrot.lane.b32.xlu1 %v4261_v17, %s4065_s16  ;;  %v4704_v17 = vadd.f32 %v4559_v32, %v4594_v46 }
 0x6b8   : > { %v1811_v55 = vpack.c.bf16 %v4704_v17, %v4704_v17 }
 0x6be   : > { %1455 = vrot.lane.b32.xlu1 %v4156_v23, %s4065_s16  ;;  %v1889_v23 = vunpack.c.l.b16 %v1811_v55 }
 0x6c0   : > { %v4710_v29 = vpack.c.b16 %v1889_v23, %v1889_v23 }
 0x6c6   : > { %1939 = vrot.lane.b32.xlu1 %v4696_v53, %s4061_s12 }
 0x6ce   : > { %1539 = vrot.lane.b32.xlu1 %v4186_v51, %s4065_s16 }
 0x6d6   : > { %2230 = vrot.lane.b32.xlu1 %v4617_v63, %s4062_s13 }
 0x6da   : > { %v1361_v16 = vpop.xlane.xlu0 %1360 }
 0x6db   : > { %v1383_v21 = vsub.f32 %v1173_v26, %v1361_v16 }
 0x6dd   : > { %v1391_v57 = vmul.f32 1.442695, %v1383_v21 }
 0x6de   : > { %1891 = vrot.lane.b32.xlu1 %v4710_v29, %s4061_s12 }
 0x6df   : > { %3912 = vpow2.f32 %v1391_v57 }
 0x6e5   : > { %v3913_v51 = vpop.eup %3912 }
 0x6e6   : > { %2437 = vrot.lane.b32.xlu1 %v4617_v63, %s4064_s15  ;;  %v1407_v46 = vsel %vm353_vm1, %v3913_v51, 0.0 }
 0x6e7   : > { %1408 = vadd.xlane.f32.xlu0 %v1407_v46 }
 0x6ea   : > { %v1373_v42 = vpop.xlane.xlu2 %1372 }
 0x6eb   : > { %v1387_v43 = vsub.f32 %v1277_v31, %v1373_v42 }
 0x6ed   : > { %v1399_v26 = vmul.f32 1.442695, %v1387_v43 }
 0x6ee   : > { %2435 = vrot.lane.b32.xlu1 %v2434_v15, %s4063_s14  ;;  %v1795_v15 = vmul.f32 0.5, %v4704_v17 }
 0x6ef   : > { %3914 = vpow2.f32 %v1399_v26  ;;  %2015 = vmax.xlane.f32.xlu0 %v2014_v37  ;;  %v1149_v26 = vpack.c.bf16 %v4655_v54, %v4667_v45 }
 0x6f5   : > { %v4721_v59 = vpop.eup %3914 }
 0x6f6   : > { %v1419_v50 = vsel %vm353_vm1, %v4721_v59, 0.0 }
 0x6f7   : > { %1420 = vadd.xlane.f32.xlu0 %v1419_v50 }
 0x6ff   : > { %2027 = vmax.xlane.f32.xlu0 %v2026_v60 }
 0x710   : > { %v1412_v31 = vpop.xlane.xlu1 %1411 }
 0x711   : > { %3916 = vrcp.f32 %v1412_v31 }
 0x717   : > { %v3917_v25 = vpop.eup %3916 }
 0x718   : > { %v1440_v2 = vmul.f32 %v3917_v25, %v3909_v36  ;;  %v1150_v25 = vpack.c.bf16 %v4481_v33, %v4299_v3  ;;  %v1797_v3 = vmul.f32 0.5, %v4690_v22  ;;  %v2329_v22 = vunpack.c.l.b16 %v4649_v28 }
 0x71a   : > { %v1448_v61 = vpack.c.bf16 %v1440_v2, %v1440_v2  ;;  %v4770_v33 = vpack.c.bf16 %v1797_v3, %v1797_v3 }
 0x71c   : > { %3741 = vmatmul.msk.bf16.vlgmr.msra.gmra.mxu1 %vm353_vm1, %v1448_v61 }
 0x720   : > { %v1424_v38 = vpop.xlane.xlu0 %1423 }
 0x721   : > { %3918 = vrcp.f32 %v1424_v38 }
 0x727   : > { %v3919_v40 = vpop.eup %3918 }
 0x728   : > { %v1444_v27 = vmul.f32 %v3919_v40, %v3911_v52  ;;  %v1561_v5 = vpop.permute.xlu1 %1560  ;;  %v1147_v52 = vpack.c.bf16 %v4646_v9, %v4471_v20  ;;  %v4750_v20 = vpack.c.bf16 %v1795_v15, %v1795_v15 }
 0x729   : > { %v1566_v11 = vsel %vm633_vm0, %v1561_v5, 0 }
 0x72a   : > { %v1452_v36 = vpack.c.bf16 %v1444_v27, %v1444_v27  ;;  %1575 = vmatpush.bf16.msrb.mxu1 %v1566_v11 }
 0x72d   : > { %3745 = vmatmul.msk.bf16.vlgmr.msrb.gmra.mxu1 %vm353_vm1, %v1452_v36 }
 0x72e   : > { %1698 = vmatpush.bf16.msra.mxu1 %v1689_v0  ;;  %v2330_v0 = vpack.c.b16 %v2329_v22, %v2329_v22 }
 0x730   : > { %v1456_v8 = vpop.permute.xlu1 %1455 }
 0x731   : > { %v1461_v55 = vsel %vm633_vm0, %v1456_v8, 0  ;;  %v1812_v8 = vpack.c.bf16 %v4601_v41, %v4601_v41 }
 0x732   : > { %1470 = vmatpush.bf16.msra.mxu0 %v1461_v55 }
 0x738   : > { %v1940_v23 = vpop.permute.xlu1 %1939 }
 0x739   : > { %v1945_v16 = vsel %vm695_vm2, %v1940_v23, 0 }
 0x73a   : > { %1954 = vmatpush.bf16.xpose.msrb.mxu1 %v1945_v16 }
 0x73d   : > { %3752 = vmatmul.msk.bf16.vlgmr.msra.gmra.mxu1 %vm695_vm2, %v1147_v52 }
 0x740   : > { %v1540_v21 = vpop.permute.xlu1 %1539 }
 0x741   : > { %v1545_v57 = vsel %vm633_vm0, %v1540_v21, 0  ;;  %v1628_v21 = vunpack.c.l.b16 %v4731_v19 }
 0x742   : > { %1554 = vmatpush.bf16.msrb.mxu0 %v1545_v57  ;;  %v2011_v57 = vsel %vm353_vm1, %v4674_v34, -inf }
 0x748   : > { %v4743_v46 = vpop.permute.xlu1 %2230 }
 0x74d   : > { %3753 = vmatmul.msk.bf16.gmra.mxu1 %vm695_vm2, %v1148_v30  ;;  %v1629_v30 = vpack.c.b16 %v1628_v21, %v1628_v21 }
 0x750   : > { %v1892_v42 = vpop.permute.xlu1 %1891 }
 0x751   : > { %v1897_v43 = vsel %vm695_vm2, %v1892_v42, 0  ;;  %v1630_v42 = vrot.slane %v1629_v30, 2 }
 0x752   : > { %1906 = vmatpush.bf16.xpose.msra.mxu3 %v1897_v43 }
 0x753   : > { %v1645_v15 = vsel %vm1643_vm10, %v1630_v42, 0 }
 0x758   : > { %v2438_v30 = vpop.permute.xlu1 %2437 }
 0x759   : > { %3765 = vmatmul.msk.bf16.vlgmr.msra.gmra.mxu3 %vm695_vm2, %v4750_v20 }
 0x75a   : > { %v1409_v9 = vpop.xlane.xlu0 %1408 }
 0x75b   : > { %3920 = vrcp.f32 %v1409_v9 }
 0x75d   : > { %3754 = vmatmul.msk.bf16.gmra.mxu1 %vm695_vm2, %v1149_v26 }
 0x761   : > { %v3921_v62 = vpop.eup %3920 }
 0x762   : > { %v1439_v18 = vmul.f32 %v3921_v62, %v3913_v51  ;;  %v2016_v37 = vpop.xlane.xlu0 %2015 }
 0x763   : > { %v2034_v50 = vsub.f32 %v4677_v6, %v2016_v37 }
 0x764   : > { %v1447_v60 = vpack.c.bf16 %v1439_v18, %v1439_v18 }
 0x765   : > { %v2044_v31 = vmul.f32 1.442695, %v2034_v50 }
 0x766   : > { %3740 = vmatmul.msk.bf16.vlgmr.msra.gmra.mxu0 %vm353_vm1, %v1447_v60 }
 0x767   : > { %3922 = vpow2.f32 %v2044_v31  ;;  %1654 = vmatpush.bf16.msra.mxu0 %v1645_v15 }
 0x76a   : > { %v1421_v17 = vpop.xlane.xlu0 %1420 }
 0x76b   : > { %3924 = vrcp.f32 %v1421_v17 }
 0x76d   : > { %v4761_v2 = vpop.eup %3922  ;;  %3755 = vmatmul.msk.bf16.gmra.mxu1 %vm695_vm2, %v1150_v25 }
 0x76e   : > { %v2062_v54 = vsel %vm353_vm1, %v4761_v2, 0.0 }
 0x76f   : > { %2063 = vadd.xlane.f32.xlu0 %v2062_v54 }
 0x771   : > { %v3925_v45 = vpop.eup %3924 }
 0x772   : > { %v1443_v6 = vmul.f32 %v3925_v45, %v4721_v59  ;;  %v2028_v51 = vpop.xlane.xlu0 %2027 }
 0x773   : > { %v2038_v61 = vsub.f32 %v4681_v1, %v2028_v51  ;;  %v4782_v1 = vadd.f32 %v4559_v32, %v4679_v47  ;;  %v1913_v32 = vunpack.c.l.b16 %v1812_v8 }
 0x774   : > { %v1451_v38 = vpack.c.bf16 %v1443_v6, %v1443_v6 }
 0x775   : > { %v2052_v40 = vmul.f32 1.442695, %v2038_v61  ;;  %v1815_v5 = vpack.c.bf16 %v4782_v1, %v4782_v1  ;;  %v4796_v47 = vpack.c.b16 %v1913_v32, %v1913_v32  ;;  %v1624_v61 = vpack.c.bf16 %v4661_v35, %v4541_v49 }
 0x776   : > { %3744 = vmatmul.msk.bf16.vlgmr.msrb.gmra.mxu0 %vm353_vm1, %v1451_v38  ;;  %v1799_v42 = vmul.f32 0.5, %v4782_v1  ;;  %v2303_v1 = vunpack.c.l.b16 %v4641_v56 }
 0x777   : > { %3926 = vpow2.f32 %v2052_v40  ;;  %v1985_v11 = vunpack.c.l.b16 %v1815_v5 }
 0x779   : > { %v4788_v36 = vpack.c.b16 %v1985_v11, %v1985_v11 }
 0x77d   : > { %v4772_v27 = vpop.eup %3926  ;;  %3767 = vmatmul.msk.bf16.vlgmr.msrb.gmra.mxu1 %vm695_vm2, %v4770_v33 }
 0x77e   : > { %v2074_v59 = vsel %vm353_vm1, %v4772_v27, 0.0 }
 0x77f   : > { %2075 = vadd.xlane.f32.xlu2 %v2074_v59  ;;  %v2236_v59 = vsel %vm633_vm0, %v4743_v46, 0 }
 0x783   : > { %2146 = vrot.lane.b32.xlu0 %v4592_v39, %s4062_s13 }
 0x78b   : > { %2331 = vrot.lane.b32.xlu0 %v2330_v0, %s4063_s14 }
 0x793   : > { %1987 = vrot.lane.b32.xlu0 %v4788_v36, %s4061_s12 }
 0x797   : > { %2333 = vrot.lane.b32.xlu2 %v4592_v39, %s4064_s15 }
 0x799   : > { %v1493_v28 = vpop.f32.mrf.mxu1 }
 0x79f   : > { %1915 = vrot.lane.b32.xlu2 %v4796_v47, %s4061_s12 }
 0x7a1   : > { %v1495_v55 = vpop.f32.mrf.mxu1 }
 0x7aa   : > { %v1577_v23 = vpop.f32.mrf.mxu1 }
 0x7b2   : > { %v1579_v16 = vpop.f32.mrf.mxu1 }
 0x7ba   : > { %v4800_v52 = vpop.f32.mrf.mxu1 }
 0x7bd   : > { %2012 = vmax.xlane.f32.xlu0 %v2011_v57 }
 0x7c2   : > { %v4805_v43 = vpop.f32.mrf.mxu1 }
 0x7ca   : > { %v4808_v9 = vpop.f32.mrf.mxu1 }
 0x7d2   : > { %v4810_v26 = vpop.f32.mrf.mxu1 }
 0x7da   : > { %v4812_v62 = vpop.f32.mrf.mxu1 }
 0x7dc   : > { %v4814_v18 = vpop.f32.mrf.mxu3 }
 0x7e2   : > { %v4816_v19 = vpop.f32.mrf.mxu1  ;;  %v2064_v31 = vpop.xlane.xlu0 %2063 }
 0x7e3   : > { %v1472_v37 = vpop.f32.mrf.mxu0  ;;  %3928 = vrcp.f32 %v2064_v31 }
 0x7e4   : > { %v1623_v50 = vpack.c.bf16 %v1493_v28, %v1472_v37  ;;  %v1910_v60 = vpop.f32.mrf.mxu3  ;;  %v2443_v37 = vsel %vm695_vm2, %v2438_v30, 0 }
 0x7e5   : > { %v1796_v60 = vmul.f32 0.5, %v4601_v41  ;;  %v2017_v41 = vsel %vm353_vm1, %v4814_v18, -inf }
 0x7e6   : > { %3748 = vmatmul.msk.bf16.vlgmr.msra.gmra.mxu0 %vm695_vm2, %v1623_v50  ;;  %v4840_v50 = vpack.c.bf16 %v1799_v42, %v1799_v42 }
 0x7e7   : > { %v4853_v31 = vpack.c.bf16 %v1796_v60, %v1796_v60 }
 0x7e9   : > { %v3929_v54 = vpop.eup %3928 }
 0x7ea   : > { %v4819_v17 = vpop.f32.mrf.mxu1  ;;  %v2090_v38 = vmul.f32 %v3929_v54, %v4761_v2 }
 0x7eb   : > { %v1474_v25 = vpop.f32.mrf.mxu0 }
 0x7ec   : > { %v2098_v22 = vpack.c.bf16 %v2090_v38, %v2090_v38 }
 0x7f2   : > { %v4821_v45 = vpop.f32.mrf.mxu1  ;;  %v2076_v6 = vpop.xlane.xlu2 %2075 }
 0x7f3   : > { %v1556_v51 = vpop.f32.mrf.mxu0  ;;  %3930 = vrcp.f32 %v2076_v6 }
 0x7f4   : > { %v1625_v16 = vpack.c.bf16 %v1577_v23, %v1556_v51  ;;  %v2304_v23 = vpack.c.b16 %v2303_v1, %v2303_v1  ;;  %v3856_v51 = vld [vmem:[%s5529_s4] ss:$0 sm:$0xff] }
 0x7f5   : > { %v2147_v40 = vpop.permute.xlu0 %2146 }
 0x7f6   : > { %v2152_v3 = vsel %vm633_vm0, %v2147_v40, 0  ;;  %3749 = vmatmul.msk.bf16.gmra.mxu0 %vm695_vm2, %v1624_v61 }
 0x7f7   : > { %2161 = vmatpush.bf16.msra.mxu2 %v2152_v3 }
 0x7f9   : > { %v3931_v8 = vpop.eup %3930 }
 0x7fa   : > { %v1956_v5 = vpop.f32.mrf.mxu1  ;;  %v2334_v0 = vpop.permute.xlu2 %2333  ;;  %3772 = vmatmul.msk.bf16.vlgmr.msra.gmra.mxu2 %vm353_vm1, %v2098_v22  ;;  %v2094_v55 = vmul.f32 %v3931_v8, %v4772_v27  ;;  %v1626_v27 = vpack.c.bf16 %v4669_v14, %v4546_v58 }
 0x7fb   : > { %2245 = vmatpush.bf16.msrb.mxu2 %v2236_v59  ;;  %v2339_v49 = vsel %vm695_vm2, %v2334_v0, 0  ;;  %v1558_v35 = vpop.f32.mrf.mxu0  ;;  %v2023_v2 = vsel %vm353_vm1, %v1956_v5, -inf  ;;  %v2436_v58 = vpop.permute.xlu1 %2435 }
 0x7fc   : > { %2024 = vmax.xlane.f32.xlu1 %v2023_v2  ;;  %v2102_v15 = vpack.c.bf16 %v2094_v55, %v2094_v55 }
 0x7fd   : > { %v2332_v11 = vpop.permute.xlu0 %2331 }
 0x7ff   : > { %2348 = vmatpush.bf16.xpose.msra.mxu2 %v2339_v49 }
 0x802   : > { %v1958_v32 = vpop.f32.mrf.mxu1  ;;  %v1916_v28 = vpop.permute.xlu2 %1915 }
 0x803   : > { %v1921_v46 = vsel %vm695_vm2, %v1916_v28, 0 }
 0x804   : > { %1930 = vmatpush.bf16.xpose.msrb.mxu0 %v1921_v46 }
 0x805   : > { %v1988_v21 = vpop.permute.xlu0 %1987 }
 0x806   : > { %v1993_v57 = vsel %vm695_vm2, %v1988_v21, 0  ;;  %3750 = vmatmul.msk.bf16.gmra.mxu0 %vm695_vm2, %v1625_v16 }
 0x807   : > { %2002 = vmatpush.bf16.xpose.msrb.mxu3 %v1993_v57 }
 0x80a   : > { %3776 = vmatmul.msk.bf16.vlgmr.msrb.gmra.mxu2 %vm353_vm1, %v2102_v15 }
 0x80b   : > { %2452 = vmatpush.bf16.xpose.msrb.mxu2 %v2443_v37 }
 0x80e   : > { %3769 = vmatmul.msk.bf16.vlgmr.msrb.gmra.mxu3 %vm695_vm2, %v4840_v50 }
 0x815   : > { %2125 = vrot.lane.b32.xlu1 %v4580_v24, %s4062_s13 }
 0x816   : > { %3751 = vmatmul.msk.bf16.gmra.mxu0 %vm695_vm2, %v1626_v27 }
 0x81a   : > { %3780 = vmatmul.msk.bf16.vlgmr.msra.gmra.mxu2 %vm695_vm2, %v2332_v11 }
 0x81d   : > { %2305 = vrot.lane.b32.xlu1 %v2304_v23, %s4063_s14 }
 0x826   : > { %3766 = vmatmul.msk.bf16.vlgmr.msrb.gmra.mxu0 %vm695_vm2, %v4853_v31 }
 0x82a   : > { %3784 = vmatmul.msk.bf16.vlgmr.msrb.gmra.mxu2 %vm695_vm2, %v2436_v58 }
 0x830   : > { %v2013_v14 = vpop.xlane.xlu0 %2012 }
 0x831   : > { %v2033_v25 = vsub.f32 %v4674_v34, %v2013_v14 }
 0x833   : > { %v2042_v56 = vmul.f32 1.442695, %v2033_v25 }
 0x835   : > { %3932 = vpow2.f32 %v2042_v56 }
 0x83b   : > { %v4859_v54 = vpop.eup %3932 }
 0x83c   : > { %v2059_v6 = vsel %vm353_vm1, %v4859_v54, 0.0 }
 0x83d   : > { %2060 = vadd.xlane.f32.xlu2 %v2059_v6 }
 0x845   : > { %2018 = vmax.xlane.f32.xlu2 %v2017_v41 }
 0x863   : > { %v1656_v61 = vpop.f32.mrf.mxu0 }
 0x864   : > { %v1701_v38 = vadd.f32 %v4800_v52, %v1656_v61 }
 0x866   : > { %v1721_v34 = vadd.f32 %v3856_v51, %v1701_v38 }
 0x868   : > { %3554 = vst.msk [vmem:[%s4873_s29] sm:$0xff] %vm353_vm1, %v1721_v34 }
 0x86b   : > { %v1658_v40 = vpop.f32.mrf.mxu0 }
 0x86c   : > { %v1703_v3 = vadd.f32 %v4805_v43, %v1658_v40 }
 0x86e   : > { %v1722_v59 = vadd.f32 %v3856_v51, %v1703_v3 }
 0x86f   : > { %v2025_v22 = vpop.xlane.xlu1 %2024 }
 0x870   : > { %3555 = vst.msk [vmem:[%s4873_s29 + $0x8] sm:$0xff] %vm353_vm1, %v1722_v59  ;;  %v2037_v52 = vsub.f32 %v1956_v5, %v2025_v22  ;;  %v2407_v22 = vunpack.c.l.b16 %v4770_v33 }
 0x872   : > { %v2050_v0 = vmul.f32 1.442695, %v2037_v52  ;;  %v2408_v52 = vpack.c.b16 %v2407_v22, %v2407_v22 }
 0x873   : > { %v1661_v49 = vpop.f32.mrf.mxu0 }
 0x874   : > { %3934 = vpow2.f32 %v2050_v0  ;;  %v1706_v35 = vadd.f32 %v4808_v9, %v1661_v49 }
 0x876   : > { %v1723_v2 = vadd.f32 %v3856_v51, %v1706_v35 }
 0x878   : > { %3556 = vst.msk [vmem:[%s4873_s29 + $0x10] sm:$0xff] %vm353_vm1, %v1723_v2 }
 0x87a   : > { %v4883_v11 = vpop.eup %3934 }
 0x87b   : > { %v1663_v8 = vpop.f32.mrf.mxu0  ;;  %v2071_v43 = vsel %vm353_vm1, %v4883_v11, 0.0 }
 0x87c   : > { %v1708_v32 = vadd.f32 %v4810_v26, %v1663_v8  ;;  %2072 = vadd.xlane.f32.xlu0 %v2071_v43 }
 0x87d   : > { %v4888_v5 = vpop.f32.mrf.mxu2 }
 0x87e   : > { %v1724_v28 = vadd.f32 %v3856_v51, %v1708_v32 }
 0x880   : > { %3557 = vst.msk [vmem:[%s4873_s29 + $0x18] sm:$0xff] %vm353_vm1, %v1724_v28 }
 0x883   : > { %v1666_v9 = vpop.f32.mrf.mxu0 }
 0x884   : > { %v1711_v46 = vadd.f32 %v4812_v62, %v1666_v9 }
 0x885   : > { %v2165_v55 = vpop.f32.mrf.mxu2 }
 0x886   : > { %v1725_v16 = vadd.f32 %v3856_v51, %v1711_v46 }
 0x887   : > { %v2126_v21 = vpop.permute.xlu1 %2125 }
 0x888   : > { %3558 = vst.msk [vmem:[%s4873_s29 + $0x20] sm:$0xff] %vm353_vm1, %v1725_v16  ;;  %v2131_v57 = vsel %vm633_vm0, %v2126_v21, 0 }
 0x889   : > { %2140 = vmatpush.bf16.msra.mxu1 %v2131_v57 }
 0x88b   : > { %v1668_v26 = vpop.f32.mrf.mxu0 }
 0x88c   : > { %v1713_v30 = vadd.f32 %v4816_v19, %v1668_v26 }
 0x88d   : > { %v4897_v42 = vpop.f32.mrf.mxu2 }
 0x88e   : > { %v1726_v15 = vadd.f32 %v3856_v51, %v1713_v30 }
 0x890   : > { %3559 = vst.msk [vmem:[%s4873_s29 + $0x28] sm:$0xff] %vm353_vm1, %v1726_v15  ;;  %2209 = vrot.lane.b32.xlu0 %v4696_v53, %s4062_s13 }
 0x891   : > { %v2004_v62 = vpop.f32.mrf.mxu3 }
 0x892   : > { %v2029_v37 = vsel %vm353_vm1, %v2004_v62, -inf }
 0x893   : > { %v1671_v27 = vpop.f32.mrf.mxu0  ;;  %2030 = vmax.xlane.f32.xlu2 %v2029_v37  ;;  %v2008_v37 = vsel %vm353_vm1, %v4671_v44, -inf }
 0x894   : > { %v1716_v1 = vadd.f32 %v4819_v17, %v1671_v27  ;;  %v2306_v27 = vpop.permute.xlu1 %2305 }
 0x895   : > { %v2249_v23 = vpop.f32.mrf.mxu2 }
 0x896   : > { %v1727_v60 = vadd.f32 %v3856_v51, %v1716_v1  ;;  %v2355_v1 = vunpack.c.l.b16 %v4750_v20 }
 0x898   : > { %3560 = vst.msk [vmem:[%s4873_s29 + $0x30] sm:$0xff] %vm353_vm1, %v1727_v60  ;;  %v2356_v60 = vpack.c.b16 %v2355_v1, %v2355_v1 }
 0x899   : > { %v2006_v19 = vpop.f32.mrf.mxu3 }
 0x89b   : > { %v1673_v58 = vpop.f32.mrf.mxu0 }
 0x89c   : > { %v1718_v14 = vadd.f32 %v4821_v45, %v1673_v58 }
 0x89d   : > { %v4908_v25 = vpop.f32.mrf.mxu2 }
 0x89e   : > { %v1728_v56 = vadd.f32 %v3856_v51, %v1718_v14  ;;  %v2490_v45 = vsel %vm353_vm1, %v4908_v25, -inf }
 0x8a0   : > { %3561 = vst.msk [vmem:[%s4873_s29 + $0x38] sm:$0xff] %vm353_vm1, %v1728_v56  ;;  %v2459_v56 = vunpack.c.l.b16 %v4840_v50 }
 0x8a3   : > { %v4912_v6 = vpop.f32.mrf.mxu0 }
 0x8a5   : > { %v2352_v41 = vpop.f32.mrf.mxu2 }
 0x8ab   : > { %v1934_v61 = vpop.f32.mrf.mxu0 }
 0x8ad   : > { %v2454_v38 = vpop.f32.mrf.mxu2 }
 0x8ae   : > { %v2502_v17 = vsel %vm353_vm1, %v2454_v38, -inf }
 0x8af   : > { %2503 = vmax.xlane.f32.xlu2 %v2502_v17 }
 0x8b0   : > { %v2061_v34 = vpop.xlane.xlu2 %2060 }
 0x8b1   : > { %3936 = vrcp.f32 %v2061_v34 }
 0x8b5   : > { %v2456_v40 = vpop.f32.mrf.mxu2 }
 0x8b7   : > { %v3937_v3 = vpop.eup %3936 }
 0x8b8   : > { %v2089_v59 = vmul.f32 %v3937_v3, %v4859_v54  ;;  %v2019_v0 = vpop.xlane.xlu2 %2018 }
 0x8b9   : > { %v2035_v54 = vsub.f32 %v4814_v18, %v2019_v0 }
 0x8ba   : > { %v2097_v51 = vpack.c.bf16 %v2089_v59, %v2089_v59  ;;  %2491 = vmax.xlane.f32.xlu0 %v2490_v45 }
 0x8bb   : > { %v2046_v49 = vmul.f32 1.442695, %v2035_v54 }
 0x8bc   : > { %3771 = vmatmul.msk.bf16.vlgmr.msra.gmra.mxu1 %vm353_vm1, %v2097_v51 }
 0x8bd   : > { %3938 = vpow2.f32 %v2046_v49 }
 0x8c3   : > { %v4930_v35 = vpop.eup %3938 }
 0x8c4   : > { %v2065_v33 = vsel %vm353_vm1, %v4930_v35, 0.0 }
 0x8c7   : > { %2307 = vrot.lane.b32.xlu2 %v4580_v24, %s4064_s15 }
 0x8ce   : > { %2411 = vrot.lane.b32.xlu0 %v4696_v53, %s4064_s15 }
 0x8d6   : > { %2409 = vrot.lane.b32.xlu0 %v2408_v52, %s4063_s14 }
 0x8de   : > { %2622 = vrot.lane.b32.xlu0 %v4592_v39, %s4065_s16 }
 0x8e6   : > { %2167 = vrot.lane.b32.xlu0 %v4710_v29, %s4062_s13 }
 0x8ee   : > { %2359 = vrot.lane.b32.xlu0 %v4710_v29, %s4064_s15 }
 0x8ef   : > { %v2073_v2 = vpop.xlane.xlu0 %2072 }
 0x8f0   : > { %2066 = vadd.xlane.f32.xlu2 %v2065_v33  ;;  %3940 = vrcp.f32 %v2073_v2 }
 0x8f6   : > { %v3941_v18 = vpop.eup %3940 }
 0x8f7   : > { %v2093_v8 = vmul.f32 %v3941_v18, %v4883_v11 }
 0x8f9   : > { %v2101_v32 = vpack.c.bf16 %v2093_v8, %v2093_v8 }
 0x902   : > { %v2210_v39 = vpop.permute.xlu0 %2209 }
 0x903   : > { %v2215_v43 = vsel %vm633_vm0, %v2210_v39, 0 }
 0x904   : > { %2224 = vmatpush.bf16.msrb.mxu1 %v2215_v43 }
 0x906   : > { %v2031_v28 = vpop.xlane.xlu2 %2030 }
 0x907   : > { %v2039_v9 = vsub.f32 %v2004_v62, %v2031_v28  ;;  %3775 = vmatmul.msk.bf16.vlgmr.msrb.gmra.mxu1 %vm353_vm1, %v2101_v32  ;;  %v2020_v28 = vsel %vm353_vm1, %v4912_v6, -inf }
 0x908   : > { %2251 = vrot.lane.b32.xlu2 %v4788_v36, %s4062_s13 }
 0x909   : > { %v2054_v46 = vmul.f32 1.442695, %v2039_v9 }
 0x90b   : > { %3942 = vpow2.f32 %v2054_v46 }
 0x911   : > { %v4941_v55 = vpop.eup %3942 }
 0x912   : > { %v2077_v16 = vsel %vm353_vm1, %v4941_v55, 0.0 }
 0x913   : > { %2078 = vadd.xlane.f32.xlu1 %v2077_v16 }
 0x922   : > { %v2504_v11 = vpop.xlane.xlu2 %2503 }
 0x923   : > { %v2514_v21 = vsub.f32 %v2454_v38, %v2504_v11 }
 0x925   : > { %v2528_v57 = vmul.f32 1.442695, %v2514_v21 }
 0x927   : > { %3944 = vpow2.f32 %v2528_v57 }
 0x92a   : > { %v2308_v26 = vpop.permute.xlu2 %2307 }
 0x92b   : > { %v2313_v30 = vsel %vm695_vm2, %v2308_v26, 0  ;;  %v2277_v26 = vunpack.c.l.b16 %v4633_v48 }
 0x92c   : > { %2706 = vrot.lane.b32.xlu1 %v4617_v63, %s4065_s16  ;;  %2322 = vmatpush.bf16.xpose.msra.mxu1 %v2313_v30 }
 0x92d   : > { %v4948_v15 = vpop.eup %3944  ;;  %v2492_v63 = vpop.xlane.xlu0 %2491 }
 0x92e   : > { %v2550_v62 = vsel %vm353_vm1, %v4948_v15, 0.0  ;;  %v2510_v38 = vsub.f32 %v4908_v25, %v2492_v63 }
 0x92f   : > { %2551 = vadd.xlane.f32.xlu0 %v2550_v62  ;;  %v2278_v62 = vpack.c.b16 %v2277_v26, %v2277_v26 }
 0x930   : > { %v2520_v17 = vmul.f32 1.442695, %v2510_v38 }
 0x931   : > { %2009 = vmax.xlane.f32.xlu2 %v2008_v37 }
 0x932   : > { %3946 = vpow2.f32 %v2520_v17 }
 0x933   : > { %3779 = vmatmul.msk.bf16.vlgmr.msra.gmra.mxu1 %vm695_vm2, %v2306_v27 }
 0x934   : > { %2860 = vrot.lane.b32.xlu1 %v4128_v4, %s4061_s12  ;;  %v2460_v4 = vpack.c.b16 %v2459_v56, %v2459_v56 }
 0x938   : > { %v4974_v50 = vpop.eup %3946 }
 0x939   : > { %v4958_v23 = vpop.f32.mrf.mxu1 }
 0x93c   : > { %2357 = vrot.lane.b32.xlu1 %v2356_v60, %s4063_s14 }
 0x940   : > { %v2412_v19 = vpop.permute.xlu0 %2411 }
 0x941   : > { %v2417_v58 = vsel %vm695_vm2, %v2412_v19, 0  ;;  %v2144_v14 = vpop.f32.mrf.mxu1 }
 0x942   : > { %2426 = vmatpush.bf16.xpose.msrb.mxu1 %v2417_v58 }
 0x943   : > { %2862 = vrot.lane.b32.xlu0 %v4140_v12, %s4061_s12 }
 0x948   : > { %v2410_v41 = vpop.permute.xlu0 %2409 }
 0x949   : > { %3783 = vmatmul.msk.bf16.vlgmr.msrb.gmra.mxu1 %vm695_vm2, %v2410_v41  ;;  %v3802_v41 = vld [vmem:[%s5526_s1 + $0x8] sm:$0xf] }
 0x94b   : > { %2461 = vrot.lane.b32.xlu0 %v2460_v4, %s4063_s14 }
 0x950   : > { %v2623_v20 = vpop.permute.xlu0 %2622 }
 0x951   : > { %v2628_v61 = vsel %vm633_vm0, %v2623_v20, 0  ;;  %v2881_v20 = vsel %vm633_vm0, %v3802_v41, 0 }
 0x952   : > { %2637 = vmatpush.bf16.msra.mxu2 %v2628_v61 }
 0x953   : > { %2864 = vrot.lane.b32.xlu0 %v4142_v13, %s4061_s12  ;;  %v2538_v13 = vsel %vm353_vm1, %v4974_v50, 0.0 }
 0x958   : > { %v2168_v34 = vpop.permute.xlu0 %2167 }
 0x959   : > { %v2173_v12 = vsel %vm633_vm0, %v2168_v34, 0 }
 0x95a   : > { %2182 = vmatpush.bf16.msra.mxu3 %v2173_v12 }
 0x95b   : > { %2866 = vrot.lane.b32.xlu0 %v4132_v7, %s4061_s12 }
 0x960   : > { %v2360_v7 = vpop.permute.xlu0 %2359 }
 0x961   : > { %v2365_v22 = vsel %vm695_vm2, %v2360_v7, 0 }
 0x963   : > { %2104 = vrot.lane.b32.xlu0 %v4569_v10, %s4062_s13  ;;  %v2067_v40 = vpop.xlane.xlu2 %2066 }
 0x964   : > { %3948 = vrcp.f32 %v2067_v40 }
 0x966   : > { %2539 = vadd.xlane.f32.xlu1 %v2538_v13 }
 0x96a   : > { %v3949_v25 = vpop.eup %3948 }
 0x96b   : > { %v2091_v3 = vmul.f32 %v3949_v25, %v4930_v35  ;;  %2188 = vrot.lane.b32.xlu0 %v4796_v47, %s4062_s13  ;;  %v2252_v59 = vpop.permute.xlu2 %2251 }
 0x96c   : > { %v2257_v45 = vsel %vm633_vm0, %v2252_v59, 0 }
 0x96d   : > { %v2099_v51 = vpack.c.bf16 %v2091_v3, %v2091_v3  ;;  %2266 = vmatpush.bf16.msrb.mxu3 %v2257_v45 }
 0x96f   : > { %3773 = vmatmul.msk.bf16.vlgmr.msra.gmra.mxu3 %vm353_vm1, %v2099_v51 }
 0x971   : > { %2374 = vmatpush.bf16.xpose.msra.mxu3 %v2365_v22 }
 0x97f   : > { %2463 = vrot.lane.b32.xlu1 %v4788_v36, %s4064_s15 }
 0x984   : > { %v4988_v52 = vpop.f32.mrf.mxu1 }
 0x986   : > { %v2079_v0 = vpop.xlane.xlu1 %2078 }
 0x987   : > { %3950 = vrcp.f32 %v2079_v0 }
 0x98c   : > { %v2228_v54 = vpop.f32.mrf.mxu1 }
 0x98d   : > { %v3951_v49 = vpop.eup %3950 }
 0x98e   : > { %v2095_v35 = vmul.f32 %v3951_v49, %v4941_v55 }
 0x990   : > { %v2103_v33 = vpack.c.bf16 %v2095_v35, %v2095_v35 }
 0x992   : > { %3777 = vmatmul.msk.bf16.vlgmr.msrb.gmra.mxu3 %vm353_vm1, %v2103_v33 }
 0x99e   : > { %v2707_v2 = vpop.permute.xlu1 %2706 }
 0x99f   : > { %v2712_v18 = vsel %vm633_vm0, %v2707_v2, 0 }
 0x9a0   : > { %2721 = vmatpush.bf16.msrb.mxu2 %v2712_v18 }
 0x9a2   : > { %v2552_v9 = vpop.xlane.xlu0 %2551 }
 0x9a4   : > { %v2010_v8 = vpop.xlane.xlu2 %2009 }
 0x9a5   : > { %v2032_v39 = vsub.f32 %v4671_v44, %v2010_v8 }
 0x9a6   : > { %v2861_v43 = vpop.permute.xlu1 %2860 }
 0x9a7   : > { %v2040_v32 = vmul.f32 1.442695, %v2032_v39  ;;  %v2381_v39 = vunpack.c.l.b16 %v4853_v31 }
 0x9a9   : > { %3952 = vpow2.f32 %v2040_v32  ;;  %2021 = vmax.xlane.f32.xlu1 %v2020_v28 }
 0x9ae   : > { %v2358_v46 = vpop.permute.xlu1 %2357 }
 0x9af   : > { %v3953_v55 = vpop.eup %3952  ;;  %3781 = vmatmul.msk.bf16.vlgmr.msra.gmra.mxu3 %vm695_vm2, %v2358_v46 }
 0x9b0   : > { %v4997_v16 = vpop.f32.mrf.mxu1  ;;  %v2056_v11 = vsel %vm353_vm1, %v3953_v55, 0.0 }
 0x9b1   : > { %2057 = vadd.xlane.f32.xlu2 %v2056_v11  ;;  %v2487_v44 = vsel %vm353_vm1, %v4997_v16, -inf }
 0x9b2   : > { %2488 = vmax.xlane.f32.xlu0 %v2487_v44 }
 0x9b5   : > { %v2863_v21 = vpop.permute.xlu0 %2862 }
 0x9b8   : > { %v2326_v57 = vpop.f32.mrf.mxu1 }
 0x9bd   : > { %v2462_v30 = vpop.permute.xlu0 %2461 }
 0x9c2   : > { %2279 = vrot.lane.b32.xlu1 %v2278_v62, %s4063_s14 }
 0x9c5   : > { %v2865_v37 = vpop.permute.xlu0 %2864 }
 0x9c6   : > { %2601 = vrot.lane.b32.xlu0 %v4580_v24, %s4065_s16  ;;  %v5006_v27 = vpop.f32.mrf.mxu1 }
 0x9c7   : > { %v2499_v61 = vsel %vm353_vm1, %v5006_v27, -inf }
 0x9cd   : > { %v2867_v1 = vpop.permute.xlu0 %2866 }
 0x9ce   : > { %v2430_v63 = vpop.f32.mrf.mxu1 }
 0x9d5   : > { %v2105_v60 = vpop.permute.xlu0 %2104 }
 0x9d6   : > { %v2110_v19 = vsel %vm633_vm0, %v2105_v60, 0 }
 0x9d7   : > { %2119 = vmatpush.bf16.msra.mxu0 %v2110_v19 }
 0x9d9   : > { %v2540_v58 = vpop.xlane.xlu1 %2539 }
 0x9da   : > { %3954 = vrcp.f32 %v2540_v58 }
 0x9db   : > { %3956 = vrcp.f32 %v2552_v9 }
 0x9dd   : > { %v2189_v14 = vpop.permute.xlu0 %2188 }
 0x9de   : > { %v2194_v48 = vsel %vm633_vm0, %v2189_v14, 0 }
 0x9df   : > { %2203 = vmatpush.bf16.msrb.mxu0 %v2194_v48 }
 0x9e0   : > { %v3955_v56 = vpop.eup %3954 }
 0x9e1   : > { %v2566_v24 = vmul.f32 %v3955_v56, %v4974_v50  ;;  %v3957_v38 = vpop.eup %3956 }
 0x9e2   : > { %v2570_v17 = vmul.f32 %v3957_v38, %v4948_v15 }
 0x9e3   : > { %v2574_v4 = vpack.c.bf16 %v2566_v24, %v2566_v24 }
 0x9e4   : > { %v2578_v50 = vpack.c.bf16 %v2570_v17, %v2570_v17 }
 0x9e5   : > { %3788 = vmatmul.msk.bf16.vlgmr.msra.gmra.mxu2 %vm353_vm1, %v2574_v4 }
 0x9e6   : > { %2890 = vmatpush.bf16.msra.mxu2 %v2881_v20 }
 0x9ec   : > { %2500 = vmax.xlane.f32.xlu1 %v2499_v61 }
 0x9f1   : > { %v2464_v34 = vpop.permute.xlu1 %2463 }
 0x9f2   : > { %v2469_v12 = vsel %vm695_vm2, %v2464_v34, 0  ;;  %v5020_v40 = vpop.f32.mrf.mxu3 }
 0x9f3   : > { %2478 = vmatpush.bf16.xpose.msrb.mxu3 %v2469_v12 }
 0x9f5   : > { %3792 = vmatmul.msk.bf16.vlgmr.msrb.gmra.mxu2 %vm353_vm1, %v2578_v50 }
 0x9fa   : > { %v2186_v13 = vpop.f32.mrf.mxu3  ;;  %3785 = vmatmul.msk.bf16.vlgmr.msrb.gmra.mxu3 %vm695_vm2, %v2462_v30 }
 0xa05   : > { %3804 = vmatmul.msk.bf16.vlgmr.msra.gmra.mxu2 %vm353_vm1, %v2861_v43  ;;  %v2382_v43 = vpack.c.b16 %v2381_v39, %v2381_v39 }
 0xa15   : > { %v5025_v25 = vpop.f32.mrf.mxu3  ;;  %3805 = vmatmul.msk.bf16.gmra.mxu2 %vm353_vm1, %v2863_v21 }
 0xa1c   : > { %v2022_v3 = vpop.xlane.xlu1 %2021 }
 0xa1d   : > { %v2036_v15 = vsub.f32 %v4912_v6, %v2022_v3  ;;  %v2270_v59 = vpop.f32.mrf.mxu3 }
 0xa1f   : > { %v2048_v7 = vmul.f32 1.442695, %v2036_v15 }
 0xa21   : > { %3958 = vpow2.f32 %v2048_v7 }
 0xa24   : > { %v2058_v45 = vpop.xlane.xlu2 %2057 }
 0xa25   : > { %3960 = vrcp.f32 %v2058_v45  ;;  %3806 = vmatmul.msk.bf16.gmra.mxu2 %vm353_vm1, %v2865_v37  ;;  %v2489_v35 = vpop.xlane.xlu0 %2488 }
 0xa27   : > { %v5030_v51 = vpop.eup %3958 }
 0xa28   : > { %v2068_v22 = vsel %vm353_vm1, %v5030_v51, 0.0 }
 0xa29   : > { %2069 = vadd.xlane.f32.xlu2 %v2068_v22 }
 0xa2b   : > { %v3961_v0 = vpop.eup %3960 }
 0xa2c   : > { %v2088_v54 = vmul.f32 %v3961_v0, %v3953_v55  ;;  %v2509_v55 = vsub.f32 %v4997_v16, %v2489_v35 }
 0xa2e   : > { %v2096_v49 = vpack.c.bf16 %v2088_v54, %v2088_v54  ;;  %v2518_v44 = vmul.f32 1.442695, %v2509_v55 }
 0xa30   : > { %3770 = vmatmul.msk.bf16.vlgmr.msra.gmra.mxu0 %vm353_vm1, %v2096_v49 }
 0xa32   : > { %v5035_v6 = vpop.f32.mrf.mxu3 }
 0xa33   : > { %v2493_v33 = vsel %vm353_vm1, %v5035_v6, -inf }
 0xa34   : > { %2494 = vmax.xlane.f32.xlu1 %v2493_v33  ;;  %v5051_v32 = vpop.permute.xlu1 %2279 }
 0xa35   : > { %3807 = vmatmul.msk.bf16.gmra.mxu2 %vm353_vm1, %v2867_v1 }
 0xa38   : > { %v2602_v2 = vpop.permute.xlu0 %2601 }
 0xa39   : > { %v2607_v18 = vsel %vm633_vm0, %v2602_v2, 0 }
 0xa3a   : > { %v2378_v8 = vpop.f32.mrf.mxu3  ;;  %2616 = vmatpush.bf16.msra.mxu1 %v2607_v18 }
 0xa41   : > { %2281 = vrot.lane.b32.xlu2 %v4569_v10, %s4064_s15 }
 0xa49   : > { %2385 = vrot.lane.b32.xlu2 %v4796_v47, %s4064_s15 }
 0xa4d   : > { %2685 = vrot.lane.b32.xlu1 %v4696_v53, %s4065_s16 }
 0xa51   : > { %2383 = vrot.lane.b32.xlu2 %v2382_v43, %s4063_s14 }
 0xa55   : > { %2643 = vrot.lane.b32.xlu1 %v4710_v29, %s4065_s16 }
 0xa5f   : > { %v2501_v28 = vpop.xlane.xlu1 %2500 }
 0xa60   : > { %v2513_v9 = vsub.f32 %v5006_v27, %v2501_v28  ;;  %v5074_v27 = vld [vmem:[%s5527_s2 + $0x2] ss:$0 sm:$0xff] }
 0xa62   : > { %v2526_v46 = vmul.f32 1.442695, %v2513_v9 }
 0xa64   : > { %3962 = vpow2.f32 %v2526_v46 }
 0xa65   : > { %3964 = vpow2.f32 %v2518_v44 }
 0xa68   : > { %v5055_v11 = vpop.f32.mrf.mxu2 }
 0xa6a   : > { %v5057_v31 = vpop.eup %3962 }
 0xa6b   : > { %v2547_v53 = vsel %vm353_vm1, %v5057_v31, 0.0  ;;  %v5061_v21 = vpop.eup %3964 }
 0xa6c   : > { %2548 = vadd.xlane.f32.xlu0 %v2547_v53  ;;  %v2535_v26 = vsel %vm353_vm1, %v5061_v21, 0.0 }
 0xa70   : > { %v2641_v29 = vpop.f32.mrf.mxu2 }
 0xa78   : > { %v5063_v57 = vpop.f32.mrf.mxu2 }
 0xa7a   : > { %2536 = vadd.xlane.f32.xlu2 %v2535_v26 }
 0xa7d   : > { %v5067_v16 = vpop.f32.mrf.mxu3 }
 0xa7e   : > { %v2505_v62 = vsel %vm353_vm1, %v5067_v16, -inf }
 0xa80   : > { %v2725_v30 = vpop.f32.mrf.mxu2 }
 0xa82   : > { %2506 = vmax.xlane.f32.xlu2 %v2505_v62 }
 0xa85   : > { %v2482_v37 = vpop.f32.mrf.mxu3 }
 0xa88   : > { %v2892_v1 = vpop.f32.mrf.mxu2 }
 0xa89   : > { %v2893_v63 = vadd.f32 %v5074_v27, %v2892_v1 }
 0xa8b   : > { %v2912_v60 = vmul.f32 0.5, %v2893_v63  ;;  %v2928_v58 = vpack.c.bf16 %v2893_v63, %v2893_v63 }
 0xa8d   : > { %v2920_v48 = vpack.c.bf16 %v2912_v60, %v2912_v60  ;;  %v2964_v24 = vunpack.c.l.b16 %v2928_v58 }
 0xa8f   : > { %v2944_v61 = vunpack.c.l.b16 %v2920_v48 }
 0xa90   : > { %v2894_v19 = vpop.f32.mrf.mxu2 }
 0xa91   : > { %v2895_v14 = vadd.f32 %v5074_v27, %v2894_v19 }
 0xa93   : > { %v2913_v56 = vmul.f32 0.5, %v2895_v14  ;;  %v2929_v41 = vpack.c.bf16 %v2895_v14, %v2895_v14 }
 0xa95   : > { %v2921_v4 = vpack.c.bf16 %v2913_v56, %v2913_v56  ;;  %v2965_v20 = vunpack.c.l.b16 %v2929_v41 }
 0xa97   : > { %v2945_v38 = vunpack.c.l.b16 %v2921_v4  ;;  %v5078_v17 = vpack.c.b16 %v2965_v20, %v2964_v24 }
 0xa98   : > { %v2897_v34 = vpop.f32.mrf.mxu2 }
 0xa99   : > { %v5080_v12 = vpack.c.b16 %v2945_v38, %v2944_v61  ;;  %v2898_v50 = vadd.f32 %v5074_v27, %v2897_v34 }
 0xa9b   : > { %v2914_v3 = vmul.f32 0.5, %v2898_v50  ;;  %v2930_v59 = vpack.c.bf16 %v2898_v50, %v2898_v50 }
 0xa9c   : > { %v2070_v13 = vpop.xlane.xlu2 %2069 }
 0xa9d   : > { %3966 = vrcp.f32 %v2070_v13  ;;  %v2922_v22 = vpack.c.bf16 %v2914_v3, %v2914_v3  ;;  %v2966_v33 = vunpack.c.l.b16 %v2930_v59 }
 0xa9f   : > { %v2946_v43 = vunpack.c.l.b16 %v2922_v22 }
 0xaa0   : > { %v2899_v15 = vpop.f32.mrf.mxu2 }
 0xaa1   : > { %v2900_v7 = vadd.f32 %v5074_v27, %v2899_v15 }
 0xaa3   : > { %v3967_v45 = vpop.eup %3966  ;;  %v2915_v0 = vmul.f32 0.5, %v2900_v7  ;;  %v2931_v54 = vpack.c.bf16 %v2900_v7, %v2900_v7 }
 0xaa4   : > { %v2092_v49 = vmul.f32 %v3967_v45, %v5030_v51  ;;  %v2282_v35 = vpop.permute.xlu2 %2281 }
 0xaa5   : > { %v2923_v2 = vpack.c.bf16 %v2915_v0, %v2915_v0  ;;  %v2967_v18 = vunpack.c.l.b16 %v2931_v54  ;;  %v2287_v8 = vsel %vm695_vm2, %v2282_v35, 0 }
 0xaa6   : > { %v2100_v39 = vpack.c.bf16 %v2092_v49, %v2092_v49  ;;  %2296 = vmatpush.bf16.xpose.msra.mxu0 %v2287_v8 }
 0xaa7   : > { %v2947_v28 = vunpack.c.l.b16 %v2923_v2  ;;  %v5086_v9 = vpack.c.b16 %v2967_v18, %v2966_v33  ;;  %v2495_v46 = vpop.xlane.xlu1 %2494 }
 0xaa8   : > { %v2511_v55 = vsub.f32 %v5035_v6, %v2495_v46  ;;  %3774 = vmatmul.msk.bf16.vlgmr.msrb.gmra.mxu0 %vm353_vm1, %v2100_v39  ;;  %v2902_v53 = vpop.f32.mrf.mxu2 }
 0xaa9   : > { %v5090_v44 = vpack.c.b16 %v2947_v28, %v2946_v43  ;;  %3221 = vrot.lane.b32.xlu0 %v5086_v9, %s4064_s15  ;;  %v2903_v29 = vadd.f32 %v5074_v27, %v2902_v53  ;;  %v5139_v53 = vld [vmem:[%s5528_s3 + $0x4] sm:$0xf] }
 0xaaa   : > { %v2522_v51 = vmul.f32 1.442695, %v2511_v55 }
 0xaab   : > { %v2916_v37 = vmul.f32 0.5, %v2903_v29  ;;  %v2932_v1 = vpack.c.bf16 %v2903_v29, %v2903_v29 }
 0xaac   : > { %3968 = vpow2.f32 %v2522_v51  ;;  %v2386_v26 = vpop.permute.xlu2 %2385 }
 0xaad   : > { %v2391_v30 = vsel %vm695_vm2, %v2386_v26, 0  ;;  %v5096_v62 = vpop.f32.mrf.mxu0  ;;  %v2924_v19 = vpack.c.bf16 %v2916_v37, %v2916_v37  ;;  %v2968_v56 = vunpack.c.l.b16 %v2932_v1  ;;  %v2813_v37 = vsel %vm1643_vm10, %v5139_v53, 0 }
 0xaae   : > { %2400 = vmatpush.bf16.xpose.msrb.mxu0 %v2391_v30 }
 0xaaf   : > { %v2948_v20 = vunpack.c.l.b16 %v2924_v19 }
 0xab0   : > { %v2904_v6 = vpop.f32.mrf.mxu2 }
 0xab1   : > { %v2905_v63 = vadd.f32 %v5074_v27, %v2904_v6 }
 0xab2   : > { %v5099_v60 = vpop.eup %3968 }
 0xab3   : > { %v2917_v58 = vmul.f32 0.5, %v2905_v63  ;;  %v2933_v14 = vpack.c.bf16 %v2905_v63, %v2905_v63  ;;  %v2541_v48 = vsel %vm353_vm1, %v5099_v60, 0.0 }
 0xab4   : > { %2542 = vadd.xlane.f32.xlu2 %v2541_v48  ;;  %v2384_v2 = vpop.permute.xlu2 %2383  ;;  %v2273_v48 = vpack.c.bf16 %v5020_v40, %v4888_v5 }
 0xab5   : > { %v2925_v41 = vpack.c.bf16 %v2917_v58, %v2917_v58  ;;  %v2969_v24 = vunpack.c.l.b16 %v2933_v14  ;;  %v2123_v4 = vpop.f32.mrf.mxu0  ;;  %v2272_v58 = vpack.c.bf16 %v4958_v23, %v5096_v62 }
 0xab7   : > { %v2949_v61 = vunpack.c.l.b16 %v2925_v41  ;;  %v5103_v38 = vpack.c.b16 %v2969_v24, %v2968_v56 }
 0xab8   : > { %3778 = vmatmul.msk.bf16.vlgmr.msra.gmra.mxu0 %vm695_vm2, %v5051_v32  ;;  %v2907_v34 = vpop.f32.mrf.mxu2 }
 0xab9   : > { %v5107_v50 = vpack.c.b16 %v2949_v61, %v2948_v20  ;;  %3223 = vrot.lane.b32.xlu1 %v5103_v38, %s4064_s15  ;;  %v2908_v13 = vadd.f32 %v5074_v27, %v2907_v34 }
 0xabb   : > { %v2918_v3 = vmul.f32 0.5, %v2908_v13  ;;  %v2934_v45 = vpack.c.bf16 %v2908_v13, %v2908_v13 }
 0xabd   : > { %v2926_v0 = vpack.c.bf16 %v2918_v3, %v2918_v3  ;;  %v2970_v49 = vunpack.c.l.b16 %v2934_v45 }
 0xabf   : > { %v2686_v15 = vpop.permute.xlu1 %2685  ;;  %v2950_v18 = vunpack.c.l.b16 %v2926_v0  ;;  %v2275_v0 = vpack.c.bf16 %v5025_v25, %v4897_v42 }
 0xac0   : > { %v2691_v59 = vsel %vm633_vm0, %v2686_v15, 0  ;;  %v2909_v7 = vpop.f32.mrf.mxu2 }
 0xac1   : > { %v2910_v22 = vadd.f32 %v5074_v27, %v2909_v7  ;;  %2700 = vmatpush.bf16.msrb.mxu1 %v2691_v59 }
 0xac3   : > { %v2919_v54 = vmul.f32 0.5, %v2910_v22  ;;  %v2935_v32 = vpack.c.bf16 %v2910_v22, %v2910_v22 }
 0xac5   : > { %v2927_v35 = vpack.c.bf16 %v2919_v54, %v2919_v54  ;;  %v2971_v33 = vunpack.c.l.b16 %v2935_v32 }
 0xac7   : > { %v2951_v8 = vunpack.c.l.b16 %v2927_v35  ;;  %v5114_v39 = vpack.c.b16 %v2971_v33, %v2970_v49  ;;  %v2644_v43 = vpop.permute.xlu1 %2643 }
 0xac8   : > { %v2649_v28 = vsel %vm633_vm0, %v2644_v43, 0  ;;  %3782 = vmatmul.msk.bf16.vlgmr.msrb.gmra.mxu0 %vm695_vm2, %v2384_v2 }
 0xac9   : > { %2982 = vrot.lane.b32.xlu0 %v5114_v39, %s4061_s12  ;;  %2658 = vmatpush.bf16.msra.mxu3 %v2649_v28  ;;  %v5120_v27 = vpack.c.b16 %v2951_v8, %v2950_v18 }
 0xacc   : > { %2980 = vrot.lane.b32.xlu2 %v5103_v38, %s4061_s12 }
 0xad1   : > { %2978 = vrot.lane.b32.xlu0 %v5086_v9, %s4061_s12 }
 0xad4   : > { %3225 = vrot.lane.b32.xlu2 %v5114_v39, %s4064_s15 }
 0xadc   : > { %2727 = vrot.lane.b32.xlu2 %v4788_v36, %s4065_s16 }
 0xadf   : > { %v2549_v29 = vpop.xlane.xlu0 %2548 }
 0xae4   : > { %3219 = vrot.lane.b32.xlu2 %v5078_v17, %s4064_s15 }
 0xaec   : > { %2976 = vrot.lane.b32.xlu2 %v5078_v17, %s4061_s12 }
 0xaed   : > { %v2537_v46 = vpop.xlane.xlu2 %2536 }
 0xaee   : > { %3970 = vrcp.f32 %v2537_v46 }
 0xaef   : > { %3972 = vrcp.f32 %v2549_v29 }
 0xaf4   : > { %v3971_v55 = vpop.eup %3970  ;;  %3211 = vrot.lane.b32.xlu2 %v5080_v12, %s4063_s14 }
 0xaf5   : > { %v2565_v51 = vmul.f32 %v3971_v55, %v5061_v21  ;;  %v2507_v36 = vpop.xlane.xlu2 %2506  ;;  %v3973_v1 = vpop.eup %3972 }
 0xaf6   : > { %v2515_v26 = vsub.f32 %v5067_v16, %v2507_v36  ;;  %v2569_v16 = vmul.f32 %v3973_v1, %v5057_v31 }
 0xaf7   : > { %v2573_v30 = vpack.c.bf16 %v2565_v51, %v2565_v51 }
 0xaf8   : > { %v2530_v6 = vmul.f32 1.442695, %v2515_v26  ;;  %v2577_v19 = vpack.c.bf16 %v2569_v16, %v2569_v16 }
 0xaf9   : > { %3787 = vmatmul.msk.bf16.vlgmr.msra.gmra.mxu1 %vm353_vm1, %v2573_v30 }
 0xafa   : > { %3974 = vpow2.f32 %v2530_v6  ;;  %2822 = vmatpush.bf16.msra.mxu1 %v2813_v37 }
 0xafc   : > { %3213 = vrot.lane.b32.xlu2 %v5090_v44, %s4063_s14 }
 0xb00   : > { %v5148_v63 = vpop.eup %3974 }
 0xb01   : > { %v2553_v21 = vsel %vm353_vm1, %v5148_v63, 0.0 }
 0xb02   : > { %2554 = vadd.xlane.f32.xlu1 %v2553_v21 }
 0xb04   : > { %3215 = vrot.lane.b32.xlu2 %v5107_v50, %s4063_s14 }
 0xb09   : > { %3791 = vmatmul.msk.bf16.vlgmr.msrb.gmra.mxu1 %vm353_vm1, %v2577_v19 }
 0xb19   : > { %3798 = vmatmul.msk.bf16.vlgmr.msra.gmra.mxu1 %vm695_vm2, %v2272_v58 }
 0xb1b   : > { %v3222_v23 = vpop.permute.xlu0 %3221 }
 0xb1c   : > { %v3243_v32 = vsel %vm695_vm2, %v3222_v23, 0 }
 0xb25   : > { %v2205_v14 = vpop.f32.mrf.mxu0 }
 0xb26   : > { %v2274_v5 = vpack.c.bf16 %v4988_v52, %v2205_v14 }
 0xb27   : > { %v2543_v56 = vpop.xlane.xlu2 %2542 }
 0xb28   : > { %3976 = vrcp.f32 %v2543_v56 }
 0xb29   : > { %3799 = vmatmul.msk.bf16.gmra.mxu1 %vm695_vm2, %v2273_v48 }
 0xb2b   : > { %v3224_v13 = vpop.permute.xlu1 %3223 }
 0xb2c   : > { %v3246_v7 = vsel %vm695_vm2, %v3224_v13, 0 }
 0xb2d   : > { %v2207_v31 = vpop.f32.mrf.mxu0 }
 0xb2e   : > { %v3977_v41 = vpop.eup %3976 }
 0xb2f   : > { %v2567_v24 = vmul.f32 %v3977_v41, %v5099_v60  ;;  %v2981_v4 = vpop.permute.xlu2 %2980 }
 0xb30   : > { %v3003_v49 = vsel %vm695_vm2, %v2981_v4, 0 }
 0xb31   : > { %v2575_v20 = vpack.c.bf16 %v2567_v24, %v2567_v24 }
 0xb33   : > { %3789 = vmatmul.msk.bf16.vlgmr.msra.gmra.mxu3 %vm353_vm1, %v2575_v20 }
 0xb35   : > { %v5164_v61 = vpop.f32.mrf.mxu0 }
 0xb36   : > { %v2484_v62 = vsel %vm353_vm1, %v5164_v61, -inf }
 0xb37   : > { %2485 = vmax.xlane.f32.xlu0 %v2484_v62  ;;  %v3226_v40 = vpop.permute.xlu2 %3225 }
 0xb38   : > { %v3249_v34 = vsel %vm695_vm2, %v3226_v40, 0 }
 0xb39   : > { %3800 = vmatmul.msk.bf16.gmra.mxu1 %vm695_vm2, %v2274_v5 }
 0xb3a   : > { %3255 = vmatpush.bf16.xpose.msrb.mxu1 %v3249_v34 }
 0xb3b   : > { %v2983_v3 = vpop.permute.xlu0 %2982 }
 0xb3c   : > { %v3006_v45 = vsel %vm695_vm2, %v2983_v3, 0 }
 0xb3d   : > { %v2300_v60 = vpop.f32.mrf.mxu0 }
 0xb3f   : > { %v2728_v15 = vpop.permute.xlu2 %2727 }
 0xb40   : > { %v2733_v59 = vsel %vm633_vm0, %v2728_v15, 0 }
 0xb41   : > { %2742 = vmatpush.bf16.msrb.mxu3 %v2733_v59 }
 0xb42   : > { %3256 = vmatpush.bf16.xpose.msrb.mxu1 %v3246_v7 }
 0xb43   : > { %v2979_v33 = vpop.permute.xlu0 %2978 }
 0xb44   : > { %v3000_v18 = vsel %vm695_vm2, %v2979_v33, 0  ;;  %v2753_v33 = vunpack.c.l.b16 %v5139_v53 }
 0xb45   : > { %3012 = vmatpush.bf16.xpose.msra.mxu3 %v3006_v45  ;;  %v2402_v52 = vpop.f32.mrf.mxu0 }
 0xb46   : > { %v2496_v22 = vsel %vm353_vm1, %v2402_v52, -inf }
 0xb47   : > { %2497 = vmax.xlane.f32.xlu1 %v2496_v22  ;;  %v3220_v54 = vpop.permute.xlu2 %3219 }
 0xb48   : > { %v3240_v42 = vsel %vm695_vm2, %v3220_v54, 0 }
 0xb49   : > { %3801 = vmatmul.msk.bf16.gmra.mxu1 %vm695_vm2, %v2275_v0 }
 0xb4a   : > { %3257 = vmatpush.bf16.xpose.msrb.mxu1 %v3243_v32 }
 0xb4b   : > { %2580 = vrot.lane.b32.xlu0 %v4569_v10, %s4065_s16 }
 0xb4d   : > { %3013 = vmatpush.bf16.xpose.msra.mxu3 %v3003_v49  ;;  %v2404_v35 = vpop.f32.mrf.mxu0 }
 0xb4f   : > { %v2977_v2 = vpop.permute.xlu2 %2976 }
 0xb50   : > { %v2997_v8 = vsel %vm695_vm2, %v2977_v2, 0 }
 0xb52   : > { %3258 = vmatpush.bf16.xpose.msrb.mxu1 %v3240_v42  ;;  %v2754_v42 = vpack.c.b16 %v2753_v33, %v2753_v33 }
 0xb53   : > { %2664 = vrot.lane.b32.xlu0 %v4796_v47, %s4065_s16 }
 0xb55   : > { %3014 = vmatpush.bf16.xpose.msra.mxu3 %v3000_v18 }
 0xb57   : > { %v3212_v25 = vpop.permute.xlu2 %3211 }
 0xb59   : > { %3816 = vmatmul.msk.bf16.vlgmr.msrb.gmra.mxu1 %vm695_vm2, %v3212_v25 }
 0xb5b   : > { %3398 = vrot.lane.b32.xlu0 %v5086_v9, %s4065_s16 }
 0xb5d   : > { %3015 = vmatpush.bf16.xpose.msra.mxu3 %v2997_v8 }
 0xb5f   : > { %v3214_v10 = vpop.permute.xlu2 %3213 }
 0xb60   : > { %3217 = vrot.lane.b32.xlu1 %v5120_v27, %s4063_s14 }
 0xb63   : > { %3160 = vrot.lane.b32.xlu0 %v5114_v39, %s4062_s13 }
 0xb67   : > { %v3216_v28 = vpop.permute.xlu2 %3215 }
 0xb69   : > { %3817 = vmatmul.msk.bf16.gmra.mxu1 %vm695_vm2, %v3214_v10  ;;  %v2755_v10 = vrot.slane %v2754_v42, 2 }
 0xb75   : > { %v2555_v43 = vpop.xlane.xlu1 %2554 }
 0xb76   : > { %3978 = vrcp.f32 %v2555_v43  ;;  %v5195_v47 = vpop.f32.mrf.mxu1 }
 0xb79   : > { %3818 = vmatmul.msk.bf16.gmra.mxu1 %vm695_vm2, %v3216_v28 }
 0xb7c   : > { %v3979_v46 = vpop.eup %3978 }
 0xb7d   : > { %v2571_v55 = vmul.f32 %v3979_v46, %v5148_v63 }
 0xb7e   : > { %v2620_v51 = vpop.f32.mrf.mxu1 }
 0xb7f   : > { %v2579_v36 = vpack.c.bf16 %v2571_v55, %v2571_v55  ;;  %v2769_v51 = vsel %vm1643_vm10, %v2755_v10, 0 }
 0xb81   : > { %3793 = vmatmul.msk.bf16.vlgmr.msrb.gmra.mxu3 %vm353_vm1, %v2579_v36 }
 0xb86   : > { %v5200_v29 = vpop.f32.mrf.mxu1 }
 0xb8e   : > { %v2704_v26 = vpop.f32.mrf.mxu1 }
 0xb91   : > { %3808 = vmatmul.msk.bf16.vlgmr.msra.gmra.mxu3 %vm695_vm2, %v5080_v12 }
 0xb96   : > { %v5204_v30 = vpop.f32.mrf.mxu1 }
 0xb9e   : > { %v5206_v37 = vpop.f32.mrf.mxu1 }
 0xba1   : > { %3809 = vmatmul.msk.bf16.gmra.mxu3 %vm695_vm2, %v5090_v44 }
 0xba6   : > { %v5210_v6 = vpop.f32.mrf.mxu1 }
 0xbaa   : > { %v2486_v1 = vpop.xlane.xlu0 %2485 }
 0xbab   : > { %v2508_v63 = vsub.f32 %v5164_v61, %v2486_v1 }
 0xbad   : > { %v2516_v21 = vmul.f32 1.442695, %v2508_v63 }
 0xbae   : > { %v5213_v16 = vpop.f32.mrf.mxu1 }
 0xbaf   : > { %3980 = vpow2.f32 %v2516_v21 }
 0xbb1   : > { %3810 = vmatmul.msk.bf16.gmra.mxu3 %vm695_vm2, %v5107_v50 }
 0xbb5   : > { %v5217_v12 = vpop.eup %3980 }
 0xbb6   : > { %v5219_v19 = vpop.f32.mrf.mxu3  ;;  %v5221_v58 = vpop.f32.mrf.mxu1  ;;  %v2532_v44 = vsel %vm353_vm1, %v5217_v12, 0.0 }
 0xbb7   : > { %2533 = vadd.xlane.f32.xlu2 %v2532_v44 }
 0xbba   : > { %v2498_v14 = vpop.xlane.xlu1 %2497 }
 0xbbb   : > { %v2512_v48 = vsub.f32 %v2402_v52, %v2498_v14 }
 0xbbd   : > { %v2524_v56 = vmul.f32 1.442695, %v2512_v48  ;;  %v2581_v31 = vpop.permute.xlu0 %2580 }
 0xbbe   : > { %v2586_v41 = vsel %vm633_vm0, %v2581_v31, 0  ;;  %v2662_v24 = vpop.f32.mrf.mxu3  ;;  %v5226_v4 = vpop.f32.mrf.mxu1 }
 0xbbf   : > { %3982 = vpow2.f32 %v2524_v56  ;;  %2595 = vmatpush.bf16.msra.mxu0 %v2586_v41 }
 0xbc1   : > { %3811 = vmatmul.msk.bf16.gmra.mxu3 %vm695_vm2, %v5120_v27 }
 0xbc5   : > { %v5230_v50 = vpop.eup %3982  ;;  %v2665_v20 = vpop.permute.xlu0 %2664 }
 0xbc6   : > { %v2670_v61 = vsel %vm633_vm0, %v2665_v20, 0  ;;  %v5233_v23 = vpop.f32.mrf.mxu1  ;;  %v2544_v62 = vsel %vm353_vm1, %v5230_v50, 0.0 }
 0xbc7   : > { %2679 = vmatpush.bf16.msrb.mxu0 %v2670_v61  ;;  %2545 = vadd.xlane.f32.xlu1 %v2544_v62 }
 0xbcd   : > { %v3399_v26 = vpop.permute.xlu0 %3398 }
 0xbce   : > { %v5237_v5 = vpop.f32.mrf.mxu1 }
 0xbcf   : > { %3402 = vrot.lane.b32.xlu2 %v5114_v39, %s4065_s16 }
 0xbd2   : > { %v3218_v40 = vpop.permute.xlu1 %3217 }
 0xbd3   : > { %3819 = vmatmul.msk.bf16.gmra.mxu1 %vm695_vm2, %v3218_v40 }
 0xbd5   : > { %v3161_v48 = vpop.permute.xlu0 %3160 }
 0xbd6   : > { %v5242_v27 = vpop.f32.mrf.mxu1 }
 0xbd7   : > { %v3280_v34 = vsel %vm3037_vm11, %v5242_v27, -inf }
 0xbd8   : > { %3281 = vmax.xlane.f32.xlu0 %v3280_v34 }
 0xbde   : > { %v5250_v60 = vpop.f32.mrf.mxu1 }
 0xbdf   : > { %v3283_v54 = vsel %vm3037_vm11, %v5250_v60, -inf }
 0xbe0   : > { %3400 = vrot.lane.b32.xlu1 %v5103_v38, %s4065_s16 }
 0xbe6   : > { %v5254_v39 = vpop.f32.mrf.mxu1 }
 0xbe7   : > { %v3286_v7 = vsel %vm3037_vm11, %v5254_v39, -inf }
 0xbe8   : > { %3158 = vrot.lane.b32.xlu1 %v5103_v38, %s4062_s13 }
 0xbec   : > { %3396 = vrot.lane.b32.xlu0 %v5078_v17, %s4065_s16  ;;  %s5435_s16 = scalar_lea.vmem %s5531_s6, %s4118_s28 }
 0xbee   : > { %v5256_v13 = vpop.f32.mrf.mxu1 }
 0xbef   : > { %v3289_v25 = vsel %vm3037_vm11, %v5256_v13, -inf }
 0xbf6   : > { %v5260_v15 = vpop.f32.mrf.mxu1 }
 0xbf7   : > { %v3292_v8 = vsel %vm3037_vm11, %v5260_v15, -inf }
 0xbfe   : > { %v5264_v45 = vpop.f32.mrf.mxu1 }
 0xbff   : > { %v3295_v52 = vsel %vm3037_vm11, %v5264_v45, -inf }
 0xc04   : > { %v5258_v3 = vpop.f32.mrf.mxu3 }
 0xc0c   : > { %v2746_v59 = vpop.f32.mrf.mxu3 }
 0xc12   : > { %3287 = vmax.xlane.f32.xlu1 %v3286_v7 }
 0xc14   : > { %v5266_v38 = vpop.f32.mrf.mxu3 }
 0xc15   : > { %v3038_v22 = vsel %vm3037_vm11, %v5266_v38, -inf }
 0xc16   : > { %3296 = vmax.xlane.f32.xlu0 %v3295_v52  ;;  %3039 = vmax.xlane.f32.xlu2 %v3038_v22 }
 0xc1c   : > { %v5272_v0 = vpop.f32.mrf.mxu3 }
 0xc1d   : > { %v3041_v49 = vsel %vm3037_vm11, %v5272_v0, -inf }
 0xc1e   : > { %3284 = vmax.xlane.f32.xlu2 %v3283_v54 }
 0xc24   : > { %v5276_v32 = vpop.f32.mrf.mxu3 }
 0xc25   : > { %v3044_v35 = vsel %vm3037_vm11, %v5276_v32, -inf }
 0xc26   : > { %3042 = vmax.xlane.f32.xlu2 %v3041_v49  ;;  %3045 = vmax.xlane.f32.xlu1 %v3044_v35 }
 0xc2a   : > { %v2534_v2 = vpop.xlane.xlu2 %2533 }
 0xc2b   : > { %3984 = vrcp.f32 %v2534_v2 }
 0xc2c   : > { %v5283_v18 = vpop.f32.mrf.mxu3 }
 0xc2d   : > { %v3047_v36 = vsel %vm3037_vm11, %v5283_v18, -inf }
 0xc2e   : > { %3290 = vmax.xlane.f32.xlu2 %v3289_v25  ;;  %3293 = vmax.xlane.f32.xlu1 %v3292_v8 }
 0xc31   : > { %v3985_v43 = vpop.eup %3984 }
 0xc32   : > { %v2564_v28 = vmul.f32 %v3985_v43, %v5217_v12  ;;  %v3403_v46 = vpop.permute.xlu2 %3402 }
 0xc33   : > { %3424 = vmatpush.bf16.msrb.mxu2 %v3403_v46 }
 0xc34   : > { %v2572_v53 = vpack.c.bf16 %v2564_v28, %v2564_v28  ;;  %v5290_v55 = vpop.f32.mrf.mxu3 }
 0xc35   : > { %v3050_v21 = vsel %vm3037_vm11, %v5290_v55, -inf }
 0xc36   : > { %3786 = vmatmul.msk.bf16.vlgmr.msra.gmra.mxu0 %vm353_vm1, %v2572_v53  ;;  %3048 = vmax.xlane.f32.xlu2 %v3047_v36 }
 0xc37   : > { %2778 = vmatpush.bf16.msra.mxu0 %v2769_v51 }
 0xc3a   : > { %v2546_v1 = vpop.xlane.xlu1 %2545 }
 0xc3b   : > { %3986 = vrcp.f32 %v2546_v1 }
 0xc3c   : > { %v5296_v63 = vpop.f32.mrf.mxu3 }
 0xc3d   : > { %v3053_v12 = vsel %vm3037_vm11, %v5296_v63, -inf }
 0xc3e   : > { %3051 = vmax.xlane.f32.xlu2 %v3050_v21  ;;  %3054 = vmax.xlane.f32.xlu1 %v3053_v12 }
 0xc41   : > { %v3987_v44 = vpop.eup %3986 }
 0xc42   : > { %v2568_v14 = vmul.f32 %v3987_v44, %v5230_v50 }
 0xc44   : > { %v2576_v56 = vpack.c.bf16 %v2568_v14, %v2568_v14  ;;  %v5309_v40 = vpop.f32.mrf.mxu3 }
 0xc45   : > { %v3056_v7 = vsel %vm3037_vm11, %v5309_v40, -inf }
 0xc46   : > { %3790 = vmatmul.msk.bf16.vlgmr.msrb.gmra.mxu0 %vm353_vm1, %v2576_v56 }
 0xc47   : > { %3182 = vmatpush.bf16.msrb.mxu0 %v3161_v48 }
 0xc4b   : > { %v3282_v31 = vpop.xlane.xlu0 %3281 }
 0xc4c   : > { %v3304_v41 = vsub.f32 %v5242_v27, %v3282_v31  ;;  %v5321_v22 = vpop.f32.mrf.mxu3 }
 0xc4d   : > { %v3059_v49 = vsel %vm3037_vm11, %v5321_v22, -inf }
 0xc4e   : > { %v3312_v24 = vmul.f32 1.442695, %v3304_v41 }
 0xc50   : > { %3988 = vpow2.f32 %v3312_v24  ;;  %v5305_v20 = vpop.f32.mrf.mxu1 }
 0xc51   : > { %v3298_v61 = vsel %vm3037_vm11, %v5305_v20, -inf }
 0xc52   : > { %v3401_v62 = vpop.permute.xlu1 %3400  ;;  %3299 = vmax.xlane.f32.xlu0 %v3298_v61 }
 0xc53   : > { %3425 = vmatpush.bf16.msrb.mxu2 %v3401_v62 }
 0xc56   : > { %v5311_v50 = vpop.eup %3988 }
 0xc57   : > { %3426 = vmatpush.bf16.msrb.mxu2 %v3399_v26  ;;  %v3328_v34 = vsel %vm3037_vm11, %v5311_v50, 0.0 }
 0xc58   : > { %v5315_v59 = vpop.f32.mrf.mxu1  ;;  %3329 = vadd.xlane.f32.xlu1 %v3328_v34 }
 0xc59   : > { %v3301_v27 = vsel %vm3037_vm11, %v5315_v59, -inf }
 0xc5a   : > { %v3159_v52 = vpop.permute.xlu1 %3158  ;;  %3302 = vmax.xlane.f32.xlu2 %v3301_v27  ;;  %3057 = vmax.xlane.f32.xlu0 %v3056_v7 }
 0xc5b   : > { %3183 = vmatpush.bf16.msrb.mxu0 %v3159_v52 }
 0xc5e   : > { %v3397_v54 = vpop.permute.xlu0 %3396 }
 0xc5f   : > { %3427 = vmatpush.bf16.msrb.mxu2 %v3397_v54 }
 0xc62   : > { %3060 = vmax.xlane.f32.xlu0 %v3059_v49 }
 0xc85   : > { %v3288_v42 = vpop.xlane.xlu1 %3287 }
 0xc86   : > { %v3306_v10 = vsub.f32 %v5254_v39, %v3288_v42 }
 0xc88   : > { %v3316_v53 = vmul.f32 1.442695, %v3306_v10 }
 0xc89   : > { %v3040_v35 = vpop.xlane.xlu2 %3039  ;;  %v3297_v62 = vpop.xlane.xlu0 %3296 }
 0xc8a   : > { %v3062_v33 = vsub.f32 %v5266_v38, %v3040_v35 }
 0xc8c   : > { %v3070_v2 = vmul.f32 1.442695, %v3062_v33 }
 0xc8e   : > { %3990 = vpow2.f32 %v3070_v2 }
 0xc91   : > { %v3285_v25 = vpop.xlane.xlu2 %3284 }
 0xc92   : > { %v3305_v8 = vsub.f32 %v5250_v60, %v3285_v25 }
 0xc94   : > { %v3314_v43 = vmul.f32 1.442695, %v3305_v8  ;;  %v5328_v28 = vpop.eup %3990 }
 0xc95   : > { %v3086_v46 = vsel %vm3037_vm11, %v5328_v28, 0.0 }
 0xc96   : > { %3992 = vpow2.f32 %v3314_v43  ;;  %3087 = vadd.xlane.f32.xlu2 %v3086_v46  ;;  %v2749_v43 = vpack.c.bf16 %v5219_v19, %v5055_v11 }
 0xc97   : > { %3994 = vpow2.f32 %v3316_v53 }
 0xc99   : > { %v3043_v51 = vpop.xlane.xlu2 %3042  ;;  %v5346_v48 = vpop.xlane.xlu1 %3045 }
 0xc9a   : > { %v3063_v38 = vsub.f32 %v5272_v0, %v3043_v51 }
 0xc9c   : > { %v5333_v36 = vpop.eup %3992  ;;  %v3072_v26 = vmul.f32 1.442695, %v3063_v38 }
 0xc9d   : > { %v3331_v60 = vsel %vm3037_vm11, %v5333_v36, 0.0  ;;  %v5337_v1 = vpop.eup %3994 }
 0xc9e   : > { %3996 = vpow2.f32 %v3072_v26  ;;  %3332 = vadd.xlane.f32.xlu0 %v3331_v60  ;;  %v3334_v14 = vsel %vm3037_vm11, %v5337_v1, 0.0 }
 0xca1   : > { %v3291_v39 = vpop.xlane.xlu2 %3290  ;;  %v3294_v34 = vpop.xlane.xlu1 %3293 }
 0xca2   : > { %v3307_v21 = vsub.f32 %v5256_v13, %v3291_v39 }
 0xca4   : > { %v5340_v12 = vpop.eup %3996  ;;  %v3318_v44 = vmul.f32 1.442695, %v3307_v21  ;;  %v3308_v21 = vsub.f32 %v5260_v15, %v3294_v34  ;;  %v2751_v15 = vpack.c.bf16 %v5258_v3, %v5063_v57 }
 0xca5   : > { %v3089_v0 = vsel %vm3037_vm11, %v5340_v12, 0.0 }
 0xca6   : > { %3998 = vpow2.f32 %v3318_v44  ;;  %3090 = vadd.xlane.f32.xlu1 %v3089_v0  ;;  %3335 = vadd.xlane.f32.xlu0 %v3334_v14  ;;  %v3064_v14 = vsub.f32 %v5276_v32, %v5346_v48 }
 0xca9   : > { %v3049_v56 = vpop.xlane.xlu2 %3048 }
 0xcaa   : > { %v3065_v31 = vsub.f32 %v5283_v18, %v3049_v56  ;;  %v3309_v18 = vsub.f32 %v5264_v45, %v3297_v62 }
 0xcac   : > { %v5349_v41 = vpop.eup %3998  ;;  %v3076_v13 = vmul.f32 1.442695, %v3065_v31  ;;  %v3322_v33 = vmul.f32 1.442695, %v3309_v18  ;;  %v3074_v31 = vmul.f32 1.442695, %v3064_v14 }
 0xcad   : > { %v3337_v24 = vsel %vm3037_vm11, %v5349_v41, 0.0 }
 0xcae   : > { %4000 = vpow2.f32 %v3076_v13  ;;  %3338 = vadd.xlane.f32.xlu2 %v3337_v24 }
 0xcb1   : > { %v3052_v61 = vpop.xlane.xlu2 %3051  ;;  %v3055_v2 = vpop.xlane.xlu1 %3054 }
 0xcb2   : > { %v3066_v27 = vsub.f32 %v5290_v55, %v3052_v61  ;;  %v3067_v55 = vsub.f32 %v5296_v63, %v3055_v2 }
 0xcb3   : > { %v2597_v7 = vpop.f32.mrf.mxu0 }
 0xcb4   : > { %v5354_v52 = vpop.eup %4000  ;;  %v3078_v54 = vmul.f32 1.442695, %v3066_v27  ;;  %v2748_v49 = vpack.c.bf16 %v5195_v47, %v2597_v7  ;;  %v3080_v45 = vmul.f32 1.442695, %v3067_v55 }
 0xcb5   : > { %v3095_v35 = vsel %vm3037_vm11, %v5354_v52, 0.0 }
 0xcb6   : > { %4002 = vpow2.f32 %v3078_v54  ;;  %3794 = vmatmul.msk.bf16.vlgmr.msra.gmra.mxu0 %vm695_vm2, %v2748_v49  ;;  %3096 = vadd.xlane.f32.xlu0 %v3095_v35 }
 0xcb7   : > { %4004 = vpow2.f32 %v3322_v33 }
 0xcb8   : > { %4006 = vpow2.f32 %v3080_v45 }
 0xcbb   : > { %v2599_v42 = vpop.f32.mrf.mxu0 }
 0xcbc   : > { %v5361_v25 = vpop.eup %4002 }
 0xcbd   : > { %v3098_v47 = vsel %vm3037_vm11, %v5361_v25, 0.0  ;;  %v5368_v8 = vpop.eup %4004 }
 0xcbe   : > { %3099 = vadd.xlane.f32.xlu0 %v3098_v47  ;;  %v3343_v63 = vsel %vm3037_vm11, %v5368_v8, 0.0  ;;  %v5378_v51 = vpop.eup %4006 }
 0xcbf   : > { %3154 = vrot.lane.b32.xlu1 %v5078_v17, %s4062_s13  ;;  %v3101_v19 = vsel %vm3037_vm11, %v5378_v51, 0.0 }
 0xcc3   : > { %v2681_v10 = vpop.f32.mrf.mxu0 }
 0xcc5   : > { %v3300_v46 = vpop.xlane.xlu0 %3299 }
 0xcc6   : > { %v3310_v53 = vsub.f32 %v5305_v20, %v3300_v46  ;;  %3795 = vmatmul.msk.bf16.gmra.mxu0 %vm695_vm2, %v2749_v43  ;;  %3156 = vrot.lane.b32.xlu2 %v5086_v9, %s4062_s13  ;;  %v2750_v9 = vpack.c.bf16 %v5200_v29, %v2681_v10 }
 0xcc7   : > { %3344 = vadd.xlane.f32.xlu0 %v3343_v63 }
 0xcc8   : > { %v3324_v17 = vmul.f32 1.442695, %v3310_v53 }
 0xcca   : > { %4008 = vpow2.f32 %v3324_v17 }
 0xccb   : > { %v2683_v38 = vpop.f32.mrf.mxu0  ;;  %v3330_v7 = vpop.xlane.xlu1 %3329 }
 0xccd   : > { %v3058_v26 = vpop.xlane.xlu0 %3057  ;;  %v3303_v13 = vpop.xlane.xlu2 %3302 }
 0xcce   : > { %v3068_v11 = vsub.f32 %v5309_v40, %v3058_v26  ;;  %v3320_v40 = vmul.f32 1.442695, %v3308_v21  ;;  %v3311_v62 = vsub.f32 %v5315_v59, %v3303_v13 }
 0xccf   : > { %3102 = vadd.xlane.f32.xlu0 %v3101_v19 }
 0xcd0   : > { %v3082_v20 = vmul.f32 1.442695, %v3068_v11  ;;  %v5383_v60 = vpop.eup %4008  ;;  %v3326_v48 = vmul.f32 1.442695, %v3311_v62 }
 0xcd1   : > { %v3346_v39 = vsel %vm3037_vm11, %v5383_v60, 0.0 }
 0xcd2   : > { %4010 = vpow2.f32 %v3082_v20 }
 0xcd3   : > { %4012 = vpow2.f32 %v3320_v40 }
 0xcd4   : > { %4014 = vpow2.f32 %v3074_v31 }
 0xcd5   : > { %v3061_v0 = vpop.xlane.xlu0 %3060 }
 0xcd6   : > { %3796 = vmatmul.msk.bf16.gmra.mxu0 %vm695_vm2, %v2750_v9  ;;  %v3069_v29 = vsub.f32 %v5321_v22, %v3061_v0 }
 0xcd7   : > { %3347 = vadd.xlane.f32.xlu0 %v3346_v39 }
 0xcd8   : > { %v5390_v44 = vpop.eup %4010  ;;  %v3084_v24 = vmul.f32 1.442695, %v3069_v29 }
 0xcd9   : > { %v3104_v56 = vsel %vm3037_vm11, %v5390_v44, 0.0  ;;  %v5399_v61 = vpop.eup %4012 }
 0xcda   : > { %4016 = vpow2.f32 %v3084_v24  ;;  %v3340_v32 = vsel %vm3037_vm11, %v5399_v61, 0.0  ;;  %v5405_v22 = vpop.eup %4014 }
 0xcdb   : > { %4018 = vpow2.f32 %v3326_v48  ;;  %v3092_v57 = vsel %vm3037_vm11, %v5405_v22, 0.0 }
 0xcdc   : > { %4020 = vrcp.f32 %v3330_v7 }
 0xcdf   : > { %3105 = vadd.xlane.f32.xlu0 %v3104_v56 }
 0xce0   : > { %v5407_v34 = vpop.eup %4016 }
 0xce1   : > { %v3107_v3 = vsel %vm3037_vm11, %v5407_v34, 0.0  ;;  %v5413_v59 = vpop.eup %4018 }
 0xce2   : > { %v3349_v27 = vsel %vm3037_vm11, %v5413_v59, 0.0  ;;  %v4021_v49 = vpop.eup %4020 }
 0xce3   : > { %v3360_v18 = vmul.f32 %v4021_v49, %v5311_v50 }
 0xce5   : > { %v3368_v33 = vpack.c.bf16 %v3360_v18, %v3360_v18 }
 0xce6   : > { %3797 = vmatmul.msk.bf16.gmra.mxu0 %vm695_vm2, %v2751_v15 }
 0xce7   : > { %v3384_v10 = vunpack.c.l.b16 %v3368_v33 }
 0xce9   : > { %3341 = vadd.xlane.f32.xlu1 %v3340_v32 }
 0xcef   : > { %3093 = vadd.xlane.f32.xlu2 %v3092_v57 }
 0xcf1   : > { %3108 = vadd.xlane.f32.xlu1 %v3107_v3 }
 0xcf7   : > { %3350 = vadd.xlane.f32.xlu2 %v3349_v27 }
 0xd09   : > { %v3088_v2 = vpop.xlane.xlu2 %3087 }
 0xd11   : > { %v3333_v54 = vpop.xlane.xlu0 %3332 }
 0xd12   : > { %4022 = vrcp.f32 %v3333_v54 }
 0xd18   : > { %v4023_v35 = vpop.eup %4022 }
 0xd19   : > { %v3361_v42 = vmul.f32 %v4023_v35, %v5333_v36  ;;  %v3336_v55 = vpop.xlane.xlu0 %3335  ;;  %v3091_v45 = vpop.xlane.xlu1 %3090 }
 0xd1a   : > { %4024 = vrcp.f32 %v3336_v55 }
 0xd1b   : > { %v3369_v47 = vpack.c.bf16 %v3361_v42, %v3361_v42  ;;  %4026 = vrcp.f32 %v3091_v45 }
 0xd1c   : > { %4028 = vrcp.f32 %v3088_v2 }
 0xd1d   : > { %v3385_v43 = vunpack.c.l.b16 %v3369_v47 }
 0xd1f   : > { %v3392_v46 = vpack.c.b16 %v3385_v43, %v3384_v10 }
 0xd20   : > { %v4025_v63 = vpop.eup %4024 }
 0xd21   : > { %v3339_v53 = vpop.xlane.xlu2 %3338  ;;  %3820 = vmatmul.msk.bf16.vlgmr.msrb.gmra.mxu2 %vm3037_vm11, %v3392_v46  ;;  %v4027_v50 = vpop.eup %4026  ;;  %v3362_v17 = vmul.f32 %v4025_v63, %v5337_v1 }
 0xd22   : > { %4030 = vrcp.f32 %v3339_v53  ;;  %v4029_v38 = vpop.eup %4028  ;;  %v3119_v36 = vmul.f32 %v4027_v50, %v5340_v12 }
 0xd23   : > { %v3118_v11 = vmul.f32 %v4029_v38, %v5328_v28  ;;  %v3370_v19 = vpack.c.bf16 %v3362_v17, %v3362_v17  ;;  %v5428_v28 = vld [vmem:[%s5529_s4 + $0x1] ss:$0 sm:$0xff] }
 0xd24   : > { %v3127_v39 = vpack.c.bf16 %v3119_v36, %v3119_v36 }
 0xd25   : > { %v3126_v40 = vpack.c.bf16 %v3118_v11, %v3118_v11  ;;  %v3386_v0 = vunpack.c.l.b16 %v3370_v19 }
 0xd26   : > { %v3143_v56 = vunpack.c.l.b16 %v3127_v39 }
 0xd27   : > { %v3142_v1 = vunpack.c.l.b16 %v3126_v40 }
 0xd28   : > { %v4031_v26 = vpop.eup %4030 }
 0xd29   : > { %v3363_v20 = vmul.f32 %v4031_v26, %v5349_v41  ;;  %v3157_v9 = vpop.permute.xlu2 %3156  ;;  %v3150_v12 = vpack.c.b16 %v3143_v56, %v3142_v1  ;;  %v3097_v62 = vpop.xlane.xlu0 %3096 }
 0xd2a   : > { %3184 = vmatpush.bf16.msrb.mxu0 %v3157_v9 }
 0xd2b   : > { %v3371_v21 = vpack.c.bf16 %v3363_v20, %v3363_v20 }
 0xd2d   : > { %v3387_v14 = vunpack.c.l.b16 %v3371_v21 }
 0xd2f   : > { %v3393_v29 = vpack.c.b16 %v3387_v14, %v3386_v0 }
 0xd31   : > { %v3155_v31 = vpop.permute.xlu1 %3154  ;;  %3821 = vmatmul.msk.bf16.gmra.mxu2 %vm3037_vm11, %v3393_v29  ;;  %v3100_v3 = vpop.xlane.xlu0 %3099 }
 0xd32   : > { %3185 = vmatpush.bf16.msrb.mxu0 %v3155_v31 }
 0xd33   : > { %v2780_v41 = vpop.f32.mrf.mxu0 }
 0xd34   : > { %v2825_v13 = vadd.f32 %v5204_v30, %v2780_v41 }
 0xd35   : > { %3812 = vmatmul.msk.bf16.vlgmr.msrb.gmra.mxu0 %vm3037_vm11, %v3150_v12 }
 0xd36   : > { %v2845_v24 = vadd.f32 %v5428_v28, %v2825_v13 }
 0xd38   : > { %3562 = vst.msk [vmem:[%s5435_s16] sm:$0xff] %vm353_vm1, %v2845_v24 }
 0xd3a   : > { %v3345_v18 = vpop.xlane.xlu0 %3344 }
 0xd3b   : > { %v2782_v15 = vpop.f32.mrf.mxu0  ;;  %4032 = vrcp.f32 %v3345_v18 }
 0xd3c   : > { %v2827_v32 = vadd.f32 %v5206_v37, %v2782_v15  ;;  %4034 = vrcp.f32 %v3097_v62 }
 0xd3e   : > { %v2846_v30 = vadd.f32 %v5428_v28, %v2827_v32 }
 0xd40   : > { %3563 = vst.msk [vmem:[%s5435_s16 + $0x8] sm:$0xff] %vm353_vm1, %v2846_v30 }
 0xd41   : > { %v4033_v55 = vpop.eup %4032 }
 0xd42   : > { %v3365_v45 = vmul.f32 %v4033_v55, %v5368_v8 }
 0xd43   : > { %v2785_v48 = vpop.f32.mrf.mxu0 }
 0xd44   : > { %v2830_v57 = vadd.f32 %v5210_v6, %v2785_v48  ;;  %v3103_v6 = vpop.xlane.xlu0 %3102  ;;  %v3373_v53 = vpack.c.bf16 %v3365_v45, %v3365_v45 }
 0xd46   : > { %v2847_v27 = vadd.f32 %v5428_v28, %v2830_v57  ;;  %v3389_v8 = vunpack.c.l.b16 %v3373_v53 }
 0xd48   : > { %3564 = vst.msk [vmem:[%s5435_s16 + $0x10] sm:$0xff] %vm353_vm1, %v2847_v27 }
 0xd4b   : > { %v2787_v7 = vpop.f32.mrf.mxu0 }
 0xd4c   : > { %v2832_v54 = vadd.f32 %v5213_v16, %v2787_v7  ;;  %v3348_v63 = vpop.xlane.xlu0 %3347  ;;  %v3803_v7 = vld [vmem:[%s5528_s3 + $0x8] sm:$0xf] }
 0xd4e   : > { %v2848_v49 = vadd.f32 %v5428_v28, %v2832_v54 }
 0xd50   : > { %3565 = vst.msk [vmem:[%s5435_s16 + $0x18] sm:$0xff] %vm353_vm1, %v2848_v49  ;;  %v3454_v49 = vunpack.c.l.b16 %v3803_v7 }
 0xd53   : > { %v2790_v37 = vpop.f32.mrf.mxu0 }
 0xd54   : > { %v2835_v35 = vadd.f32 %v5221_v58, %v2790_v37  ;;  %v4035_v58 = vpop.eup %4034  ;;  %v3106_v30 = vpop.xlane.xlu0 %3105  ;;  %v3455_v37 = vpack.c.b16 %v3454_v49, %v3454_v49 }
 0xd55   : > { %v3121_v17 = vmul.f32 %v4035_v58, %v5354_v52 }
 0xd56   : > { %v2849_v33 = vadd.f32 %v5428_v28, %v2835_v35 }
 0xd57   : > { %v3129_v19 = vpack.c.bf16 %v3121_v17, %v3121_v17 }
 0xd58   : > { %3566 = vst.msk [vmem:[%s5435_s16 + $0x20] sm:$0xff] %vm353_vm1, %v2849_v33  ;;  %v3456_v33 = vrot.slane %v3455_v37, 2 }
 0xd59   : > { %v3145_v40 = vunpack.c.l.b16 %v3129_v19 }
 0xd5b   : > { %v2792_v2 = vpop.f32.mrf.mxu0 }
 0xd5c   : > { %v2837_v42 = vadd.f32 %v5226_v4, %v2792_v2  ;;  %v3342_v16 = vpop.xlane.xlu1 %3341  ;;  %v3470_v2 = vsel %vm1643_vm10, %v3456_v33, 0 }
 0xd5d   : > { %4036 = vrcp.f32 %v3342_v16  ;;  %3479 = vmatpush.bf16.msrb.mxu3 %v3470_v2 }
 0xd5e   : > { %v2850_v47 = vadd.f32 %v5428_v28, %v2837_v42 }
 0xd60   : > { %3567 = vst.msk [vmem:[%s5435_s16 + $0x28] sm:$0xff] %vm353_vm1, %v2850_v47 }
 0xd62   : > { %v3094_v10 = vpop.xlane.xlu2 %3093 }
 0xd63   : > { %v4037_v43 = vpop.eup %4036  ;;  %4038 = vrcp.f32 %v3094_v10  ;;  %v2795_v46 = vpop.f32.mrf.mxu0 }
 0xd64   : > { %v3364_v50 = vmul.f32 %v4037_v43, %v5399_v61  ;;  %v2840_v4 = vadd.f32 %v5233_v23, %v2795_v46  ;;  %4040 = vrcp.f32 %v3348_v63  ;;  %v3109_v32 = vpop.xlane.xlu1 %3108 }
 0xd65   : > { %4042 = vrcp.f32 %v3103_v6 }
 0xd66   : > { %v3372_v38 = vpack.c.bf16 %v3364_v50, %v3364_v50  ;;  %v2851_v36 = vadd.f32 %v5428_v28, %v2840_v4 }
 0xd68   : > { %v3388_v26 = vunpack.c.l.b16 %v3372_v38  ;;  %3568 = vst.msk [vmem:[%s5435_s16 + $0x30] sm:$0xff] %vm353_vm1, %v2851_v36 }
 0xd69   : > { %v4039_v11 = vpop.eup %4038 }
 0xd6a   : > { %v3120_v20 = vmul.f32 %v4039_v11, %v5405_v22  ;;  %v3351_v9 = vpop.xlane.xlu2 %3350  ;;  %v3394_v61 = vpack.c.b16 %v3389_v8, %v3388_v26  ;;  %v4041_v21 = vpop.eup %4040 }
 0xd6b   : > { %4044 = vrcp.f32 %v3351_v9  ;;  %v2797_v23 = vpop.f32.mrf.mxu0  ;;  %v4043_v56 = vpop.eup %4042  ;;  %v3366_v29 = vmul.f32 %v4041_v21, %v5383_v60  ;;  %v3859_v21 = vld [vmem:[%s5529_s4 + $0x2] ss:$0 sm:$0xff] }
 0xd6c   : > { %v3128_v39 = vpack.c.bf16 %v3120_v20, %v3120_v20  ;;  %v2842_v52 = vadd.f32 %v5237_v5, %v2797_v23  ;;  %3822 = vmatmul.msk.bf16.gmra.mxu2 %vm3037_vm11, %v3394_v61  ;;  %4046 = vrcp.f32 %v3100_v3  ;;  %v3123_v12 = vmul.f32 %v4043_v56, %v5378_v51 }
 0xd6d   : > { %v3374_v41 = vpack.c.bf16 %v3366_v29, %v3366_v29  ;;  %4048 = vrcp.f32 %v3109_v32 }
 0xd6e   : > { %v3144_v0 = vunpack.c.l.b16 %v3128_v39  ;;  %v2852_v14 = vadd.f32 %v5428_v28, %v2842_v52  ;;  %v3131_v28 = vpack.c.bf16 %v3123_v12, %v3123_v12  ;;  %4050 = vrcp.f32 %v3106_v30 }
 0xd6f   : > { %v3390_v62 = vunpack.c.l.b16 %v3374_v41 }
 0xd70   : > { %3569 = vst.msk [vmem:[%s5435_s16 + $0x38] sm:$0xff] %vm353_vm1, %v2852_v14  ;;  %v3151_v22 = vpack.c.b16 %v3145_v40, %v3144_v0  ;;  %v3147_v57 = vunpack.c.l.b16 %v3131_v28 }
 0xd71   : > { %v4045_v1 = vpop.eup %4044 }
 0xd72   : > { %v3367_v31 = vmul.f32 %v4045_v1, %v5413_v59  ;;  %3813 = vmatmul.msk.bf16.gmra.mxu0 %vm3037_vm11, %v3151_v22  ;;  %v4047_v5 = vpop.eup %4046 }
 0xd73   : > { %v3122_v24 = vmul.f32 %v4047_v5, %v5361_v25  ;;  %v4049_v27 = vpop.eup %4048 }
 0xd74   : > { %v3375_v13 = vpack.c.bf16 %v3367_v31, %v3367_v31  ;;  %v4051_v51 = vpop.eup %4050  ;;  %v3125_v25 = vmul.f32 %v4049_v27, %v5407_v34  ;;  %v3514_v34 = vsel %vm1643_vm10, %v3803_v7, 0 }
 0xd75   : > { %v3130_v60 = vpack.c.bf16 %v3122_v24, %v3122_v24  ;;  %v3124_v54 = vmul.f32 %v4051_v51, %v5390_v44  ;;  %3523 = vmatpush.bf16.msra.mxu0 %v3514_v34 }
 0xd76   : > { %v3391_v15 = vunpack.c.l.b16 %v3375_v13  ;;  %v3133_v18 = vpack.c.bf16 %v3125_v25, %v3125_v25 }
 0xd77   : > { %v3146_v59 = vunpack.c.l.b16 %v3130_v60  ;;  %v3132_v35 = vpack.c.bf16 %v3124_v54, %v3124_v54 }
 0xd78   : > { %v3395_v48 = vpack.c.b16 %v3391_v15, %v3390_v62  ;;  %v3149_v6 = vunpack.c.l.b16 %v3133_v18 }
 0xd79   : > { %v3152_v3 = vpack.c.b16 %v3147_v57, %v3146_v59  ;;  %v3148_v42 = vunpack.c.l.b16 %v3132_v35 }
 0xd7b   : > { %v3153_v16 = vpack.c.b16 %v3149_v6, %v3148_v42 }
 0xd7c   : > { %3823 = vmatmul.msk.bf16.gmra.mxu2 %vm3037_vm11, %v3395_v48 }
 0xd82   : > { %3814 = vmatmul.msk.bf16.gmra.mxu0 %vm3037_vm11, %v3152_v3 }
 0xd92   : > { %3815 = vmatmul.msk.bf16.gmra.mxu0 %vm3037_vm11, %v3153_v16 }
 0xda4   : > { %v3429_v55 = vpop.f32.mrf.mxu2 }
 0xdac   : > { %v3431_v47 = vpop.f32.mrf.mxu2 }
 0xdad   : > { %v3449_v45 = vpack.c.bf16 %v3431_v47, %v3429_v55 }
 0xdaf   : > { %3824 = vmatmul.msk.bf16.vlgmr.msrb.gmra.mxu3 %vm695_vm2, %v3449_v45 }
 0xdb2   : > { %v3187_v44 = vpop.f32.mrf.mxu0 }
 0xdb4   : > { %v3434_v58 = vpop.f32.mrf.mxu2 }
 0xdba   : > { %v3189_v10 = vpop.f32.mrf.mxu0 }
 0xdbb   : > { %v3207_v43 = vpack.c.bf16 %v3189_v10, %v3187_v44 }
 0xdbc   : > { %v3436_v46 = vpop.f32.mrf.mxu2 }
 0xdbd   : > { %v3450_v53 = vpack.c.bf16 %v3436_v46, %v3434_v58  ;;  %3828 = vmatmul.msk.bf16.vlgmr.msra.gmra.mxu0 %vm695_vm2, %v3207_v43 }
 0xdbf   : > { %3825 = vmatmul.msk.bf16.gmra.mxu3 %vm695_vm2, %v3450_v53 }
 0xdef   : > { %v3192_v63 = vpop.f32.mrf.mxu0  ;;  %v3439_v50 = vpop.f32.mrf.mxu2 }
 0xdf7   : > { %v3194_v4 = vpop.f32.mrf.mxu0  ;;  %v3441_v17 = vpop.f32.mrf.mxu2 }
 0xdf8   : > { %v3208_v38 = vpack.c.bf16 %v3194_v4, %v3192_v63  ;;  %v3451_v36 = vpack.c.bf16 %v3441_v17, %v3439_v50 }
 0xdfa   : > { %3826 = vmatmul.msk.bf16.gmra.mxu3 %vm695_vm2, %v3451_v36  ;;  %3829 = vmatmul.msk.bf16.gmra.mxu0 %vm695_vm2, %v3208_v38 }
 0xdff   : > { %v3197_v8 = vpop.f32.mrf.mxu0  ;;  %v3444_v26 = vpop.f32.mrf.mxu2 }
 0xe07   : > { %v3199_v11 = vpop.f32.mrf.mxu0  ;;  %v3446_v19 = vpop.f32.mrf.mxu2 }
 0xe08   : > { %v3209_v20 = vpack.c.bf16 %v3199_v11, %v3197_v8  ;;  %v3452_v9 = vpack.c.bf16 %v3446_v19, %v3444_v26 }
 0xe0a   : > { %3827 = vmatmul.msk.bf16.gmra.mxu3 %vm695_vm2, %v3452_v9  ;;  %3830 = vmatmul.msk.bf16.gmra.mxu0 %vm695_vm2, %v3209_v20 }
 0xe0f   : > { %v3202_v61 = vpop.f32.mrf.mxu0 }
 0xe17   : > { %v3204_v23 = vpop.f32.mrf.mxu0 }
 0xe18   : > { %v3210_v39 = vpack.c.bf16 %v3204_v23, %v3202_v61 }
 0xe1a   : > { %3831 = vmatmul.msk.bf16.gmra.mxu0 %vm695_vm2, %v3210_v39 }
 0xe32   : > { %v3481_v52 = vpop.f32.mrf.mxu3 }
 0xe3a   : > { %v3525_v40 = vpop.f32.mrf.mxu0  ;;  %v3483_v56 = vpop.f32.mrf.mxu3 }
 0xe3b   : > { %v3526_v0 = vadd.f32 %v3525_v40, %v3481_v52 }
 0xe3d   : > { %v3546_v14 = vadd.f32 %v3859_v21, %v3526_v0 }
 0xe3f   : > { %3570 = vst.msk [vmem:[%s5504_s25] sm:$0xff] %vm353_vm1, %v3546_v14 }
 0xe42   : > { %v3527_v29 = vpop.f32.mrf.mxu0  ;;  %v3486_v31 = vpop.f32.mrf.mxu3 }
 0xe43   : > { %v3528_v22 = vadd.f32 %v3527_v29, %v3483_v56 }
 0xe45   : > { %v3547_v1 = vadd.f32 %v3859_v21, %v3528_v22 }
 0xe47   : > { %3571 = vst.msk [vmem:[%s5504_s25 + $0x8] sm:$0xff] %vm353_vm1, %v3547_v1 }
 0xe4a   : > { %v3488_v41 = vpop.f32.mrf.mxu3 }
 0xe77   : > { %v3530_v5 = vpop.f32.mrf.mxu0 }
 0xe78   : > { %v3531_v12 = vadd.f32 %v3530_v5, %v3486_v31 }
 0xe7a   : > { %v3548_v13 = vadd.f32 %v3859_v21, %v3531_v12 }
 0xe7c   : > { %3572 = vst.msk [vmem:[%s5504_s25 + $0x10] sm:$0xff] %vm353_vm1, %v3548_v13 }
 0xe7d   : > { %v3491_v28 = vpop.f32.mrf.mxu3 }
 0xe7f   : > { %v3532_v24 = vpop.f32.mrf.mxu0 }
 0xe80   : > { %v3533_v15 = vadd.f32 %v3532_v24, %v3488_v41 }
 0xe82   : > { %v3549_v62 = vadd.f32 %v3859_v21, %v3533_v15 }
 0xe84   : > { %3573 = vst.msk [vmem:[%s5504_s25 + $0x18] sm:$0xff] %vm353_vm1, %v3549_v62 }
 0xe85   : > { %v3493_v48 = vpop.f32.mrf.mxu3 }
 0xe87   : > { %v3535_v32 = vpop.f32.mrf.mxu0 }
 0xe88   : > { %v3536_v60 = vadd.f32 %v3535_v32, %v3491_v28 }
 0xe8a   : > { %v3550_v30 = vadd.f32 %v3859_v21, %v3536_v60 }
 0xe8c   : > { %3574 = vst.msk [vmem:[%s5504_s25 + $0x20] sm:$0xff] %vm353_vm1, %v3550_v30 }
 0xe8d   : > { %v3496_v27 = vpop.f32.mrf.mxu3 }
 0xe8f   : > { %v3537_v57 = vpop.f32.mrf.mxu0 }
 0xe90   : > { %v3538_v59 = vadd.f32 %v3537_v57, %v3493_v48 }
 0xe92   : > { %v3551_v3 = vadd.f32 %v3859_v21, %v3538_v59 }
 0xe94   : > { %3575 = vst.msk [vmem:[%s5504_s25 + $0x28] sm:$0xff] %vm353_vm1, %v3551_v3 }
 0xe95   : > { %v3498_v54 = vpop.f32.mrf.mxu3 }
 0xe97   : > { %v3540_v51 = vpop.f32.mrf.mxu0 }
 0xe98   : > { %v3541_v25 = vadd.f32 %v3540_v51, %v3496_v27 }
 0xe9a   : > { %v3552_v7 = vadd.f32 %v3859_v21, %v3541_v25 }
 0xe9c   : > { %3576 = vst.msk [vmem:[%s5504_s25 + $0x30] sm:$0xff] %vm353_vm1, %v3552_v7 }
 0xe9f   : > { %v3542_v49 = vpop.f32.mrf.mxu0 }
 0xea0   : > { %v3543_v18 = vadd.f32 %v3542_v49, %v3498_v54 }
 0xea2   : > { %v3553_v37 = vadd.f32 %v3859_v21, %v3543_v18 }
 0xea4   : > { %3577 = vst.msk [vmem:[%s5504_s25 + $0x38] sm:$0xff] %vm353_vm1, %v3553_v37 }
 0xea5 PF: > { %s18_s24 = sadd.s32 1, %s4058_s24  }
 0xea6   : > { %p15_p4 = scmp.ge.s32.totalorder %s18_s24, 4  }
 0xea8   :  { %17 = sbr.rel (!%p15_p4) target bundleno = 1 (0x1), region = 105 }

</bundles_post_ra>
